<compile_context>
chip_gen: v5e
topology: v5e:2x2
jax: 0.10.0
libtpu: 0.0.40
codegen_flags: <defaults>
</compile_context>

<pallas_src>
import functools

import jax
import jax.numpy as jnp
from jax.experimental import pallas as pl
from jax.experimental.pallas import tpu as pltpu

# ---------------- model hyper-params (small, but structurally a ViT) ---------
PATCH = 16          # patch_size=16 as in vit_base_patch16_224
EMBED = 128         # embed_dim (768 in vit_base; shrunk for the demo)
DEPTH = 2           # depth (12 in vit_base; shrunk)
HEADS = 4           # num_heads (12 in vit_base; shrunk)
HEAD_DIM = EMBED // HEADS
MLP_HIDDEN = 4 * EMBED
OUT_SIZE = 14       # ChestX-ray14 has 14 labels
OUT_PAD = 128       # head output padded to a full lane group
LN_EPS = 1e-6       # timm ViT LayerNorm eps

_CP = pltpu.CompilerParams(
    dimension_semantics=("arbitrary",),
    vmem_limit_bytes=32 * 1024 * 1024,
)


def _fs(shape):
    """Full-array BlockSpec (single VMEM block, grid=(1,))."""
    nd = len(shape)
    return pl.BlockSpec(shape, lambda i, _nd=nd: (0,) * _nd)


def _ln(x, g, b):
    """LayerNorm over the last axis, f32 math (matches torch biased variance)."""
    mean = jnp.mean(x, axis=-1, keepdims=True)
    var = jnp.mean(jnp.square(x - mean), axis=-1, keepdims=True)
    return (x - mean) * jax.lax.rsqrt(var + jnp.float32(LN_EPS)) * g + b


def _gelu(x):
    """Exact (erf) GELU, matching torch.nn.GELU default, in f32."""
    return 0.5 * x * (1.0 + jax.lax.erf(x * jnp.float32(0.7071067811865476)))


# ------------------------------- Pallas kernels ------------------------------
def _embed_kernel(patches_ref, pw_ref, pb_ref, cls_ref, pos_ref, o_ref, *,
                  batch, n_patches):
    """patch-embed matmul + cls-token concat + positional embedding, fused."""
    seq = n_patches + 1
    p = patches_ref[...].astype(jnp.bfloat16)                       # (B*NP, CPP)
    t = jnp.dot(p, pw_ref[...], preferred_element_type=jnp.float32)  # (B*NP, D)
    t = t + pb_ref[...]
    cls = cls_ref[...]                                              # (1, D) f32
    pos = pos_ref[...]                                              # (seq, D) f32
    for b in range(batch):
        r = b * seq
        o_ref[r:r + 1, :] = (cls + pos[0:1, :]).astype(o_ref.dtype)
        o_ref[r + 1:r + seq, :] = (
            t[b * n_patches:(b + 1) * n_patches, :] + pos[1:, :]
        ).astype(o_ref.dtype)


def _block_kernel(tok_ref,
                  ln1_g_ref, ln1_b_ref, qkv_w_ref, qkv_b_ref,
                  proj_w_ref, proj_b_ref,
                  ln2_g_ref, ln2_b_ref, fc1_w_ref, fc1_b_ref,
                  fc2_w_ref, fc2_b_ref,
                  o_ref, *, batch, seq, heads, head_dim):
    """One full pre-norm transformer block, fused (residuals in epilogue)."""
    D = tok_ref.shape[-1]
    x = tok_ref[...].astype(jnp.float32)                            # (B*N, D)

    # ---- attention sub-block -------------------------------------------------
    h = _ln(x, ln1_g_ref[...], ln1_b_ref[...])
    qkv = jnp.dot(h.astype(jnp.bfloat16), qkv_w_ref[...],
                  preferred_element_type=jnp.float32) + qkv_b_ref[...]  # (B*N, 3D)

    scale = jnp.float32(head_dim) ** jnp.float32(-0.5)
    qb = (qkv[:, 0:D] * scale).astype(jnp.bfloat16)   # scale folded into q
    kb = qkv[:, D:2 * D].astype(jnp.bfloat16)
    vb = qkv[:, 2 * D:3 * D].astype(jnp.bfloat16)

    rows = []
    for b in range(batch):
        r0, r1 = b * seq, (b + 1) * seq
        head_outs = []
        for hh in range(heads):
            c0, c1 = hh * head_dim, (hh + 1) * head_dim
            s = jnp.einsum("qd,kd->qk", qb[r0:r1, c0:c1], kb[r0:r1, c0:c1],
                           preferred_element_type=jnp.float32)      # (N, N)
            s = s - jnp.max(s, axis=-1, keepdims=True)
            p = jnp.exp(s)
            p = p * pl.reciprocal(jnp.sum(p, axis=-1, keepdims=True), approx=True)
            head_outs.append(jnp.dot(p.astype(jnp.bfloat16), vb[r0:r1, c0:c1],
                                     preferred_element_type=jnp.float32))
        rows.append(jnp.concatenate(head_outs, axis=-1))            # (N, D) lane-dense
    a = jnp.concatenate(rows, axis=0)                               # (B*N, D)

    a = jnp.dot(a.astype(jnp.bfloat16), proj_w_ref[...],
                preferred_element_type=jnp.float32) + proj_b_ref[...]
    x = x + a                                                       # residual fold

    # ---- MLP sub-block --------------------------------------------------------
    h = _ln(x, ln2_g_ref[...], ln2_b_ref[...])
    m = jnp.dot(h.astype(jnp.bfloat16), fc1_w_ref[...],
                preferred_element_type=jnp.float32) + fc1_b_ref[...]
    m = _gelu(m)
    y = jnp.dot(m.astype(jnp.bfloat16), fc2_w_ref[...],
                preferred_element_type=jnp.float32) + fc2_b_ref[...]
    o_ref[...] = (x + y).astype(o_ref.dtype)                        # residual fold


def _head_kernel(tok_ref, g_ref, b_ref, hw_ref, hb_ref, o_ref, *, batch, seq):
    """Final LayerNorm (cls rows only) + classifier Linear + Sigmoid, fused."""
    x = tok_ref[...].astype(jnp.float32)                            # (B*N, D)
    cls = jnp.concatenate([x[b * seq:b * seq + 1, :] for b in range(batch)],
                          axis=0)                                   # (B, D)
    h = _ln(cls, g_ref[...], b_ref[...])
    logits = jnp.dot(h.astype(jnp.bfloat16), hw_ref[...],
                     preferred_element_type=jnp.float32) + hb_ref[...]
    o_ref[...] = jax.nn.sigmoid(logits).astype(o_ref.dtype)         # (B, OUT_PAD)


# ------------------------------ pallas_call wrappers --------------------------
def embed(patches, params, batch, n_patches):
    M, CPP = patches.shape
    seq = n_patches + 1
    return pl.pallas_call(
        functools.partial(_embed_kernel, batch=batch, n_patches=n_patches),
        grid=(1,),
        out_shape=jax.ShapeDtypeStruct((batch * seq, EMBED), jnp.float32),
        in_specs=[_fs((M, CPP)), _fs((CPP, EMBED)), _fs((1, EMBED)),
                  _fs((1, EMBED)), _fs((seq, EMBED))],
        out_specs=_fs((batch * seq, EMBED)),
        compiler_params=_CP,
    )(patches, params["patch_w"], params["patch_b"],
      params["cls_token"], params["pos_embed"])


def transformer_block(tok, blk, batch, seq):
    M, D = tok.shape
    args = (tok,
            blk["ln1_g"], blk["ln1_b"], blk["qkv_w"], blk["qkv_b"],
            blk["proj_w"], blk["proj_b"],
            blk["ln2_g"], blk["ln2_b"], blk["fc1_w"], blk["fc1_b"],
            blk["fc2_w"], blk["fc2_b"])
    return pl.pallas_call(
        functools.partial(_block_kernel, batch=batch, seq=seq,
                          heads=HEADS, head_dim=HEAD_DIM),
        grid=(1,),
        out_shape=jax.ShapeDtypeStruct((M, D), jnp.float32),
        in_specs=[_fs(a.shape) for a in args],
        out_specs=_fs((M, D)),
        input_output_aliases={0: 0},          # reuse residual-stream buffer
        compiler_params=_CP,
    )(*args)


def head(tok, params, batch, seq):
    M, D = tok.shape
    return pl.pallas_call(
        functools.partial(_head_kernel, batch=batch, seq=seq),
        grid=(1,),
        out_shape=jax.ShapeDtypeStruct((batch, OUT_PAD), jnp.float32),
        in_specs=[_fs((M, D)), _fs((1, D)), _fs((1, D)),
                  _fs((D, OUT_PAD)), _fs((1, OUT_PAD))],
        out_specs=_fs((batch, OUT_PAD)),
        compiler_params=_CP,
    )(tok, params["ln_g"], params["ln_b"], params["head_w"], params["head_b"])


# ------------------------------ parameter init --------------------------------
def init_params(key, in_chans, num_patches):
    seq_len = num_patches + 1  # + cls token
    keys = jax.random.split(key, 8 + DEPTH)

    def nrm(k, shape):
        return 0.02 * jax.random.normal(k, shape, dtype=jnp.float32)

    head_w = jnp.zeros((EMBED, OUT_PAD), jnp.float32)
    head_w = head_w.at[:, :OUT_SIZE].set(nrm(keys[3], (EMBED, OUT_SIZE)))

    params = {
        # Conv2d(in_chans, EMBED, kernel=patch, stride=patch) flattened as a
        # matmul: weight (EMBED, C, p, p) -> (C*p*p, EMBED), (c, ph, pw) order.
        "patch_w": nrm(keys[0], (in_chans * PATCH * PATCH, EMBED)).astype(jnp.bfloat16),
        "patch_b": jnp.zeros((1, EMBED), jnp.float32),
        "cls_token": nrm(keys[1], (1, EMBED)),
        "pos_embed": nrm(keys[2], (seq_len, EMBED)),
        "ln_g": jnp.ones((1, EMBED), jnp.float32),
        "ln_b": jnp.zeros((1, EMBED), jnp.float32),
        # classifier: nn.Linear(features_dim, out_size) + Sigmoid (lane-padded)
        "head_w": head_w.astype(jnp.bfloat16),
        "head_b": jnp.zeros((1, OUT_PAD), jnp.float32),
        "blocks": [],
    }
    for d in range(DEPTH):
        bk = jax.random.split(keys[8 + d], 4)
        params["blocks"].append({
            "ln1_g": jnp.ones((1, EMBED), jnp.float32),
            "ln1_b": jnp.zeros((1, EMBED), jnp.float32),
            "qkv_w": nrm(bk[0], (EMBED, 3 * EMBED)).astype(jnp.bfloat16),
            "qkv_b": jnp.zeros((1, 3 * EMBED), jnp.float32),
            "proj_w": nrm(bk[1], (EMBED, EMBED)).astype(jnp.bfloat16),
            "proj_b": jnp.zeros((1, EMBED), jnp.float32),
            "ln2_g": jnp.ones((1, EMBED), jnp.float32),
            "ln2_b": jnp.zeros((1, EMBED), jnp.float32),
            "fc1_w": nrm(bk[2], (EMBED, MLP_HIDDEN)).astype(jnp.bfloat16),
            "fc1_b": jnp.zeros((1, MLP_HIDDEN), jnp.float32),
            "fc2_w": nrm(bk[3], (MLP_HIDDEN, EMBED)).astype(jnp.bfloat16),
            "fc2_b": jnp.zeros((1, EMBED), jnp.float32),
        })
    return params


# ------------------------------- forward pass ---------------------------------
def vit_model_forward(x, params):
    """x: (B, C, H, W) NCHW float32  ->  (B, OUT_SIZE) sigmoid probabilities."""
    B, C, H, W = x.shape
    hp, wp = H // PATCH, W // PATCH
    num_patches = hp * wp
    seq = num_patches + 1

    # Patch unfold: stride-p conv == unfold + matmul. The matmul lives in the
    # fused embed kernel; the unfold of the tiny raw image is done once here.
    # TODO(synk): at 224x224 scale, express this strided gather via a manual DMA
    # (16x16 windows violate the (8,128) BlockSpec constraint at this size).
    patches = (
        x.reshape(B, C, hp, PATCH, wp, PATCH)
        .transpose(0, 2, 4, 1, 3, 5)              # (B, hp, wp, C, p, p)
        .reshape(B * num_patches, C * PATCH * PATCH)
    )

    # fused: patch matmul + cls token + pos embed -> residual stream (B*seq, D)
    tok = embed(patches, params, B, num_patches)

    # one fused pallas_call per transformer block (residuals folded inside)
    for blk in params["blocks"]:
        tok = transformer_block(tok, blk, B, seq)

    # fused: final LN (cls rows) + Linear + Sigmoid, lane-padded output
    probs = head(tok, params, B, seq)
    return probs[:, :OUT_SIZE]


# ---------------------------------- main ---------------------------------------
if __name__ == "__main__":
    key = jax.random.PRNGKey(0)
    k_x, k_p = jax.random.split(key)

    B, C, IMG = 2, 3, 32                          # 32/16 -> 2x2 = 4 patches
    x = jax.random.normal(k_x, (B, C, IMG, IMG), dtype=jnp.float32)

    params = init_params(k_p, in_chans=C, num_patches=(IMG // PATCH) ** 2)

    fwd = jax.jit(vit_model_forward)
    out = fwd(x, params)
    out = jax.block_until_ready(out)

    assert out.shape == (B, OUT_SIZE)
    assert bool(jnp.all((out >= 0.0) & (out <= 1.0)))
    print("KERNEL_OK")
</pallas_src>

<mosaic_0001>
module attributes {stable_mosaic.version = 11 : i64} {
  func.func @_embed_kernel(%arg0: i32, %arg1: memref<8x768xf32, #tpu.memory_space<vmem>>, %arg2: memref<768x128xbf16, #tpu.memory_space<vmem>>, %arg3: memref<1x128xf32, #tpu.memory_space<vmem>>, %arg4: memref<1x128xf32, #tpu.memory_space<vmem>>, %arg5: memref<5x128xf32, #tpu.memory_space<vmem>>, %arg6: memref<10x128xf32, #tpu.memory_space<vmem>>) attributes {dimension_semantics = [#tpu.dimension_semantics<arbitrary>], iteration_bounds = array<i64: 1>, scalar_prefetch = 0 : i64, scratch_operands = 0 : i64, tpu.core_type = #tpu.core_type<tc>, window_params = [{pipeline_mode = #tpu.pipeline_mode<synchronous>, transform_indices = @transform_0, window_bounds = array<i64: 8, 768>}, {pipeline_mode = #tpu.pipeline_mode<synchronous>, transform_indices = @transform_1, window_bounds = array<i64: 768, 128>}, {pipeline_mode = #tpu.pipeline_mode<synchronous>, transform_indices = @transform_2, window_bounds = array<i64: 1, 128>}, {pipeline_mode = #tpu.pipeline_mode<synchronous>, transform_indices = @transform_3, window_bounds = array<i64: 1, 128>}, {pipeline_mode = #tpu.pipeline_mode<synchronous>, transform_indices = @transform_4, window_bounds = array<i64: 5, 128>}, {pipeline_mode = #tpu.pipeline_mode<synchronous>, transform_indices = @transform_5, window_bounds = array<i64: 10, 128>}]} {
    %c0 = arith.constant 0 : index
    %c0_0 = arith.constant 0 : index
    %0 = vector.load %arg1[%c0, %c0_0] : memref<8x768xf32, #tpu.memory_space<vmem>>, vector<8x768xf32>
    %1 = arith.truncf %0 : vector<8x768xf32> to vector<8x768xbf16>
    %c0_1 = arith.constant 0 : index
    %c0_2 = arith.constant 0 : index
    %2 = vector.load %arg2[%c0_1, %c0_2] : memref<768x128xbf16, #tpu.memory_space<vmem>>, vector<768x128xbf16>
    %cst = arith.constant dense<0.000000e+00> : vector<8x128xf32>
    %3 = tpu.matmul %1, %2, %cst {dimension_numbers = #tpu.dot_dimension_numbers<[1], [0], [0], [1], [0, 0, 1, 1], [], []>} : vector<8x768xbf16>, vector<768x128xbf16>, vector<8x128xf32> -> vector<8x128xf32>
    %c0_3 = arith.constant 0 : index
    %c0_4 = arith.constant 0 : index
    %4 = vector.load %arg3[%c0_3, %c0_4] : memref<1x128xf32, #tpu.memory_space<vmem>>, vector<1x128xf32>
    %5 = vector.broadcast %4 : vector<1x128xf32> to vector<8x128xf32>
    %6 = arith.addf %3, %5 : vector<8x128xf32>
    %c0_5 = arith.constant 0 : index
    %c0_6 = arith.constant 0 : index
    %7 = vector.load %arg4[%c0_5, %c0_6] : memref<1x128xf32, #tpu.memory_space<vmem>>, vector<1x128xf32>
    %c0_7 = arith.constant 0 : index
    %c0_8 = arith.constant 0 : index
    %8 = vector.load %arg5[%c0_7, %c0_8] : memref<5x128xf32, #tpu.memory_space<vmem>>, vector<5x128xf32>
    %9 = vector.extract_strided_slice %8 {offsets = [0, 0], sizes = [1, 128], strides = [1, 1]} : vector<5x128xf32> to vector<1x128xf32>
    %10 = arith.addf %7, %9 : vector<1x128xf32>
    %c0_9 = arith.constant 0 : index
    %c0_10 = arith.constant 0 : index
    %11 = vector.load %arg6[%c0_9, %c0_10] : memref<10x128xf32, #tpu.memory_space<vmem>>, vector<1x128xf32>
    tpu.vector_store %arg6[%c0_9, %c0_10], %10 {strides = array<i32>} : memref<10x128xf32, #tpu.memory_space<vmem>>, vector<1x128xf32>,
    %12 = vector.extract_strided_slice %6 {offsets = [0, 0], sizes = [4, 128], strides = [1, 1]} : vector<8x128xf32> to vector<4x128xf32>
    %13 = vector.extract_strided_slice %8 {offsets = [1, 0], sizes = [4, 128], strides = [1, 1]} : vector<5x128xf32> to vector<4x128xf32>
    %14 = arith.addf %12, %13 : vector<4x128xf32>
    %c1 = arith.constant 1 : index
    %c0_11 = arith.constant 0 : index
    %15 = vector.load %arg6[%c1, %c0_11] : memref<10x128xf32, #tpu.memory_space<vmem>>, vector<4x128xf32>
    tpu.vector_store %arg6[%c1, %c0_11], %14 {strides = array<i32>} : memref<10x128xf32, #tpu.memory_space<vmem>>, vector<4x128xf32>,
    %16 = vector.extract_strided_slice %8 {offsets = [0, 0], sizes = [1, 128], strides = [1, 1]} : vector<5x128xf32> to vector<1x128xf32>
    %17 = arith.addf %7, %16 : vector<1x128xf32>
    %c5 = arith.constant 5 : index
    %c0_12 = arith.constant 0 : index
    %18 = vector.load %arg6[%c5, %c0_12] : memref<10x128xf32, #tpu.memory_space<vmem>>, vector<1x128xf32>
    tpu.vector_store %arg6[%c5, %c0_12], %17 {strides = array<i32>} : memref<10x128xf32, #tpu.memory_space<vmem>>, vector<1x128xf32>,
    %19 = vector.extract_strided_slice %6 {offsets = [4, 0], sizes = [4, 128], strides = [1, 1]} : vector<8x128xf32> to vector<4x128xf32>
    %20 = vector.extract_strided_slice %8 {offsets = [1, 0], sizes = [4, 128], strides = [1, 1]} : vector<5x128xf32> to vector<4x128xf32>
    %21 = arith.addf %19, %20 : vector<4x128xf32>
    %c6 = arith.constant 6 : index
    %c0_13 = arith.constant 0 : index
    %22 = vector.load %arg6[%c6, %c0_13] : memref<10x128xf32, #tpu.memory_space<vmem>>, vector<4x128xf32>
    tpu.vector_store %arg6[%c6, %c0_13], %21 {strides = array<i32>} : memref<10x128xf32, #tpu.memory_space<vmem>>, vector<4x128xf32>,
    return
  }
  func.func @transform_0(%arg0: i32) -> (i32, i32) {
    %c0_i32 = arith.constant 0 : i32
    %c0_i32_0 = arith.constant 0 : i32
    %c0_i32_1 = arith.constant 0 : i32
    return %c0_i32, %c0_i32_0 : i32, i32
  }
  func.func @transform_1(%arg0: i32) -> (i32, i32) {
    %c0_i32 = arith.constant 0 : i32
    %c0_i32_0 = arith.constant 0 : i32
    %c0_i32_1 = arith.constant 0 : i32
    return %c0_i32, %c0_i32_0 : i32, i32
  }
  func.func @transform_2(%arg0: i32) -> (i32, i32) {
    %c0_i32 = arith.constant 0 : i32
    %c0_i32_0 = arith.constant 0 : i32
    %c0_i32_1 = arith.constant 0 : i32
    return %c0_i32, %c0_i32_0 : i32, i32
  }
  func.func @transform_3(%arg0: i32) -> (i32, i32) {
    %c0_i32 = arith.constant 0 : i32
    %c0_i32_0 = arith.constant 0 : i32
    %c0_i32_1 = arith.constant 0 : i32
    return %c0_i32, %c0_i32_0 : i32, i32
  }
  func.func @transform_4(%arg0: i32) -> (i32, i32) {
    %c0_i32 = arith.constant 0 : i32
    %c0_i32_0 = arith.constant 0 : i32
    %c0_i32_1 = arith.constant 0 : i32
    return %c0_i32, %c0_i32_0 : i32, i32
  }
  func.func @transform_5(%arg0: i32) -> (i32, i32) {
    %c0_i32 = arith.constant 0 : i32
    %c0_i32_0 = arith.constant 0 : i32
    %c0_i32_1 = arith.constant 0 : i32
    return %c0_i32, %c0_i32_0 : i32, i32
  }
}

module attributes {stable_mosaic.version = 11 : i64} {
  func.func @_block_kernel(%arg0: i32, %arg1: memref<10x128xf32, #tpu.memory_space<vmem>>, %arg2: memref<1x128xf32, #tpu.memory_space<vmem>>, %arg3: memref<1x128xf32, #tpu.memory_space<vmem>>, %arg4: memref<128x384xbf16, #tpu.memory_space<vmem>>, %arg5: memref<1x384xf32, #tpu.memory_space<vmem>>, %arg6: memref<128x128xbf16, #tpu.memory_space<vmem>>, %arg7: memref<1x128xf32, #tpu.memory_space<vmem>>, %arg8: memref<1x128xf32, #tpu.memory_space<vmem>>, %arg9: memref<1x128xf32, #tpu.memory_space<vmem>>, %arg10: memref<128x512xbf16, #tpu.memory_space<vmem>>, %arg11: memref<1x512xf32, #tpu.memory_space<vmem>>, %arg12: memref<512x128xbf16, #tpu.memory_space<vmem>>, %arg13: memref<1x128xf32, #tpu.memory_space<vmem>>, %arg14: memref<10x128xf32, #tpu.memory_space<vmem>>) attributes {dimension_semantics = [#tpu.dimension_semantics<arbitrary>], iteration_bounds = array<i64: 1>, scalar_prefetch = 0 : i64, scratch_operands = 0 : i64, tpu.core_type = #tpu.core_type<tc>, window_params = [{pipeline_mode = #tpu.pipeline_mode<synchronous>, transform_indices = @transform_0, window_bounds = array<i64: 10, 128>}, {pipeline_mode = #tpu.pipeline_mode<synchronous>, transform_indices = @transform_1, window_bounds = array<i64: 1, 128>}, {pipeline_mode = #tpu.pipeline_mode<synchronous>, transform_indices = @transform_2, window_bounds = array<i64: 1, 128>}, {pipeline_mode = #tpu.pipeline_mode<synchronous>, transform_indices = @transform_3, window_bounds = array<i64: 128, 384>}, {pipeline_mode = #tpu.pipeline_mode<synchronous>, transform_indices = @transform_4, window_bounds = array<i64: 1, 384>}, {pipeline_mode = #tpu.pipeline_mode<synchronous>, transform_indices = @transform_5, window_bounds = array<i64: 128, 128>}, {pipeline_mode = #tpu.pipeline_mode<synchronous>, transform_indices = @transform_6, window_bounds = array<i64: 1, 128>}, {pipeline_mode = #tpu.pipeline_mode<synchronous>, transform_indices = @transform_7, window_bounds = array<i64: 1, 128>}, {pipeline_mode = #tpu.pipeline_mode<synchronous>, transform_indices = @transform_8, window_bounds = array<i64: 1, 128>}, {pipeline_mode = #tpu.pipeline_mode<synchronous>, transform_indices = @transform_9, window_bounds = array<i64: 128, 512>}, {pipeline_mode = #tpu.pipeline_mode<synchronous>, transform_indices = @transform_10, window_bounds = array<i64: 1, 512>}, {pipeline_mode = #tpu.pipeline_mode<synchronous>, transform_indices = @transform_11, window_bounds = array<i64: 512, 128>}, {pipeline_mode = #tpu.pipeline_mode<synchronous>, transform_indices = @transform_12, window_bounds = array<i64: 1, 128>}, {pipeline_mode = #tpu.pipeline_mode<synchronous>, transform_indices = @transform_13, window_bounds = array<i64: 10, 128>}]} {
    %c0 = arith.constant 0 : index
    %c0_0 = arith.constant 0 : index
    %0 = vector.load %arg1[%c0, %c0_0] : memref<10x128xf32, #tpu.memory_space<vmem>>, vector<10x128xf32>
    %c0_1 = arith.constant 0 : index
    %c0_2 = arith.constant 0 : index
    %1 = vector.load %arg2[%c0_1, %c0_2] : memref<1x128xf32, #tpu.memory_space<vmem>>, vector<1x128xf32>
    %c0_3 = arith.constant 0 : index
    %c0_4 = arith.constant 0 : index
    %2 = vector.load %arg3[%c0_3, %c0_4] : memref<1x128xf32, #tpu.memory_space<vmem>>, vector<1x128xf32>
    %cst = arith.constant dense<0.000000e+00> : vector<10xf32>
    %3 = vector.multi_reduction <add>, %0, %cst [1] : vector<10x128xf32> to vector<10xf32>
    %4 = vector.shape_cast %3 : vector<10xf32> to vector<10x1xf32>
    %cst_5 = arith.constant 1.280000e+02 : f32
    %5 = vector.broadcast %cst_5 : f32 to vector<10x1xf32>
    %6 = arith.divf %4, %5 : vector<10x1xf32>
    %7 = vector.broadcast %6 : vector<10x1xf32> to vector<10x128xf32>
    %8 = arith.subf %0, %7 : vector<10x128xf32>
    %9 = arith.mulf %8, %8 : vector<10x128xf32>
    %cst_6 = arith.constant dense<0.000000e+00> : vector<10xf32>
    %10 = vector.multi_reduction <add>, %9, %cst_6 [1] : vector<10x128xf32> to vector<10xf32>
    %11 = vector.shape_cast %10 : vector<10xf32> to vector<10x1xf32>
    %cst_7 = arith.constant 1.280000e+02 : f32
    %12 = vector.broadcast %cst_7 : f32 to vector<10x1xf32>
    %13 = arith.divf %11, %12 : vector<10x1xf32>
    %14 = vector.broadcast %6 : vector<10x1xf32> to vector<10x128xf32>
    %15 = arith.subf %0, %14 : vector<10x128xf32>
    %cst_8 = arith.constant 9.99999997E-7 : f32
    %16 = vector.broadcast %cst_8 : f32 to vector<10x1xf32>
    %17 = arith.addf %13, %16 : vector<10x1xf32>
    %18 = math.rsqrt %17 : vector<10x1xf32>
    %19 = vector.broadcast %18 : vector<10x1xf32> to vector<10x128xf32>
    %20 = arith.mulf %15, %19 : vector<10x128xf32>
    %21 = vector.broadcast %1 : vector<1x128xf32> to vector<10x128xf32>
    %22 = arith.mulf %20, %21 : vector<10x128xf32>
    %23 = vector.broadcast %2 : vector<1x128xf32> to vector<10x128xf32>
    %24 = arith.addf %22, %23 : vector<10x128xf32>
    %25 = arith.truncf %24 : vector<10x128xf32> to vector<10x128xbf16>
    %c0_9 = arith.constant 0 : index
    %c0_10 = arith.constant 0 : index
    %26 = vector.load %arg4[%c0_9, %c0_10] : memref<128x384xbf16, #tpu.memory_space<vmem>>, vector<128x384xbf16>
    %cst_11 = arith.constant dense<0.000000e+00> : vector<10x384xf32>
    %27 = tpu.matmul %25, %26, %cst_11 {dimension_numbers = #tpu.dot_dimension_numbers<[1], [0], [0], [1], [0, 0, 1, 1], [], []>} : vector<10x128xbf16>, vector<128x384xbf16>, vector<10x384xf32> -> vector<10x384xf32>
    %c0_12 = arith.constant 0 : index
    %c0_13 = arith.constant 0 : index
    %28 = vector.load %arg5[%c0_12, %c0_13] : memref<1x384xf32, #tpu.memory_space<vmem>>, vector<1x384xf32>
    %29 = vector.broadcast %28 : vector<1x384xf32> to vector<10x384xf32>
    %30 = arith.addf %27, %29 : vector<10x384xf32>
    %cst_14 = arith.constant 3.200000e+01 : f32
    %cst_15 = arith.constant -5.000000e-01 : f32
    %31 = math.powf %cst_14, %cst_15 : f32
    %32 = vector.extract_strided_slice %30 {offsets = [0, 0], sizes = [10, 128], strides = [1, 1]} : vector<10x384xf32> to vector<10x128xf32>
    %33 = vector.broadcast %31 : f32 to vector<10x128xf32>
    %34 = arith.mulf %32, %33 : vector<10x128xf32>
    %35 = arith.truncf %34 : vector<10x128xf32> to vector<10x128xbf16>
    %36 = vector.extract_strided_slice %30 {offsets = [0, 128], sizes = [10, 128], strides = [1, 1]} : vector<10x384xf32> to vector<10x128xf32>
    %37 = arith.truncf %36 : vector<10x128xf32> to vector<10x128xbf16>
    %38 = vector.extract_strided_slice %30 {offsets = [0, 256], sizes = [10, 128], strides = [1, 1]} : vector<10x384xf32> to vector<10x128xf32>
    %39 = arith.truncf %38 : vector<10x128xf32> to vector<10x128xbf16>
    %40 = vector.extract_strided_slice %35 {offsets = [0, 0], sizes = [5, 32], strides = [1, 1]} : vector<10x128xbf16> to vector<5x32xbf16>
    %41 = vector.extract_strided_slice %37 {offsets = [0, 0], sizes = [5, 32], strides = [1, 1]} : vector<10x128xbf16> to vector<5x32xbf16>
    "tpu.trace_start"() <{level = 10 : i32, message = "qd,kd->qk"}> : () -> ()
    %cst_16 = arith.constant dense<0.000000e+00> : vector<5x5xf32>
    %42 = tpu.matmul %40, %41, %cst_16 {dimension_numbers = #tpu.dot_dimension_numbers<[1], [1], [0], [0], [0, 0, 1, 0], [], []>} : vector<5x32xbf16>, vector<5x32xbf16>, vector<5x5xf32> -> vector<5x5xf32>
    "tpu.trace_stop"() : () -> ()
    %cst_17 = arith.constant dense<0xFF800000> : vector<5xf32>
    %43 = vector.multi_reduction <maximumf>, %42, %cst_17 [1] : vector<5x5xf32> to vector<5xf32>
    %44 = vector.shape_cast %43 : vector<5xf32> to vector<5x1xf32>
    %45 = vector.broadcast %44 : vector<5x1xf32> to vector<5x5xf32>
    %46 = arith.subf %42, %45 : vector<5x5xf32>
    %47 = math.exp %46 : vector<5x5xf32>
    %cst_18 = arith.constant dense<0.000000e+00> : vector<5xf32>
    %48 = vector.multi_reduction <add>, %47, %cst_18 [1] : vector<5x5xf32> to vector<5xf32>
    %49 = vector.shape_cast %48 : vector<5xf32> to vector<5x1xf32>
    %50 = tpu.reciprocal %49 {approx = true} : vector<5x1xf32> -> vector<5x1xf32>
    %51 = vector.broadcast %50 : vector<5x1xf32> to vector<5x5xf32>
    %52 = arith.mulf %47, %51 : vector<5x5xf32>
    %53 = arith.truncf %52 : vector<5x5xf32> to vector<5x5xbf16>
    %54 = vector.extract_strided_slice %39 {offsets = [0, 0], sizes = [5, 32], strides = [1, 1]} : vector<10x128xbf16> to vector<5x32xbf16>
    %cst_19 = arith.constant dense<0.000000e+00> : vector<5x32xf32>
    %55 = tpu.matmul %53, %54, %cst_19 {dimension_numbers = #tpu.dot_dimension_numbers<[1], [0], [0], [1], [0, 0, 1, 1], [], []>} : vector<5x5xbf16>, vector<5x32xbf16>, vector<5x32xf32> -> vector<5x32xf32>
    %56 = vector.extract_strided_slice %35 {offsets = [0, 32], sizes = [5, 32], strides = [1, 1]} : vector<10x128xbf16> to vector<5x32xbf16>
    %57 = vector.extract_strided_slice %37 {offsets = [0, 32], sizes = [5, 32], strides = [1, 1]} : vector<10x128xbf16> to vector<5x32xbf16>
    "tpu.trace_start"() <{level = 10 : i32, message = "qd,kd->qk"}> : () -> ()
    %cst_20 = arith.constant dense<0.000000e+00> : vector<5x5xf32>
    %58 = tpu.matmul %56, %57, %cst_20 {dimension_numbers = #tpu.dot_dimension_numbers<[1], [1], [0], [0], [0, 0, 1, 0], [], []>} : vector<5x32xbf16>, vector<5x32xbf16>, vector<5x5xf32> -> vector<5x5xf32>
    "tpu.trace_stop"() : () -> ()
    %cst_21 = arith.constant dense<0xFF800000> : vector<5xf32>
    %59 = vector.multi_reduction <maximumf>, %58, %cst_21 [1] : vector<5x5xf32> to vector<5xf32>
    %60 = vector.shape_cast %59 : vector<5xf32> to vector<5x1xf32>
    %61 = vector.broadcast %60 : vector<5x1xf32> to vector<5x5xf32>
    %62 = arith.subf %58, %61 : vector<5x5xf32>
    %63 = math.exp %62 : vector<5x5xf32>
    %cst_22 = arith.constant dense<0.000000e+00> : vector<5xf32>
    %64 = vector.multi_reduction <add>, %63, %cst_22 [1] : vector<5x5xf32> to vector<5xf32>
    %65 = vector.shape_cast %64 : vector<5xf32> to vector<5x1xf32>
    %66 = tpu.reciprocal %65 {approx = true} : vector<5x1xf32> -> vector<5x1xf32>
    %67 = vector.broadcast %66 : vector<5x1xf32> to vector<5x5xf32>
    %68 = arith.mulf %63, %67 : vector<5x5xf32>
    %69 = arith.truncf %68 : vector<5x5xf32> to vector<5x5xbf16>
    %70 = vector.extract_strided_slice %39 {offsets = [0, 32], sizes = [5, 32], strides = [1, 1]} : vector<10x128xbf16> to vector<5x32xbf16>
    %cst_23 = arith.constant dense<0.000000e+00> : vector<5x32xf32>
    %71 = tpu.matmul %69, %70, %cst_23 {dimension_numbers = #tpu.dot_dimension_numbers<[1], [0], [0], [1], [0, 0, 1, 1], [], []>} : vector<5x5xbf16>, vector<5x32xbf16>, vector<5x32xf32> -> vector<5x32xf32>
    %72 = vector.extract_strided_slice %35 {offsets = [0, 64], sizes = [5, 32], strides = [1, 1]} : vector<10x128xbf16> to vector<5x32xbf16>
    %73 = vector.extract_strided_slice %37 {offsets = [0, 64], sizes = [5, 32], strides = [1, 1]} : vector<10x128xbf16> to vector<5x32xbf16>
    "tpu.trace_start"() <{level = 10 : i32, message = "qd,kd->qk"}> : () -> ()
    %cst_24 = arith.constant dense<0.000000e+00> : vector<5x5xf32>
    %74 = tpu.matmul %72, %73, %cst_24 {dimension_numbers = #tpu.dot_dimension_numbers<[1], [1], [0], [0], [0, 0, 1, 0], [], []>} : vector<5x32xbf16>, vector<5x32xbf16>, vector<5x5xf32> -> vector<5x5xf32>
    "tpu.trace_stop"() : () -> ()
    %cst_25 = arith.constant dense<0xFF800000> : vector<5xf32>
    %75 = vector.multi_reduction <maximumf>, %74, %cst_25 [1] : vector<5x5xf32> to vector<5xf32>
    %76 = vector.shape_cast %75 : vector<5xf32> to vector<5x1xf32>
    %77 = vector.broadcast %76 : vector<5x1xf32> to vector<5x5xf32>
    %78 = arith.subf %74, %77 : vector<5x5xf32>
    %79 = math.exp %78 : vector<5x5xf32>
    %cst_26 = arith.constant dense<0.000000e+00> : vector<5xf32>
    %80 = vector.multi_reduction <add>, %79, %cst_26 [1] : vector<5x5xf32> to vector<5xf32>
    %81 = vector.shape_cast %80 : vector<5xf32> to vector<5x1xf32>
    %82 = tpu.reciprocal %81 {approx = true} : vector<5x1xf32> -> vector<5x1xf32>
    %83 = vector.broadcast %82 : vector<5x1xf32> to vector<5x5xf32>
    %84 = arith.mulf %79, %83 : vector<5x5xf32>
    %85 = arith.truncf %84 : vector<5x5xf32> to vector<5x5xbf16>
    %86 = vector.extract_strided_slice %39 {offsets = [0, 64], sizes = [5, 32], strides = [1, 1]} : vector<10x128xbf16> to vector<5x32xbf16>
    %cst_27 = arith.constant dense<0.000000e+00> : vector<5x32xf32>
    %87 = tpu.matmul %85, %86, %cst_27 {dimension_numbers = #tpu.dot_dimension_numbers<[1], [0], [0], [1], [0, 0, 1, 1], [], []>} : vector<5x5xbf16>, vector<5x32xbf16>, vector<5x32xf32> -> vector<5x32xf32>
    %88 = vector.extract_strided_slice %35 {offsets = [0, 96], sizes = [5, 32], strides = [1, 1]} : vector<10x128xbf16> to vector<5x32xbf16>
    %89 = vector.extract_strided_slice %37 {offsets = [0, 96], sizes = [5, 32], strides = [1, 1]} : vector<10x128xbf16> to vector<5x32xbf16>
    "tpu.trace_start"() <{level = 10 : i32, message = "qd,kd->qk"}> : () -> ()
    %cst_28 = arith.constant dense<0.000000e+00> : vector<5x5xf32>
    %90 = tpu.matmul %88, %89, %cst_28 {dimension_numbers = #tpu.dot_dimension_numbers<[1], [1], [0], [0], [0, 0, 1, 0], [], []>} : vector<5x32xbf16>, vector<5x32xbf16>, vector<5x5xf32> -> vector<5x5xf32>
    "tpu.trace_stop"() : () -> ()
    %cst_29 = arith.constant dense<0xFF800000> : vector<5xf32>
    %91 = vector.multi_reduction <maximumf>, %90, %cst_29 [1] : vector<5x5xf32> to vector<5xf32>
    %92 = vector.shape_cast %91 : vector<5xf32> to vector<5x1xf32>
    %93 = vector.broadcast %92 : vector<5x1xf32> to vector<5x5xf32>
    %94 = arith.subf %90, %93 : vector<5x5xf32>
    %95 = math.exp %94 : vector<5x5xf32>
    %cst_30 = arith.constant dense<0.000000e+00> : vector<5xf32>
    %96 = vector.multi_reduction <add>, %95, %cst_30 [1] : vector<5x5xf32> to vector<5xf32>
    %97 = vector.shape_cast %96 : vector<5xf32> to vector<5x1xf32>
    %98 = tpu.reciprocal %97 {approx = true} : vector<5x1xf32> -> vector<5x1xf32>
    %99 = vector.broadcast %98 : vector<5x1xf32> to vector<5x5xf32>
    %100 = arith.mulf %95, %99 : vector<5x5xf32>
    %101 = arith.truncf %100 : vector<5x5xf32> to vector<5x5xbf16>
    %102 = vector.extract_strided_slice %39 {offsets = [0, 96], sizes = [5, 32], strides = [1, 1]} : vector<10x128xbf16> to vector<5x32xbf16>
    %cst_31 = arith.constant dense<0.000000e+00> : vector<5x32xf32>
    %103 = tpu.matmul %101, %102, %cst_31 {dimension_numbers = #tpu.dot_dimension_numbers<[1], [0], [0], [1], [0, 0, 1, 1], [], []>} : vector<5x5xbf16>, vector<5x32xbf16>, vector<5x32xf32> -> vector<5x32xf32>
    %104 = tpu.concatenate %55, %71, %87, %103 in 1 : vector<5x32xf32>, vector<5x32xf32>, vector<5x32xf32>, vector<5x32xf32> -> vector<5x128xf32>
    %105 = vector.extract_strided_slice %35 {offsets = [5, 0], sizes = [5, 32], strides = [1, 1]} : vector<10x128xbf16> to vector<5x32xbf16>
    %106 = vector.extract_strided_slice %37 {offsets = [5, 0], sizes = [5, 32], strides = [1, 1]} : vector<10x128xbf16> to vector<5x32xbf16>
    "tpu.trace_start"() <{level = 10 : i32, message = "qd,kd->qk"}> : () -> ()
    %cst_32 = arith.constant dense<0.000000e+00> : vector<5x5xf32>
    %107 = tpu.matmul %105, %106, %cst_32 {dimension_numbers = #tpu.dot_dimension_numbers<[1], [1], [0], [0], [0, 0, 1, 0], [], []>} : vector<5x32xbf16>, vector<5x32xbf16>, vector<5x5xf32> -> vector<5x5xf32>
    "tpu.trace_stop"() : () -> ()
    %cst_33 = arith.constant dense<0xFF800000> : vector<5xf32>
    %108 = vector.multi_reduction <maximumf>, %107, %cst_33 [1] : vector<5x5xf32> to vector<5xf32>
    %109 = vector.shape_cast %108 : vector<5xf32> to vector<5x1xf32>
    %110 = vector.broadcast %109 : vector<5x1xf32> to vector<5x5xf32>
    %111 = arith.subf %107, %110 : vector<5x5xf32>
    %112 = math.exp %111 : vector<5x5xf32>
    %cst_34 = arith.constant dense<0.000000e+00> : vector<5xf32>
    %113 = vector.multi_reduction <add>, %112, %cst_34 [1] : vector<5x5xf32> to vector<5xf32>
    %114 = vector.shape_cast %113 : vector<5xf32> to vector<5x1xf32>
    %115 = tpu.reciprocal %114 {approx = true} : vector<5x1xf32> -> vector<5x1xf32>
    %116 = vector.broadcast %115 : vector<5x1xf32> to vector<5x5xf32>
    %117 = arith.mulf %112, %116 : vector<5x5xf32>
    %118 = arith.truncf %117 : vector<5x5xf32> to vector<5x5xbf16>
    %119 = vector.extract_strided_slice %39 {offsets = [5, 0], sizes = [5, 32], strides = [1, 1]} : vector<10x128xbf16> to vector<5x32xbf16>
    %cst_35 = arith.constant dense<0.000000e+00> : vector<5x32xf32>
    %120 = tpu.matmul %118, %119, %cst_35 {dimension_numbers = #tpu.dot_dimension_numbers<[1], [0], [0], [1], [0, 0, 1, 1], [], []>} : vector<5x5xbf16>, vector<5x32xbf16>, vector<5x32xf32> -> vector<5x32xf32>
    %121 = vector.extract_strided_slice %35 {offsets = [5, 32], sizes = [5, 32], strides = [1, 1]} : vector<10x128xbf16> to vector<5x32xbf16>
    %122 = vector.extract_strided_slice %37 {offsets = [5, 32], sizes = [5, 32], strides = [1, 1]} : vector<10x128xbf16> to vector<5x32xbf16>
    "tpu.trace_start"() <{level = 10 : i32, message = "qd,kd->qk"}> : () -> ()
    %cst_36 = arith.constant dense<0.000000e+00> : vector<5x5xf32>
    %123 = tpu.matmul %121, %122, %cst_36 {dimension_numbers = #tpu.dot_dimension_numbers<[1], [1], [0], [0], [0, 0, 1, 0], [], []>} : vector<5x32xbf16>, vector<5x32xbf16>, vector<5x5xf32> -> vector<5x5xf32>
    "tpu.trace_stop"() : () -> ()
    %cst_37 = arith.constant dense<0xFF800000> : vector<5xf32>
    %124 = vector.multi_reduction <maximumf>, %123, %cst_37 [1] : vector<5x5xf32> to vector<5xf32>
    %125 = vector.shape_cast %124 : vector<5xf32> to vector<5x1xf32>
    %126 = vector.broadcast %125 : vector<5x1xf32> to vector<5x5xf32>
    %127 = arith.subf %123, %126 : vector<5x5xf32>
    %128 = math.exp %127 : vector<5x5xf32>
    %cst_38 = arith.constant dense<0.000000e+00> : vector<5xf32>
    %129 = vector.multi_reduction <add>, %128, %cst_38 [1] : vector<5x5xf32> to vector<5xf32>
    %130 = vector.shape_cast %129 : vector<5xf32> to vector<5x1xf32>
    %131 = tpu.reciprocal %130 {approx = true} : vector<5x1xf32> -> vector<5x1xf32>
    %132 = vector.broadcast %131 : vector<5x1xf32> to vector<5x5xf32>
    %133 = arith.mulf %128, %132 : vector<5x5xf32>
    %134 = arith.truncf %133 : vector<5x5xf32> to vector<5x5xbf16>
    %135 = vector.extract_strided_slice %39 {offsets = [5, 32], sizes = [5, 32], strides = [1, 1]} : vector<10x128xbf16> to vector<5x32xbf16>
    %cst_39 = arith.constant dense<0.000000e+00> : vector<5x32xf32>
    %136 = tpu.matmul %134, %135, %cst_39 {dimension_numbers = #tpu.dot_dimension_numbers<[1], [0], [0], [1], [0, 0, 1, 1], [], []>} : vector<5x5xbf16>, vector<5x32xbf16>, vector<5x32xf32> -> vector<5x32xf32>
    %137 = vector.extract_strided_slice %35 {offsets = [5, 64], sizes = [5, 32], strides = [1, 1]} : vector<10x128xbf16> to vector<5x32xbf16>
    %138 = vector.extract_strided_slice %37 {offsets = [5, 64], sizes = [5, 32], strides = [1, 1]} : vector<10x128xbf16> to vector<5x32xbf16>
    "tpu.trace_start"() <{level = 10 : i32, message = "qd,kd->qk"}> : () -> ()
    %cst_40 = arith.constant dense<0.000000e+00> : vector<5x5xf32>
    %139 = tpu.matmul %137, %138, %cst_40 {dimension_numbers = #tpu.dot_dimension_numbers<[1], [1], [0], [0], [0, 0, 1, 0], [], []>} : vector<5x32xbf16>, vector<5x32xbf16>, vector<5x5xf32> -> vector<5x5xf32>
    "tpu.trace_stop"() : () -> ()
    %cst_41 = arith.constant dense<0xFF800000> : vector<5xf32>
    %140 = vector.multi_reduction <maximumf>, %139, %cst_41 [1] : vector<5x5xf32> to vector<5xf32>
    %141 = vector.shape_cast %140 : vector<5xf32> to vector<5x1xf32>
    %142 = vector.broadcast %141 : vector<5x1xf32> to vector<5x5xf32>
    %143 = arith.subf %139, %142 : vector<5x5xf32>
    %144 = math.exp %143 : vector<5x5xf32>
    %cst_42 = arith.constant dense<0.000000e+00> : vector<5xf32>
    %145 = vector.multi_reduction <add>, %144, %cst_42 [1] : vector<5x5xf32> to vector<5xf32>
    %146 = vector.shape_cast %145 : vector<5xf32> to vector<5x1xf32>
    %147 = tpu.reciprocal %146 {approx = true} : vector<5x1xf32> -> vector<5x1xf32>
    %148 = vector.broadcast %147 : vector<5x1xf32> to vector<5x5xf32>
    %149 = arith.mulf %144, %148 : vector<5x5xf32>
    %150 = arith.truncf %149 : vector<5x5xf32> to vector<5x5xbf16>
    %151 = vector.extract_strided_slice %39 {offsets = [5, 64], sizes = [5, 32], strides = [1, 1]} : vector<10x128xbf16> to vector<5x32xbf16>
    %cst_43 = arith.constant dense<0.000000e+00> : vector<5x32xf32>
    %152 = tpu.matmul %150, %151, %cst_43 {dimension_numbers = #tpu.dot_dimension_numbers<[1], [0], [0], [1], [0, 0, 1, 1], [], []>} : vector<5x5xbf16>, vector<5x32xbf16>, vector<5x32xf32> -> vector<5x32xf32>
    %153 = vector.extract_strided_slice %35 {offsets = [5, 96], sizes = [5, 32], strides = [1, 1]} : vector<10x128xbf16> to vector<5x32xbf16>
    %154 = vector.extract_strided_slice %37 {offsets = [5, 96], sizes = [5, 32], strides = [1, 1]} : vector<10x128xbf16> to vector<5x32xbf16>
    "tpu.trace_start"() <{level = 10 : i32, message = "qd,kd->qk"}> : () -> ()
    %cst_44 = arith.constant dense<0.000000e+00> : vector<5x5xf32>
    %155 = tpu.matmul %153, %154, %cst_44 {dimension_numbers = #tpu.dot_dimension_numbers<[1], [1], [0], [0], [0, 0, 1, 0], [], []>} : vector<5x32xbf16>, vector<5x32xbf16>, vector<5x5xf32> -> vector<5x5xf32>
    "tpu.trace_stop"() : () -> ()
    %cst_45 = arith.constant dense<0xFF800000> : vector<5xf32>
    %156 = vector.multi_reduction <maximumf>, %155, %cst_45 [1] : vector<5x5xf32> to vector<5xf32>
    %157 = vector.shape_cast %156 : vector<5xf32> to vector<5x1xf32>
    %158 = vector.broadcast %157 : vector<5x1xf32> to vector<5x5xf32>
    %159 = arith.subf %155, %158 : vector<5x5xf32>
    %160 = math.exp %159 : vector<5x5xf32>
    %cst_46 = arith.constant dense<0.000000e+00> : vector<5xf32>
    %161 = vector.multi_reduction <add>, %160, %cst_46 [1] : vector<5x5xf32> to vector<5xf32>
    %162 = vector.shape_cast %161 : vector<5xf32> to vector<5x1xf32>
    %163 = tpu.reciprocal %162 {approx = true} : vector<5x1xf32> -> vector<5x1xf32>
    %164 = vector.broadcast %163 : vector<5x1xf32> to vector<5x5xf32>
    %165 = arith.mulf %160, %164 : vector<5x5xf32>
    %166 = arith.truncf %165 : vector<5x5xf32> to vector<5x5xbf16>
    %167 = vector.extract_strided_slice %39 {offsets = [5, 96], sizes = [5, 32], strides = [1, 1]} : vector<10x128xbf16> to vector<5x32xbf16>
    %cst_47 = arith.constant dense<0.000000e+00> : vector<5x32xf32>
    %168 = tpu.matmul %166, %167, %cst_47 {dimension_numbers = #tpu.dot_dimension_numbers<[1], [0], [0], [1], [0, 0, 1, 1], [], []>} : vector<5x5xbf16>, vector<5x32xbf16>, vector<5x32xf32> -> vector<5x32xf32>
    %169 = tpu.concatenate %120, %136, %152, %168 in 1 : vector<5x32xf32>, vector<5x32xf32>, vector<5x32xf32>, vector<5x32xf32> -> vector<5x128xf32>
    %170 = tpu.concatenate %104, %169 in 0 : vector<5x128xf32>, vector<5x128xf32> -> vector<10x128xf32>
    %171 = arith.truncf %170 : vector<10x128xf32> to vector<10x128xbf16>
    %c0_48 = arith.constant 0 : index
    %c0_49 = arith.constant 0 : index
    %172 = vector.load %arg6[%c0_48, %c0_49] : memref<128x128xbf16, #tpu.memory_space<vmem>>, vector<128x128xbf16>
    %cst_50 = arith.constant dense<0.000000e+00> : vector<10x128xf32>
    %173 = tpu.matmul %171, %172, %cst_50 {dimension_numbers = #tpu.dot_dimension_numbers<[1], [0], [0], [1], [0, 0, 1, 1], [], []>} : vector<10x128xbf16>, vector<128x128xbf16>, vector<10x128xf32> -> vector<10x128xf32>
    %c0_51 = arith.constant 0 : index
    %c0_52 = arith.constant 0 : index
    %174 = vector.load %arg7[%c0_51, %c0_52] : memref<1x128xf32, #tpu.memory_space<vmem>>, vector<1x128xf32>
    %175 = vector.broadcast %174 : vector<1x128xf32> to vector<10x128xf32>
    %176 = arith.addf %173, %175 : vector<10x128xf32>
    %177 = arith.addf %0, %176 : vector<10x128xf32>
    %c0_53 = arith.constant 0 : index
    %c0_54 = arith.constant 0 : index
    %178 = vector.load %arg8[%c0_53, %c0_54] : memref<1x128xf32, #tpu.memory_space<vmem>>, vector<1x128xf32>
    %c0_55 = arith.constant 0 : index
    %c0_56 = arith.constant 0 : index
    %179 = vector.load %arg9[%c0_55, %c0_56] : memref<1x128xf32, #tpu.memory_space<vmem>>, vector<1x128xf32>
    %cst_57 = arith.constant dense<0.000000e+00> : vector<10xf32>
    %180 = vector.multi_reduction <add>, %177, %cst_57 [1] : vector<10x128xf32> to vector<10xf32>
    %181 = vector.shape_cast %180 : vector<10xf32> to vector<10x1xf32>
    %cst_58 = arith.constant 1.280000e+02 : f32
    %182 = vector.broadcast %cst_58 : f32 to vector<10x1xf32>
    %183 = arith.divf %181, %182 : vector<10x1xf32>
    %184 = vector.broadcast %183 : vector<10x1xf32> to vector<10x128xf32>
    %185 = arith.subf %177, %184 : vector<10x128xf32>
    %186 = arith.mulf %185, %185 : vector<10x128xf32>
    %cst_59 = arith.constant dense<0.000000e+00> : vector<10xf32>
    %187 = vector.multi_reduction <add>, %186, %cst_59 [1] : vector<10x128xf32> to vector<10xf32>
    %188 = vector.shape_cast %187 : vector<10xf32> to vector<10x1xf32>
    %cst_60 = arith.constant 1.280000e+02 : f32
    %189 = vector.broadcast %cst_60 : f32 to vector<10x1xf32>
    %190 = arith.divf %188, %189 : vector<10x1xf32>
    %191 = vector.broadcast %183 : vector<10x1xf32> to vector<10x128xf32>
    %192 = arith.subf %177, %191 : vector<10x128xf32>
    %cst_61 = arith.constant 9.99999997E-7 : f32
    %193 = vector.broadcast %cst_61 : f32 to vector<10x1xf32>
    %194 = arith.addf %190, %193 : vector<10x1xf32>
    %195 = math.rsqrt %194 : vector<10x1xf32>
    %196 = vector.broadcast %195 : vector<10x1xf32> to vector<10x128xf32>
    %197 = arith.mulf %192, %196 : vector<10x128xf32>
    %198 = vector.broadcast %178 : vector<1x128xf32> to vector<10x128xf32>
    %199 = arith.mulf %197, %198 : vector<10x128xf32>
    %200 = vector.broadcast %179 : vector<1x128xf32> to vector<10x128xf32>
    %201 = arith.addf %199, %200 : vector<10x128xf32>
    %202 = arith.truncf %201 : vector<10x128xf32> to vector<10x128xbf16>
    %c0_62 = arith.constant 0 : index
    %c0_63 = arith.constant 0 : index
    %203 = vector.load %arg10[%c0_62, %c0_63] : memref<128x512xbf16, #tpu.memory_space<vmem>>, vector<128x512xbf16>
    %cst_64 = arith.constant dense<0.000000e+00> : vector<10x512xf32>
    %204 = tpu.matmul %202, %203, %cst_64 {dimension_numbers = #tpu.dot_dimension_numbers<[1], [0], [0], [1], [0, 0, 1, 1], [], []>} : vector<10x128xbf16>, vector<128x512xbf16>, vector<10x512xf32> -> vector<10x512xf32>
    %c0_65 = arith.constant 0 : index
    %c0_66 = arith.constant 0 : index
    %205 = vector.load %arg11[%c0_65, %c0_66] : memref<1x512xf32, #tpu.memory_space<vmem>>, vector<1x512xf32>
    %206 = vector.broadcast %205 : vector<1x512xf32> to vector<10x512xf32>
    %207 = arith.addf %204, %206 : vector<10x512xf32>
    %cst_67 = arith.constant 5.000000e-01 : f32
    %208 = vector.broadcast %cst_67 : f32 to vector<10x512xf32>
    %209 = arith.mulf %208, %207 : vector<10x512xf32>
    %cst_68 = arith.constant 0.707106769 : f32
    %210 = vector.broadcast %cst_68 : f32 to vector<10x512xf32>
    %211 = arith.mulf %207, %210 : vector<10x512xf32>
    %212 = math.erf %211 : vector<10x512xf32>
    %cst_69 = arith.constant 1.000000e+00 : f32
    %213 = vector.broadcast %cst_69 : f32 to vector<10x512xf32>
    %214 = arith.addf %213, %212 : vector<10x512xf32>
    %215 = arith.mulf %209, %214 : vector<10x512xf32>
    %216 = arith.truncf %215 : vector<10x512xf32> to vector<10x512xbf16>
    %c0_70 = arith.constant 0 : index
    %c0_71 = arith.constant 0 : index
    %217 = vector.load %arg12[%c0_70, %c0_71] : memref<512x128xbf16, #tpu.memory_space<vmem>>, vector<512x128xbf16>
    %cst_72 = arith.constant dense<0.000000e+00> : vector<10x128xf32>
    %218 = tpu.matmul %216, %217, %cst_72 {dimension_numbers = #tpu.dot_dimension_numbers<[1], [0], [0], [1], [0, 0, 1, 1], [], []>} : vector<10x512xbf16>, vector<512x128xbf16>, vector<10x128xf32> -> vector<10x128xf32>
    %c0_73 = arith.constant 0 : index
    %c0_74 = arith.constant 0 : index
    %219 = vector.load %arg13[%c0_73, %c0_74] : memref<1x128xf32, #tpu.memory_space<vmem>>, vector<1x128xf32>
    %220 = vector.broadcast %219 : vector<1x128xf32> to vector<10x128xf32>
    %221 = arith.addf %218, %220 : vector<10x128xf32>
    %222 = arith.addf %177, %221 : vector<10x128xf32>
    %c0_75 = arith.constant 0 : index
    %c0_76 = arith.constant 0 : index
    %223 = vector.load %arg14[%c0_75, %c0_76] : memref<10x128xf32, #tpu.memory_space<vmem>>, vector<10x128xf32>
    tpu.vector_store %arg14[%c0_75, %c0_76], %222 {strides = array<i32>} : memref<10x128xf32, #tpu.memory_space<vmem>>, vector<10x128xf32>,
    return
  }
  func.func @transform_0(%arg0: i32) -> (i32, i32) {
    %c0_i32 = arith.constant 0 : i32
    %c0_i32_0 = arith.constant 0 : i32
    %c0_i32_1 = arith.constant 0 : i32
    return %c0_i32, %c0_i32_0 : i32, i32
  }
  func.func @transform_1(%arg0: i32) -> (i32, i32) {
    %c0_i32 = arith.constant 0 : i32
    %c0_i32_0 = arith.constant 0 : i32
    %c0_i32_1 = arith.constant 0 : i32
    return %c0_i32, %c0_i32_0 : i32, i32
  }
  func.func @transform_2(%arg0: i32) -> (i32, i32) {
    %c0_i32 = arith.constant 0 : i32
    %c0_i32_0 = arith.constant 0 : i32
    %c0_i32_1 = arith.constant 0 : i32
    return %c0_i32, %c0_i32_0 : i32, i32
  }
  func.func @transform_3(%arg0: i32) -> (i32, i32) {
    %c0_i32 = arith.constant 0 : i32
    %c0_i32_0 = arith.constant 0 : i32
    %c0_i32_1 = arith.constant 0 : i32
    return %c0_i32, %c0_i32_0 : i32, i32
  }
  func.func @transform_4(%arg0: i32) -> (i32, i32) {
    %c0_i32 = arith.constant 0 : i32
    %c0_i32_0 = arith.constant 0 : i32
    %c0_i32_1 = arith.constant 0 : i32
    return %c0_i32, %c0_i32_0 : i32, i32
  }
  func.func @transform_5(%arg0: i32) -> (i32, i32) {
    %c0_i32 = arith.constant 0 : i32
    %c0_i32_0 = arith.constant 0 : i32
    %c0_i32_1 = arith.constant 0 : i32
    return %c0_i32, %c0_i32_0 : i32, i32
  }
  func.func @transform_6(%arg0: i32) -> (i32, i32) {
    %c0_i32 = arith.constant 0 : i32
    %c0_i32_0 = arith.constant 0 : i32
    %c0_i32_1 = arith.constant 0 : i32
    return %c0_i32, %c0_i32_0 : i32, i32
  }
  func.func @transform_7(%arg0: i32) -> (i32, i32) {
    %c0_i32 = arith.constant 0 : i32
    %c0_i32_0 = arith.constant 0 : i32
    %c0_i32_1 = arith.constant 0 : i32
    return %c0_i32, %c0_i32_0 : i32, i32
  }
  func.func @transform_8(%arg0: i32) -> (i32, i32) {
    %c0_i32 = arith.constant 0 : i32
    %c0_i32_0 = arith.constant 0 : i32
    %c0_i32_1 = arith.constant 0 : i32
    return %c0_i32, %c0_i32_0 : i32, i32
  }
  func.func @transform_9(%arg0: i32) -> (i32, i32) {
    %c0_i32 = arith.constant 0 : i32
    %c0_i32_0 = arith.constant 0 : i32
    %c0_i32_1 = arith.constant 0 : i32
    return %c0_i32, %c0_i32_0 : i32, i32
  }
  func.func @transform_10(%arg0: i32) -> (i32, i32) {
    %c0_i32 = arith.constant 0 : i32
    %c0_i32_0 = arith.constant 0 : i32
    %c0_i32_1 = arith.constant 0 : i32
    return %c0_i32, %c0_i32_0 : i32, i32
  }
  func.func @transform_11(%arg0: i32) -> (i32, i32) {
    %c0_i32 = arith.constant 0 : i32
    %c0_i32_0 = arith.constant 0 : i32
    %c0_i32_1 = arith.constant 0 : i32
    return %c0_i32, %c0_i32_0 : i32, i32
  }
  func.func @transform_12(%arg0: i32) -> (i32, i32) {
    %c0_i32 = arith.constant 0 : i32
    %c0_i32_0 = arith.constant 0 : i32
    %c0_i32_1 = arith.constant 0 : i32
    return %c0_i32, %c0_i32_0 : i32, i32
  }
  func.func @transform_13(%arg0: i32) -> (i32, i32) {
    %c0_i32 = arith.constant 0 : i32
    %c0_i32_0 = arith.constant 0 : i32
    %c0_i32_1 = arith.constant 0 : i32
    return %c0_i32, %c0_i32_0 : i32, i32
  }
}

module attributes {stable_mosaic.version = 11 : i64} {
  func.func @_head_kernel(%arg0: i32, %arg1: memref<10x128xf32, #tpu.memory_space<vmem>>, %arg2: memref<1x128xf32, #tpu.memory_space<vmem>>, %arg3: memref<1x128xf32, #tpu.memory_space<vmem>>, %arg4: memref<128x128xbf16, #tpu.memory_space<vmem>>, %arg5: memref<1x128xf32, #tpu.memory_space<vmem>>, %arg6: memref<2x128xf32, #tpu.memory_space<vmem>>) attributes {dimension_semantics = [#tpu.dimension_semantics<arbitrary>], iteration_bounds = array<i64: 1>, scalar_prefetch = 0 : i64, scratch_operands = 0 : i64, tpu.core_type = #tpu.core_type<tc>, window_params = [{pipeline_mode = #tpu.pipeline_mode<synchronous>, transform_indices = @transform_0, window_bounds = array<i64: 10, 128>}, {pipeline_mode = #tpu.pipeline_mode<synchronous>, transform_indices = @transform_1, window_bounds = array<i64: 1, 128>}, {pipeline_mode = #tpu.pipeline_mode<synchronous>, transform_indices = @transform_2, window_bounds = array<i64: 1, 128>}, {pipeline_mode = #tpu.pipeline_mode<synchronous>, transform_indices = @transform_3, window_bounds = array<i64: 128, 128>}, {pipeline_mode = #tpu.pipeline_mode<synchronous>, transform_indices = @transform_4, window_bounds = array<i64: 1, 128>}, {pipeline_mode = #tpu.pipeline_mode<synchronous>, transform_indices = @transform_5, window_bounds = array<i64: 2, 128>}]} {
    %c0 = arith.constant 0 : index
    %c0_0 = arith.constant 0 : index
    %0 = vector.load %arg1[%c0, %c0_0] : memref<10x128xf32, #tpu.memory_space<vmem>>, vector<10x128xf32>
    %1 = vector.extract_strided_slice %0 {offsets = [0, 0], sizes = [1, 128], strides = [1, 1]} : vector<10x128xf32> to vector<1x128xf32>
    %2 = vector.extract_strided_slice %0 {offsets = [5, 0], sizes = [1, 128], strides = [1, 1]} : vector<10x128xf32> to vector<1x128xf32>
    %3 = tpu.concatenate %1, %2 in 0 : vector<1x128xf32>, vector<1x128xf32> -> vector<2x128xf32>
    %c0_1 = arith.constant 0 : index
    %c0_2 = arith.constant 0 : index
    %4 = vector.load %arg2[%c0_1, %c0_2] : memref<1x128xf32, #tpu.memory_space<vmem>>, vector<1x128xf32>
    %c0_3 = arith.constant 0 : index
    %c0_4 = arith.constant 0 : index
    %5 = vector.load %arg3[%c0_3, %c0_4] : memref<1x128xf32, #tpu.memory_space<vmem>>, vector<1x128xf32>
    %cst = arith.constant dense<0.000000e+00> : vector<2xf32>
    %6 = vector.multi_reduction <add>, %3, %cst [1] : vector<2x128xf32> to vector<2xf32>
    %7 = vector.shape_cast %6 : vector<2xf32> to vector<2x1xf32>
    %cst_5 = arith.constant 1.280000e+02 : f32
    %8 = vector.broadcast %cst_5 : f32 to vector<2x1xf32>
    %9 = arith.divf %7, %8 : vector<2x1xf32>
    %10 = vector.broadcast %9 : vector<2x1xf32> to vector<2x128xf32>
    %11 = arith.subf %3, %10 : vector<2x128xf32>
    %12 = arith.mulf %11, %11 : vector<2x128xf32>
    %cst_6 = arith.constant dense<0.000000e+00> : vector<2xf32>
    %13 = vector.multi_reduction <add>, %12, %cst_6 [1] : vector<2x128xf32> to vector<2xf32>
    %14 = vector.shape_cast %13 : vector<2xf32> to vector<2x1xf32>
    %cst_7 = arith.constant 1.280000e+02 : f32
    %15 = vector.broadcast %cst_7 : f32 to vector<2x1xf32>
    %16 = arith.divf %14, %15 : vector<2x1xf32>
    %17 = vector.broadcast %9 : vector<2x1xf32> to vector<2x128xf32>
    %18 = arith.subf %3, %17 : vector<2x128xf32>
    %cst_8 = arith.constant 9.99999997E-7 : f32
    %19 = vector.broadcast %cst_8 : f32 to vector<2x1xf32>
    %20 = arith.addf %16, %19 : vector<2x1xf32>
    %21 = math.rsqrt %20 : vector<2x1xf32>
    %22 = vector.broadcast %21 : vector<2x1xf32> to vector<2x128xf32>
    %23 = arith.mulf %18, %22 : vector<2x128xf32>
    %24 = vector.broadcast %4 : vector<1x128xf32> to vector<2x128xf32>
    %25 = arith.mulf %23, %24 : vector<2x128xf32>
    %26 = vector.broadcast %5 : vector<1x128xf32> to vector<2x128xf32>
    %27 = arith.addf %25, %26 : vector<2x128xf32>
    %28 = arith.truncf %27 : vector<2x128xf32> to vector<2x128xbf16>
    %c0_9 = arith.constant 0 : index
    %c0_10 = arith.constant 0 : index
    %29 = vector.load %arg4[%c0_9, %c0_10] : memref<128x128xbf16, #tpu.memory_space<vmem>>, vector<128x128xbf16>
    %cst_11 = arith.constant dense<0.000000e+00> : vector<2x128xf32>
    %30 = tpu.matmul %28, %29, %cst_11 {dimension_numbers = #tpu.dot_dimension_numbers<[1], [0], [0], [1], [0, 0, 1, 1], [], []>} : vector<2x128xbf16>, vector<128x128xbf16>, vector<2x128xf32> -> vector<2x128xf32>
    %c0_12 = arith.constant 0 : index
    %c0_13 = arith.constant 0 : index
    %31 = vector.load %arg5[%c0_12, %c0_13] : memref<1x128xf32, #tpu.memory_space<vmem>>, vector<1x128xf32>
    %32 = vector.broadcast %31 : vector<1x128xf32> to vector<2x128xf32>
    %33 = arith.addf %30, %32 : vector<2x128xf32>
    %34 = arith.negf %33 : vector<2x128xf32>
    %35 = math.exp %34 : vector<2x128xf32>
    %cst_14 = arith.constant 1.000000e+00 : f32
    %36 = vector.broadcast %cst_14 : f32 to vector<2x128xf32>
    %37 = arith.addf %36, %35 : vector<2x128xf32>
    %38 = arith.divf %36, %37 : vector<2x128xf32>
    %c0_15 = arith.constant 0 : index
    %c0_16 = arith.constant 0 : index
    %39 = vector.load %arg6[%c0_15, %c0_16] : memref<2x128xf32, #tpu.memory_space<vmem>>, vector<2x128xf32>
    tpu.vector_store %arg6[%c0_15, %c0_16], %38 {strides = array<i32>} : memref<2x128xf32, #tpu.memory_space<vmem>>, vector<2x128xf32>,
    return
  }
  func.func @transform_0(%arg0: i32) -> (i32, i32) {
    %c0_i32 = arith.constant 0 : i32
    %c0_i32_0 = arith.constant 0 : i32
    %c0_i32_1 = arith.constant 0 : i32
    return %c0_i32, %c0_i32_0 : i32, i32
  }
  func.func @transform_1(%arg0: i32) -> (i32, i32) {
    %c0_i32 = arith.constant 0 : i32
    %c0_i32_0 = arith.constant 0 : i32
    %c0_i32_1 = arith.constant 0 : i32
    return %c0_i32, %c0_i32_0 : i32, i32
  }
  func.func @transform_2(%arg0: i32) -> (i32, i32) {
    %c0_i32 = arith.constant 0 : i32
    %c0_i32_0 = arith.constant 0 : i32
    %c0_i32_1 = arith.constant 0 : i32
    return %c0_i32, %c0_i32_0 : i32, i32
  }
  func.func @transform_3(%arg0: i32) -> (i32, i32) {
    %c0_i32 = arith.constant 0 : i32
    %c0_i32_0 = arith.constant 0 : i32
    %c0_i32_1 = arith.constant 0 : i32
    return %c0_i32, %c0_i32_0 : i32, i32
  }
  func.func @transform_4(%arg0: i32) -> (i32, i32) {
    %c0_i32 = arith.constant 0 : i32
    %c0_i32_0 = arith.constant 0 : i32
    %c0_i32_1 = arith.constant 0 : i32
    return %c0_i32, %c0_i32_0 : i32, i32
  }
  func.func @transform_5(%arg0: i32) -> (i32, i32) {
    %c0_i32 = arith.constant 0 : i32
    %c0_i32_0 = arith.constant 0 : i32
    %c0_i32_1 = arith.constant 0 : i32
    return %c0_i32, %c0_i32_0 : i32, i32
  }
}

module attributes {stable_mosaic.version = 11 : i64} {
  func.func @_block_kernel(%arg0: i32, %arg1: memref<10x128xf32, #tpu.memory_space<vmem>>, %arg2: memref<1x128xf32, #tpu.memory_space<vmem>>, %arg3: memref<1x128xf32, #tpu.memory_space<vmem>>, %arg4: memref<128x384xbf16, #tpu.memory_space<vmem>>, %arg5: memref<1x384xf32, #tpu.memory_space<vmem>>, %arg6: memref<128x128xbf16, #tpu.memory_space<vmem>>, %arg7: memref<1x128xf32, #tpu.memory_space<vmem>>, %arg8: memref<1x128xf32, #tpu.memory_space<vmem>>, %arg9: memref<1x128xf32, #tpu.memory_space<vmem>>, %arg10: memref<128x512xbf16, #tpu.memory_space<vmem>>, %arg11: memref<1x512xf32, #tpu.memory_space<vmem>>, %arg12: memref<512x128xbf16, #tpu.memory_space<vmem>>, %arg13: memref<1x128xf32, #tpu.memory_space<vmem>>, %arg14: memref<10x128xf32, #tpu.memory_space<vmem>>) attributes {dimension_semantics = [#tpu.dimension_semantics<arbitrary>], iteration_bounds = array<i64: 1>, scalar_prefetch = 0 : i64, scratch_operands = 0 : i64, tpu.core_type = #tpu.core_type<tc>, window_params = [{pipeline_mode = #tpu.pipeline_mode<synchronous>, transform_indices = @transform_0, window_bounds = array<i64: 10, 128>}, {pipeline_mode = #tpu.pipeline_mode<synchronous>, transform_indices = @transform_1, window_bounds = array<i64: 1, 128>}, {pipeline_mode = #tpu.pipeline_mode<synchronous>, transform_indices = @transform_2, window_bounds = array<i64: 1, 128>}, {pipeline_mode = #tpu.pipeline_mode<synchronous>, transform_indices = @transform_3, window_bounds = array<i64: 128, 384>}, {pipeline_mode = #tpu.pipeline_mode<synchronous>, transform_indices = @transform_4, window_bounds = array<i64: 1, 384>}, {pipeline_mode = #tpu.pipeline_mode<synchronous>, transform_indices = @transform_5, window_bounds = array<i64: 128, 128>}, {pipeline_mode = #tpu.pipeline_mode<synchronous>, transform_indices = @transform_6, window_bounds = array<i64: 1, 128>}, {pipeline_mode = #tpu.pipeline_mode<synchronous>, transform_indices = @transform_7, window_bounds = array<i64: 1, 128>}, {pipeline_mode = #tpu.pipeline_mode<synchronous>, transform_indices = @transform_8, window_bounds = array<i64: 1, 128>}, {pipeline_mode = #tpu.pipeline_mode<synchronous>, transform_indices = @transform_9, window_bounds = array<i64: 128, 512>}, {pipeline_mode = #tpu.pipeline_mode<synchronous>, transform_indices = @transform_10, window_bounds = array<i64: 1, 512>}, {pipeline_mode = #tpu.pipeline_mode<synchronous>, transform_indices = @transform_11, window_bounds = array<i64: 512, 128>}, {pipeline_mode = #tpu.pipeline_mode<synchronous>, transform_indices = @transform_12, window_bounds = array<i64: 1, 128>}, {pipeline_mode = #tpu.pipeline_mode<synchronous>, transform_indices = @transform_13, window_bounds = array<i64: 10, 128>}]} {
    %c0 = arith.constant 0 : index
    %c0_0 = arith.constant 0 : index
    %0 = vector.load %arg1[%c0, %c0_0] : memref<10x128xf32, #tpu.memory_space<vmem>>, vector<10x128xf32>
    %c0_1 = arith.constant 0 : index
    %c0_2 = arith.constant 0 : index
    %1 = vector.load %arg2[%c0_1, %c0_2] : memref<1x128xf32, #tpu.memory_space<vmem>>, vector<1x128xf32>
    %c0_3 = arith.constant 0 : index
    %c0_4 = arith.constant 0 : index
    %2 = vector.load %arg3[%c0_3, %c0_4] : memref<1x128xf32, #tpu.memory_space<vmem>>, vector<1x128xf32>
    %cst = arith.constant dense<0.000000e+00> : vector<10xf32>
    %3 = vector.multi_reduction <add>, %0, %cst [1] : vector<10x128xf32> to vector<10xf32>
    %4 = vector.shape_cast %3 : vector<10xf32> to vector<10x1xf32>
    %cst_5 = arith.constant 1.280000e+02 : f32
    %5 = vector.broadcast %cst_5 : f32 to vector<10x1xf32>
    %6 = arith.divf %4, %5 : vector<10x1xf32>
    %7 = vector.broadcast %6 : vector<10x1xf32> to vector<10x128xf32>
    %8 = arith.subf %0, %7 : vector<10x128xf32>
    %9 = arith.mulf %8, %8 : vector<10x128xf32>
    %cst_6 = arith.constant dense<0.000000e+00> : vector<10xf32>
    %10 = vector.multi_reduction <add>, %9, %cst_6 [1] : vector<10x128xf32> to vector<10xf32>
    %11 = vector.shape_cast %10 : vector<10xf32> to vector<10x1xf32>
    %cst_7 = arith.constant 1.280000e+02 : f32
    %12 = vector.broadcast %cst_7 : f32 to vector<10x1xf32>
    %13 = arith.divf %11, %12 : vector<10x1xf32>
    %14 = vector.broadcast %6 : vector<10x1xf32> to vector<10x128xf32>
    %15 = arith.subf %0, %14 : vector<10x128xf32>
    %cst_8 = arith.constant 9.99999997E-7 : f32
    %16 = vector.broadcast %cst_8 : f32 to vector<10x1xf32>
    %17 = arith.addf %13, %16 : vector<10x1xf32>
    %18 = math.rsqrt %17 : vector<10x1xf32>
    %19 = vector.broadcast %18 : vector<10x1xf32> to vector<10x128xf32>
    %20 = arith.mulf %15, %19 : vector<10x128xf32>
    %21 = vector.broadcast %1 : vector<1x128xf32> to vector<10x128xf32>
    %22 = arith.mulf %20, %21 : vector<10x128xf32>
    %23 = vector.broadcast %2 : vector<1x128xf32> to vector<10x128xf32>
    %24 = arith.addf %22, %23 : vector<10x128xf32>
    %25 = arith.truncf %24 : vector<10x128xf32> to vector<10x128xbf16>
    %c0_9 = arith.constant 0 : index
    %c0_10 = arith.constant 0 : index
    %26 = vector.load %arg4[%c0_9, %c0_10] : memref<128x384xbf16, #tpu.memory_space<vmem>>, vector<128x384xbf16>
    %cst_11 = arith.constant dense<0.000000e+00> : vector<10x384xf32>
    %27 = tpu.matmul %25, %26, %cst_11 {dimension_numbers = #tpu.dot_dimension_numbers<[1], [0], [0], [1], [0, 0, 1, 1], [], []>} : vector<10x128xbf16>, vector<128x384xbf16>, vector<10x384xf32> -> vector<10x384xf32>
    %c0_12 = arith.constant 0 : index
    %c0_13 = arith.constant 0 : index
    %28 = vector.load %arg5[%c0_12, %c0_13] : memref<1x384xf32, #tpu.memory_space<vmem>>, vector<1x384xf32>
    %29 = vector.broadcast %28 : vector<1x384xf32> to vector<10x384xf32>
    %30 = arith.addf %27, %29 : vector<10x384xf32>
    %cst_14 = arith.constant 3.200000e+01 : f32
    %cst_15 = arith.constant -5.000000e-01 : f32
    %31 = math.powf %cst_14, %cst_15 : f32
    %32 = vector.extract_strided_slice %30 {offsets = [0, 0], sizes = [10, 128], strides = [1, 1]} : vector<10x384xf32> to vector<10x128xf32>
    %33 = vector.broadcast %31 : f32 to vector<10x128xf32>
    %34 = arith.mulf %32, %33 : vector<10x128xf32>
    %35 = arith.truncf %34 : vector<10x128xf32> to vector<10x128xbf16>
    %36 = vector.extract_strided_slice %30 {offsets = [0, 128], sizes = [10, 128], strides = [1, 1]} : vector<10x384xf32> to vector<10x128xf32>
    %37 = arith.truncf %36 : vector<10x128xf32> to vector<10x128xbf16>
    %38 = vector.extract_strided_slice %30 {offsets = [0, 256], sizes = [10, 128], strides = [1, 1]} : vector<10x384xf32> to vector<10x128xf32>
    %39 = arith.truncf %38 : vector<10x128xf32> to vector<10x128xbf16>
    %40 = vector.extract_strided_slice %35 {offsets = [0, 0], sizes = [5, 32], strides = [1, 1]} : vector<10x128xbf16> to vector<5x32xbf16>
    %41 = vector.extract_strided_slice %37 {offsets = [0, 0], sizes = [5, 32], strides = [1, 1]} : vector<10x128xbf16> to vector<5x32xbf16>
    "tpu.trace_start"() <{level = 10 : i32, message = "qd,kd->qk"}> : () -> ()
    %cst_16 = arith.constant dense<0.000000e+00> : vector<5x5xf32>
    %42 = tpu.matmul %40, %41, %cst_16 {dimension_numbers = #tpu.dot_dimension_numbers<[1], [1], [0], [0], [0, 0, 1, 0], [], []>} : vector<5x32xbf16>, vector<5x32xbf16>, vector<5x5xf32> -> vector<5x5xf32>
    "tpu.trace_stop"() : () -> ()
    %cst_17 = arith.constant dense<0xFF800000> : vector<5xf32>
    %43 = vector.multi_reduction <maximumf>, %42, %cst_17 [1] : vector<5x5xf32> to vector<5xf32>
    %44 = vector.shape_cast %43 : vector<5xf32> to vector<5x1xf32>
    %45 = vector.broadcast %44 : vector<5x1xf32> to vector<5x5xf32>
    %46 = arith.subf %42, %45 : vector<5x5xf32>
    %47 = math.exp %46 : vector<5x5xf32>
    %cst_18 = arith.constant dense<0.000000e+00> : vector<5xf32>
    %48 = vector.multi_reduction <add>, %47, %cst_18 [1] : vector<5x5xf32> to vector<5xf32>
    %49 = vector.shape_cast %48 : vector<5xf32> to vector<5x1xf32>
    %50 = tpu.reciprocal %49 {approx = true} : vector<5x1xf32> -> vector<5x1xf32>
    %51 = vector.broadcast %50 : vector<5x1xf32> to vector<5x5xf32>
    %52 = arith.mulf %47, %51 : vector<5x5xf32>
    %53 = arith.truncf %52 : vector<5x5xf32> to vector<5x5xbf16>
    %54 = vector.extract_strided_slice %39 {offsets = [0, 0], sizes = [5, 32], strides = [1, 1]} : vector<10x128xbf16> to vector<5x32xbf16>
    %cst_19 = arith.constant dense<0.000000e+00> : vector<5x32xf32>
    %55 = tpu.matmul %53, %54, %cst_19 {dimension_numbers = #tpu.dot_dimension_numbers<[1], [0], [0], [1], [0, 0, 1, 1], [], []>} : vector<5x5xbf16>, vector<5x32xbf16>, vector<5x32xf32> -> vector<5x32xf32>
    %56 = vector.extract_strided_slice %35 {offsets = [0, 32], sizes = [5, 32], strides = [1, 1]} : vector<10x128xbf16> to vector<5x32xbf16>
    %57 = vector.extract_strided_slice %37 {offsets = [0, 32], sizes = [5, 32], strides = [1, 1]} : vector<10x128xbf16> to vector<5x32xbf16>
    "tpu.trace_start"() <{level = 10 : i32, message = "qd,kd->qk"}> : () -> ()
    %cst_20 = arith.constant dense<0.000000e+00> : vector<5x5xf32>
    %58 = tpu.matmul %56, %57, %cst_20 {dimension_numbers = #tpu.dot_dimension_numbers<[1], [1], [0], [0], [0, 0, 1, 0], [], []>} : vector<5x32xbf16>, vector<5x32xbf16>, vector<5x5xf32> -> vector<5x5xf32>
    "tpu.trace_stop"() : () -> ()
    %cst_21 = arith.constant dense<0xFF800000> : vector<5xf32>
    %59 = vector.multi_reduction <maximumf>, %58, %cst_21 [1] : vector<5x5xf32> to vector<5xf32>
    %60 = vector.shape_cast %59 : vector<5xf32> to vector<5x1xf32>
    %61 = vector.broadcast %60 : vector<5x1xf32> to vector<5x5xf32>
    %62 = arith.subf %58, %61 : vector<5x5xf32>
    %63 = math.exp %62 : vector<5x5xf32>
    %cst_22 = arith.constant dense<0.000000e+00> : vector<5xf32>
    %64 = vector.multi_reduction <add>, %63, %cst_22 [1] : vector<5x5xf32> to vector<5xf32>
    %65 = vector.shape_cast %64 : vector<5xf32> to vector<5x1xf32>
    %66 = tpu.reciprocal %65 {approx = true} : vector<5x1xf32> -> vector<5x1xf32>
    %67 = vector.broadcast %66 : vector<5x1xf32> to vector<5x5xf32>
    %68 = arith.mulf %63, %67 : vector<5x5xf32>
    %69 = arith.truncf %68 : vector<5x5xf32> to vector<5x5xbf16>
    %70 = vector.extract_strided_slice %39 {offsets = [0, 32], sizes = [5, 32], strides = [1, 1]} : vector<10x128xbf16> to vector<5x32xbf16>
    %cst_23 = arith.constant dense<0.000000e+00> : vector<5x32xf32>
    %71 = tpu.matmul %69, %70, %cst_23 {dimension_numbers = #tpu.dot_dimension_numbers<[1], [0], [0], [1], [0, 0, 1, 1], [], []>} : vector<5x5xbf16>, vector<5x32xbf16>, vector<5x32xf32> -> vector<5x32xf32>
    %72 = vector.extract_strided_slice %35 {offsets = [0, 64], sizes = [5, 32], strides = [1, 1]} : vector<10x128xbf16> to vector<5x32xbf16>
    %73 = vector.extract_strided_slice %37 {offsets = [0, 64], sizes = [5, 32], strides = [1, 1]} : vector<10x128xbf16> to vector<5x32xbf16>
    "tpu.trace_start"() <{level = 10 : i32, message = "qd,kd->qk"}> : () -> ()
    %cst_24 = arith.constant dense<0.000000e+00> : vector<5x5xf32>
    %74 = tpu.matmul %72, %73, %cst_24 {dimension_numbers = #tpu.dot_dimension_numbers<[1], [1], [0], [0], [0, 0, 1, 0], [], []>} : vector<5x32xbf16>, vector<5x32xbf16>, vector<5x5xf32> -> vector<5x5xf32>
    "tpu.trace_stop"() : () -> ()
    %cst_25 = arith.constant dense<0xFF800000> : vector<5xf32>
    %75 = vector.multi_reduction <maximumf>, %74, %cst_25 [1] : vector<5x5xf32> to vector<5xf32>
    %76 = vector.shape_cast %75 : vector<5xf32> to vector<5x1xf32>
    %77 = vector.broadcast %76 : vector<5x1xf32> to vector<5x5xf32>
    %78 = arith.subf %74, %77 : vector<5x5xf32>
    %79 = math.exp %78 : vector<5x5xf32>
    %cst_26 = arith.constant dense<0.000000e+00> : vector<5xf32>
    %80 = vector.multi_reduction <add>, %79, %cst_26 [1] : vector<5x5xf32> to vector<5xf32>
    %81 = vector.shape_cast %80 : vector<5xf32> to vector<5x1xf32>
    %82 = tpu.reciprocal %81 {approx = true} : vector<5x1xf32> -> vector<5x1xf32>
    %83 = vector.broadcast %82 : vector<5x1xf32> to vector<5x5xf32>
    %84 = arith.mulf %79, %83 : vector<5x5xf32>
    %85 = arith.truncf %84 : vector<5x5xf32> to vector<5x5xbf16>
    %86 = vector.extract_strided_slice %39 {offsets = [0, 64], sizes = [5, 32], strides = [1, 1]} : vector<10x128xbf16> to vector<5x32xbf16>
    %cst_27 = arith.constant dense<0.000000e+00> : vector<5x32xf32>
    %87 = tpu.matmul %85, %86, %cst_27 {dimension_numbers = #tpu.dot_dimension_numbers<[1], [0], [0], [1], [0, 0, 1, 1], [], []>} : vector<5x5xbf16>, vector<5x32xbf16>, vector<5x32xf32> -> vector<5x32xf32>
    %88 = vector.extract_strided_slice %35 {offsets = [0, 96], sizes = [5, 32], strides = [1, 1]} : vector<10x128xbf16> to vector<5x32xbf16>
    %89 = vector.extract_strided_slice %37 {offsets = [0, 96], sizes = [5, 32], strides = [1, 1]} : vector<10x128xbf16> to vector<5x32xbf16>
    "tpu.trace_start"() <{level = 10 : i32, message = "qd,kd->qk"}> : () -> ()
    %cst_28 = arith.constant dense<0.000000e+00> : vector<5x5xf32>
    %90 = tpu.matmul %88, %89, %cst_28 {dimension_numbers = #tpu.dot_dimension_numbers<[1], [1], [0], [0], [0, 0, 1, 0], [], []>} : vector<5x32xbf16>, vector<5x32xbf16>, vector<5x5xf32> -> vector<5x5xf32>
    "tpu.trace_stop"() : () -> ()
    %cst_29 = arith.constant dense<0xFF800000> : vector<5xf32>
    %91 = vector.multi_reduction <maximumf>, %90, %cst_29 [1] : vector<5x5xf32> to vector<5xf32>
    %92 = vector.shape_cast %91 : vector<5xf32> to vector<5x1xf32>
    %93 = vector.broadcast %92 : vector<5x1xf32> to vector<5x5xf32>
    %94 = arith.subf %90, %93 : vector<5x5xf32>
    %95 = math.exp %94 : vector<5x5xf32>
    %cst_30 = arith.constant dense<0.000000e+00> : vector<5xf32>
    %96 = vector.multi_reduction <add>, %95, %cst_30 [1] : vector<5x5xf32> to vector<5xf32>
    %97 = vector.shape_cast %96 : vector<5xf32> to vector<5x1xf32>
    %98 = tpu.reciprocal %97 {approx = true} : vector<5x1xf32> -> vector<5x1xf32>
    %99 = vector.broadcast %98 : vector<5x1xf32> to vector<5x5xf32>
    %100 = arith.mulf %95, %99 : vector<5x5xf32>
    %101 = arith.truncf %100 : vector<5x5xf32> to vector<5x5xbf16>
    %102 = vector.extract_strided_slice %39 {offsets = [0, 96], sizes = [5, 32], strides = [1, 1]} : vector<10x128xbf16> to vector<5x32xbf16>
    %cst_31 = arith.constant dense<0.000000e+00> : vector<5x32xf32>
    %103 = tpu.matmul %101, %102, %cst_31 {dimension_numbers = #tpu.dot_dimension_numbers<[1], [0], [0], [1], [0, 0, 1, 1], [], []>} : vector<5x5xbf16>, vector<5x32xbf16>, vector<5x32xf32> -> vector<5x32xf32>
    %104 = tpu.concatenate %55, %71, %87, %103 in 1 : vector<5x32xf32>, vector<5x32xf32>, vector<5x32xf32>, vector<5x32xf32> -> vector<5x128xf32>
    %105 = vector.extract_strided_slice %35 {offsets = [5, 0], sizes = [5, 32], strides = [1, 1]} : vector<10x128xbf16> to vector<5x32xbf16>
    %106 = vector.extract_strided_slice %37 {offsets = [5, 0], sizes = [5, 32], strides = [1, 1]} : vector<10x128xbf16> to vector<5x32xbf16>
    "tpu.trace_start"() <{level = 10 : i32, message = "qd,kd->qk"}> : () -> ()
    %cst_32 = arith.constant dense<0.000000e+00> : vector<5x5xf32>
    %107 = tpu.matmul %105, %106, %cst_32 {dimension_numbers = #tpu.dot_dimension_numbers<[1], [1], [0], [0], [0, 0, 1, 0], [], []>} : vector<5x32xbf16>, vector<5x32xbf16>, vector<5x5xf32> -> vector<5x5xf32>
    "tpu.trace_stop"() : () -> ()
    %cst_33 = arith.constant dense<0xFF800000> : vector<5xf32>
    %108 = vector.multi_reduction <maximumf>, %107, %cst_33 [1] : vector<5x5xf32> to vector<5xf32>
    %109 = vector.shape_cast %108 : vector<5xf32> to vector<5x1xf32>
    %110 = vector.broadcast %109 : vector<5x1xf32> to vector<5x5xf32>
    %111 = arith.subf %107, %110 : vector<5x5xf32>
    %112 = math.exp %111 : vector<5x5xf32>
    %cst_34 = arith.constant dense<0.000000e+00> : vector<5xf32>
    %113 = vector.multi_reduction <add>, %112, %cst_34 [1] : vector<5x5xf32> to vector<5xf32>
    %114 = vector.shape_cast %113 : vector<5xf32> to vector<5x1xf32>
    %115 = tpu.reciprocal %114 {approx = true} : vector<5x1xf32> -> vector<5x1xf32>
    %116 = vector.broadcast %115 : vector<5x1xf32> to vector<5x5xf32>
    %117 = arith.mulf %112, %116 : vector<5x5xf32>
    %118 = arith.truncf %117 : vector<5x5xf32> to vector<5x5xbf16>
    %119 = vector.extract_strided_slice %39 {offsets = [5, 0], sizes = [5, 32], strides = [1, 1]} : vector<10x128xbf16> to vector<5x32xbf16>
    %cst_35 = arith.constant dense<0.000000e+00> : vector<5x32xf32>
    %120 = tpu.matmul %118, %119, %cst_35 {dimension_numbers = #tpu.dot_dimension_numbers<[1], [0], [0], [1], [0, 0, 1, 1], [], []>} : vector<5x5xbf16>, vector<5x32xbf16>, vector<5x32xf32> -> vector<5x32xf32>
    %121 = vector.extract_strided_slice %35 {offsets = [5, 32], sizes = [5, 32], strides = [1, 1]} : vector<10x128xbf16> to vector<5x32xbf16>
    %122 = vector.extract_strided_slice %37 {offsets = [5, 32], sizes = [5, 32], strides = [1, 1]} : vector<10x128xbf16> to vector<5x32xbf16>
    "tpu.trace_start"() <{level = 10 : i32, message = "qd,kd->qk"}> : () -> ()
    %cst_36 = arith.constant dense<0.000000e+00> : vector<5x5xf32>
    %123 = tpu.matmul %121, %122, %cst_36 {dimension_numbers = #tpu.dot_dimension_numbers<[1], [1], [0], [0], [0, 0, 1, 0], [], []>} : vector<5x32xbf16>, vector<5x32xbf16>, vector<5x5xf32> -> vector<5x5xf32>
    "tpu.trace_stop"() : () -> ()
    %cst_37 = arith.constant dense<0xFF800000> : vector<5xf32>
    %124 = vector.multi_reduction <maximumf>, %123, %cst_37 [1] : vector<5x5xf32> to vector<5xf32>
    %125 = vector.shape_cast %124 : vector<5xf32> to vector<5x1xf32>
    %126 = vector.broadcast %125 : vector<5x1xf32> to vector<5x5xf32>
    %127 = arith.subf %123, %126 : vector<5x5xf32>
    %128 = math.exp %127 : vector<5x5xf32>
    %cst_38 = arith.constant dense<0.000000e+00> : vector<5xf32>
    %129 = vector.multi_reduction <add>, %128, %cst_38 [1] : vector<5x5xf32> to vector<5xf32>
    %130 = vector.shape_cast %129 : vector<5xf32> to vector<5x1xf32>
    %131 = tpu.reciprocal %130 {approx = true} : vector<5x1xf32> -> vector<5x1xf32>
    %132 = vector.broadcast %131 : vector<5x1xf32> to vector<5x5xf32>
    %133 = arith.mulf %128, %132 : vector<5x5xf32>
    %134 = arith.truncf %133 : vector<5x5xf32> to vector<5x5xbf16>
    %135 = vector.extract_strided_slice %39 {offsets = [5, 32], sizes = [5, 32], strides = [1, 1]} : vector<10x128xbf16> to vector<5x32xbf16>
    %cst_39 = arith.constant dense<0.000000e+00> : vector<5x32xf32>
    %136 = tpu.matmul %134, %135, %cst_39 {dimension_numbers = #tpu.dot_dimension_numbers<[1], [0], [0], [1], [0, 0, 1, 1], [], []>} : vector<5x5xbf16>, vector<5x32xbf16>, vector<5x32xf32> -> vector<5x32xf32>
    %137 = vector.extract_strided_slice %35 {offsets = [5, 64], sizes = [5, 32], strides = [1, 1]} : vector<10x128xbf16> to vector<5x32xbf16>
    %138 = vector.extract_strided_slice %37 {offsets = [5, 64], sizes = [5, 32], strides = [1, 1]} : vector<10x128xbf16> to vector<5x32xbf16>
    "tpu.trace_start"() <{level = 10 : i32, message = "qd,kd->qk"}> : () -> ()
    %cst_40 = arith.constant dense<0.000000e+00> : vector<5x5xf32>
    %139 = tpu.matmul %137, %138, %cst_40 {dimension_numbers = #tpu.dot_dimension_numbers<[1], [1], [0], [0], [0, 0, 1, 0], [], []>} : vector<5x32xbf16>, vector<5x32xbf16>, vector<5x5xf32> -> vector<5x5xf32>
    "tpu.trace_stop"() : () -> ()
    %cst_41 = arith.constant dense<0xFF800000> : vector<5xf32>
    %140 = vector.multi_reduction <maximumf>, %139, %cst_41 [1] : vector<5x5xf32> to vector<5xf32>
    %141 = vector.shape_cast %140 : vector<5xf32> to vector<5x1xf32>
    %142 = vector.broadcast %141 : vector<5x1xf32> to vector<5x5xf32>
    %143 = arith.subf %139, %142 : vector<5x5xf32>
    %144 = math.exp %143 : vector<5x5xf32>
    %cst_42 = arith.constant dense<0.000000e+00> : vector<5xf32>
    %145 = vector.multi_reduction <add>, %144, %cst_42 [1] : vector<5x5xf32> to vector<5xf32>
    %146 = vector.shape_cast %145 : vector<5xf32> to vector<5x1xf32>
    %147 = tpu.reciprocal %146 {approx = true} : vector<5x1xf32> -> vector<5x1xf32>
    %148 = vector.broadcast %147 : vector<5x1xf32> to vector<5x5xf32>
    %149 = arith.mulf %144, %148 : vector<5x5xf32>
    %150 = arith.truncf %149 : vector<5x5xf32> to vector<5x5xbf16>
    %151 = vector.extract_strided_slice %39 {offsets = [5, 64], sizes = [5, 32], strides = [1, 1]} : vector<10x128xbf16> to vector<5x32xbf16>
    %cst_43 = arith.constant dense<0.000000e+00> : vector<5x32xf32>
    %152 = tpu.matmul %150, %151, %cst_43 {dimension_numbers = #tpu.dot_dimension_numbers<[1], [0], [0], [1], [0, 0, 1, 1], [], []>} : vector<5x5xbf16>, vector<5x32xbf16>, vector<5x32xf32> -> vector<5x32xf32>
    %153 = vector.extract_strided_slice %35 {offsets = [5, 96], sizes = [5, 32], strides = [1, 1]} : vector<10x128xbf16> to vector<5x32xbf16>
    %154 = vector.extract_strided_slice %37 {offsets = [5, 96], sizes = [5, 32], strides = [1, 1]} : vector<10x128xbf16> to vector<5x32xbf16>
    "tpu.trace_start"() <{level = 10 : i32, message = "qd,kd->qk"}> : () -> ()
    %cst_44 = arith.constant dense<0.000000e+00> : vector<5x5xf32>
    %155 = tpu.matmul %153, %154, %cst_44 {dimension_numbers = #tpu.dot_dimension_numbers<[1], [1], [0], [0], [0, 0, 1, 0], [], []>} : vector<5x32xbf16>, vector<5x32xbf16>, vector<5x5xf32> -> vector<5x5xf32>
    "tpu.trace_stop"() : () -> ()
    %cst_45 = arith.constant dense<0xFF800000> : vector<5xf32>
    %156 = vector.multi_reduction <maximumf>, %155, %cst_45 [1] : vector<5x5xf32> to vector<5xf32>
    %157 = vector.shape_cast %156 : vector<5xf32> to vector<5x1xf32>
    %158 = vector.broadcast %157 : vector<5x1xf32> to vector<5x5xf32>
    %159 = arith.subf %155, %158 : vector<5x5xf32>
    %160 = math.exp %159 : vector<5x5xf32>
    %cst_46 = arith.constant dense<0.000000e+00> : vector<5xf32>
    %161 = vector.multi_reduction <add>, %160, %cst_46 [1] : vector<5x5xf32> to vector<5xf32>
    %162 = vector.shape_cast %161 : vector<5xf32> to vector<5x1xf32>
    %163 = tpu.reciprocal %162 {approx = true} : vector<5x1xf32> -> vector<5x1xf32>
    %164 = vector.broadcast %163 : vector<5x1xf32> to vector<5x5xf32>
    %165 = arith.mulf %160, %164 : vector<5x5xf32>
    %166 = arith.truncf %165 : vector<5x5xf32> to vector<5x5xbf16>
    %167 = vector.extract_strided_slice %39 {offsets = [5, 96], sizes = [5, 32], strides = [1, 1]} : vector<10x128xbf16> to vector<5x32xbf16>
    %cst_47 = arith.constant dense<0.000000e+00> : vector<5x32xf32>
    %168 = tpu.matmul %166, %167, %cst_47 {dimension_numbers = #tpu.dot_dimension_numbers<[1], [0], [0], [1], [0, 0, 1, 1], [], []>} : vector<5x5xbf16>, vector<5x32xbf16>, vector<5x32xf32> -> vector<5x32xf32>
    %169 = tpu.concatenate %120, %136, %152, %168 in 1 : vector<5x32xf32>, vector<5x32xf32>, vector<5x32xf32>, vector<5x32xf32> -> vector<5x128xf32>
    %170 = tpu.concatenate %104, %169 in 0 : vector<5x128xf32>, vector<5x128xf32> -> vector<10x128xf32>
    %171 = arith.truncf %170 : vector<10x128xf32> to vector<10x128xbf16>
    %c0_48 = arith.constant 0 : index
    %c0_49 = arith.constant 0 : index
    %172 = vector.load %arg6[%c0_48, %c0_49] : memref<128x128xbf16, #tpu.memory_space<vmem>>, vector<128x128xbf16>
    %cst_50 = arith.constant dense<0.000000e+00> : vector<10x128xf32>
    %173 = tpu.matmul %171, %172, %cst_50 {dimension_numbers = #tpu.dot_dimension_numbers<[1], [0], [0], [1], [0, 0, 1, 1], [], []>} : vector<10x128xbf16>, vector<128x128xbf16>, vector<10x128xf32> -> vector<10x128xf32>
    %c0_51 = arith.constant 0 : index
    %c0_52 = arith.constant 0 : index
    %174 = vector.load %arg7[%c0_51, %c0_52] : memref<1x128xf32, #tpu.memory_space<vmem>>, vector<1x128xf32>
    %175 = vector.broadcast %174 : vector<1x128xf32> to vector<10x128xf32>
    %176 = arith.addf %173, %175 : vector<10x128xf32>
    %177 = arith.addf %0, %176 : vector<10x128xf32>
    %c0_53 = arith.constant 0 : index
    %c0_54 = arith.constant 0 : index
    %178 = vector.load %arg8[%c0_53, %c0_54] : memref<1x128xf32, #tpu.memory_space<vmem>>, vector<1x128xf32>
    %c0_55 = arith.constant 0 : index
    %c0_56 = arith.constant 0 : index
    %179 = vector.load %arg9[%c0_55, %c0_56] : memref<1x128xf32, #tpu.memory_space<vmem>>, vector<1x128xf32>
    %cst_57 = arith.constant dense<0.000000e+00> : vector<10xf32>
    %180 = vector.multi_reduction <add>, %177, %cst_57 [1] : vector<10x128xf32> to vector<10xf32>
    %181 = vector.shape_cast %180 : vector<10xf32> to vector<10x1xf32>
    %cst_58 = arith.constant 1.280000e+02 : f32
    %182 = vector.broadcast %cst_58 : f32 to vector<10x1xf32>
    %183 = arith.divf %181, %182 : vector<10x1xf32>
    %184 = vector.broadcast %183 : vector<10x1xf32> to vector<10x128xf32>
    %185 = arith.subf %177, %184 : vector<10x128xf32>
    %186 = arith.mulf %185, %185 : vector<10x128xf32>
    %cst_59 = arith.constant dense<0.000000e+00> : vector<10xf32>
    %187 = vector.multi_reduction <add>, %186, %cst_59 [1] : vector<10x128xf32> to vector<10xf32>
    %188 = vector.shape_cast %187 : vector<10xf32> to vector<10x1xf32>
    %cst_60 = arith.constant 1.280000e+02 : f32
    %189 = vector.broadcast %cst_60 : f32 to vector<10x1xf32>
    %190 = arith.divf %188, %189 : vector<10x1xf32>
    %191 = vector.broadcast %183 : vector<10x1xf32> to vector<10x128xf32>
    %192 = arith.subf %177, %191 : vector<10x128xf32>
    %cst_61 = arith.constant 9.99999997E-7 : f32
    %193 = vector.broadcast %cst_61 : f32 to vector<10x1xf32>
    %194 = arith.addf %190, %193 : vector<10x1xf32>
    %195 = math.rsqrt %194 : vector<10x1xf32>
    %196 = vector.broadcast %195 : vector<10x1xf32> to vector<10x128xf32>
    %197 = arith.mulf %192, %196 : vector<10x128xf32>
    %198 = vector.broadcast %178 : vector<1x128xf32> to vector<10x128xf32>
    %199 = arith.mulf %197, %198 : vector<10x128xf32>
    %200 = vector.broadcast %179 : vector<1x128xf32> to vector<10x128xf32>
    %201 = arith.addf %199, %200 : vector<10x128xf32>
    %202 = arith.truncf %201 : vector<10x128xf32> to vector<10x128xbf16>
    %c0_62 = arith.constant 0 : index
    %c0_63 = arith.constant 0 : index
    %203 = vector.load %arg10[%c0_62, %c0_63] : memref<128x512xbf16, #tpu.memory_space<vmem>>, vector<128x512xbf16>
    %cst_64 = arith.constant dense<0.000000e+00> : vector<10x512xf32>
    %204 = tpu.matmul %202, %203, %cst_64 {dimension_numbers = #tpu.dot_dimension_numbers<[1], [0], [0], [1], [0, 0, 1, 1], [], []>} : vector<10x128xbf16>, vector<128x512xbf16>, vector<10x512xf32> -> vector<10x512xf32>
    %c0_65 = arith.constant 0 : index
    %c0_66 = arith.constant 0 : index
    %205 = vector.load %arg11[%c0_65, %c0_66] : memref<1x512xf32, #tpu.memory_space<vmem>>, vector<1x512xf32>
    %206 = vector.broadcast %205 : vector<1x512xf32> to vector<10x512xf32>
    %207 = arith.addf %204, %206 : vector<10x512xf32>
    %cst_67 = arith.constant 5.000000e-01 : f32
    %208 = vector.broadcast %cst_67 : f32 to vector<10x512xf32>
    %209 = arith.mulf %208, %207 : vector<10x512xf32>
    %cst_68 = arith.constant 0.707106769 : f32
    %210 = vector.broadcast %cst_68 : f32 to vector<10x512xf32>
    %211 = arith.mulf %207, %210 : vector<10x512xf32>
    %212 = math.erf %211 : vector<10x512xf32>
    %cst_69 = arith.constant 1.000000e+00 : f32
    %213 = vector.broadcast %cst_69 : f32 to vector<10x512xf32>
    %214 = arith.addf %213, %212 : vector<10x512xf32>
    %215 = arith.mulf %209, %214 : vector<10x512xf32>
    %216 = arith.truncf %215 : vector<10x512xf32> to vector<10x512xbf16>
    %c0_70 = arith.constant 0 : index
    %c0_71 = arith.constant 0 : index
    %217 = vector.load %arg12[%c0_70, %c0_71] : memref<512x128xbf16, #tpu.memory_space<vmem>>, vector<512x128xbf16>
    %cst_72 = arith.constant dense<0.000000e+00> : vector<10x128xf32>
    %218 = tpu.matmul %216, %217, %cst_72 {dimension_numbers = #tpu.dot_dimension_numbers<[1], [0], [0], [1], [0, 0, 1, 1], [], []>} : vector<10x512xbf16>, vector<512x128xbf16>, vector<10x128xf32> -> vector<10x128xf32>
    %c0_73 = arith.constant 0 : index
    %c0_74 = arith.constant 0 : index
    %219 = vector.load %arg13[%c0_73, %c0_74] : memref<1x128xf32, #tpu.memory_space<vmem>>, vector<1x128xf32>
    %220 = vector.broadcast %219 : vector<1x128xf32> to vector<10x128xf32>
    %221 = arith.addf %218, %220 : vector<10x128xf32>
    %222 = arith.addf %177, %221 : vector<10x128xf32>
    %c0_75 = arith.constant 0 : index
    %c0_76 = arith.constant 0 : index
    %223 = vector.load %arg14[%c0_75, %c0_76] : memref<10x128xf32, #tpu.memory_space<vmem>>, vector<10x128xf32>
    tpu.vector_store %arg14[%c0_75, %c0_76], %222 {strides = array<i32>} : memref<10x128xf32, #tpu.memory_space<vmem>>, vector<10x128xf32>,
    return
  }
  func.func @transform_0(%arg0: i32) -> (i32, i32) {
    %c0_i32 = arith.constant 0 : i32
    %c0_i32_0 = arith.constant 0 : i32
    %c0_i32_1 = arith.constant 0 : i32
    return %c0_i32, %c0_i32_0 : i32, i32
  }
  func.func @transform_1(%arg0: i32) -> (i32, i32) {
    %c0_i32 = arith.constant 0 : i32
    %c0_i32_0 = arith.constant 0 : i32
    %c0_i32_1 = arith.constant 0 : i32
    return %c0_i32, %c0_i32_0 : i32, i32
  }
  func.func @transform_2(%arg0: i32) -> (i32, i32) {
    %c0_i32 = arith.constant 0 : i32
    %c0_i32_0 = arith.constant 0 : i32
    %c0_i32_1 = arith.constant 0 : i32
    return %c0_i32, %c0_i32_0 : i32, i32
  }
  func.func @transform_3(%arg0: i32) -> (i32, i32) {
    %c0_i32 = arith.constant 0 : i32
    %c0_i32_0 = arith.constant 0 : i32
    %c0_i32_1 = arith.constant 0 : i32
    return %c0_i32, %c0_i32_0 : i32, i32
  }
  func.func @transform_4(%arg0: i32) -> (i32, i32) {
    %c0_i32 = arith.constant 0 : i32
    %c0_i32_0 = arith.constant 0 : i32
    %c0_i32_1 = arith.constant 0 : i32
    return %c0_i32, %c0_i32_0 : i32, i32
  }
  func.func @transform_5(%arg0: i32) -> (i32, i32) {
    %c0_i32 = arith.constant 0 : i32
    %c0_i32_0 = arith.constant 0 : i32
    %c0_i32_1 = arith.constant 0 : i32
    return %c0_i32, %c0_i32_0 : i32, i32
  }
  func.func @transform_6(%arg0: i32) -> (i32, i32) {
    %c0_i32 = arith.constant 0 : i32
    %c0_i32_0 = arith.constant 0 : i32
    %c0_i32_1 = arith.constant 0 : i32
    return %c0_i32, %c0_i32_0 : i32, i32
  }
  func.func @transform_7(%arg0: i32) -> (i32, i32) {
    %c0_i32 = arith.constant 0 : i32
    %c0_i32_0 = arith.constant 0 : i32
    %c0_i32_1 = arith.constant 0 : i32
    return %c0_i32, %c0_i32_0 : i32, i32
  }
  func.func @transform_8(%arg0: i32) -> (i32, i32) {
    %c0_i32 = arith.constant 0 : i32
    %c0_i32_0 = arith.constant 0 : i32
    %c0_i32_1 = arith.constant 0 : i32
    return %c0_i32, %c0_i32_0 : i32, i32
  }
  func.func @transform_9(%arg0: i32) -> (i32, i32) {
    %c0_i32 = arith.constant 0 : i32
    %c0_i32_0 = arith.constant 0 : i32
    %c0_i32_1 = arith.constant 0 : i32
    return %c0_i32, %c0_i32_0 : i32, i32
  }
  func.func @transform_10(%arg0: i32) -> (i32, i32) {
    %c0_i32 = arith.constant 0 : i32
    %c0_i32_0 = arith.constant 0 : i32
    %c0_i32_1 = arith.constant 0 : i32
    return %c0_i32, %c0_i32_0 : i32, i32
  }
  func.func @transform_11(%arg0: i32) -> (i32, i32) {
    %c0_i32 = arith.constant 0 : i32
    %c0_i32_0 = arith.constant 0 : i32
    %c0_i32_1 = arith.constant 0 : i32
    return %c0_i32, %c0_i32_0 : i32, i32
  }
  func.func @transform_12(%arg0: i32) -> (i32, i32) {
    %c0_i32 = arith.constant 0 : i32
    %c0_i32_0 = arith.constant 0 : i32
    %c0_i32_1 = arith.constant 0 : i32
    return %c0_i32, %c0_i32_0 : i32, i32
  }
  func.func @transform_13(%arg0: i32) -> (i32, i32) {
    %c0_i32 = arith.constant 0 : i32
    %c0_i32_0 = arith.constant 0 : i32
    %c0_i32_1 = arith.constant 0 : i32
    return %c0_i32, %c0_i32_0 : i32, i32
  }
}

</mosaic_0001>

<bundles_post_ra>
// kernel: vit_model_forward.4
= control target key start
LH: loop header
LB: loop body
LE: loop exit
PB: predicated region body
PF: predicated region fallthrough
CT: control target
= control target key end

     0   :  { %10 = vsyncpa [#allocation3], 0  ;;  %s1095_s0 = inlined_call_operand.vmem [shape: f32[8,768], index: 0, kind: input, shape index: {}]   ;;  %s1096_s1 = inlined_call_operand.vmem [shape: bf16[768,128], index: 1, kind: input, shape index: {}]   ;;  %s1097_s2 = inlined_call_operand.hbm [shape: f32[1,128], index: 2, kind: input, shape index: {}]   ;;  %s1098_s3 = inlined_call_operand.hbm [shape: f32[1,128], index: 3, kind: input, shape index: {}]   ;;  %s1099_s4 = inlined_call_operand.hbm [shape: f32[5,128], index: 4, kind: input, shape index: {}]   ;;  %s1100_s5 = inlined_call_operand.vmem [shape: f32[10,128], index: 5, kind: output, shape index: {}]  }
   0x1   :  { %11 = vsyncpa [#allocation5], 0  ;;  %s32_s20 = sshll.u32 %s1098_s3, 4  ;;  %s879_s21 = smov [#allocation4]   ;;  %s33_s20 = int_to_ptr.hbm [resolvable:$true] %s32_s20 }
   0x2   :  { %s34_s22 = sshll.u32 %s879_s21, 4  ;;  %s21_s25 = sshll.u32 %s1097_s2, 4  ;;  %s35_s22 = int_to_ptr.vmem [resolvable:$true] %s34_s22  ;;  %s22_s25 = int_to_ptr.hbm [resolvable:$true] %s21_s25 }
   0x3   :  { %37 = dma.hbm_to_vmem [thread:$0]  %s33_s20, 16, %s35_s22, [#allocation5]  }
   0x4   :  { %s880_s26 = smov [#allocation2]   ;;  %s43_s30 = sshll.u32 %s1099_s4, 4  ;;  %s44_s30 = int_to_ptr.hbm [resolvable:$true] %s43_s30 }
   0x5   :  { %s23_s27 = sshll.u32 %s880_s26, 4  ;;  %s881_s3 = smov [#allocation6]   ;;  %s24_s27 = int_to_ptr.vmem [resolvable:$true] %s23_s27 }
   0x6   :  { %26 = dma.hbm_to_vmem [thread:$0]  %s22_s25, 16, %s24_s27, [#allocation3]  }
   0x7   :  { %s45_s6 = sshll.u32 %s881_s3, 4  ;;  %s46_s6 = int_to_ptr.vmem [resolvable:$true] %s45_s6 }
   0x8   :  { %48 = dma.hbm_to_vmem [thread:$0]  %s44_s30, 128, %s46_s6, [#allocation5]  }
   0x9   :  { %875 = dma.done.wait [#allocation3], 16  }
   0xa   :  { %876 = vsyncadd [#allocation3], 4294967280 }
   0xb   :  { %877 = dma.done.wait [#allocation5], 144  }
   0xc   :  { %878 = vsyncadd [#allocation5], 4294967152  ;;  %v758_v0 = vld [vmem:[%s1096_s1 + $0x38] sm:$0xff]  ;;  %v757_v2 = vld [vmem:[%s1096_s1 + $0x30] sm:$0xff] }
   0xd   :  { %v766_v1 = vld [vmem:[%s1096_s1 + $0x78] sm:$0xff]  ;;  %461 = vmatpush.bf16.msra.mxu0 %v758_v0  ;;  %v765_v3 = vld [vmem:[%s1096_s1 + $0x70] sm:$0xff]  ;;  %v756_v8 = vld [vmem:[%s1096_s1 + $0x28] sm:$0xff] }
   0xe   :  { %474 = vmatpush.bf16.msra.mxu1 %v766_v1  ;;  %v774_v4 = vld [vmem:[%s1096_s1 + $0xb8] sm:$0xff]  ;;  %v773_v6 = vld [vmem:[%s1096_s1 + $0xb0] sm:$0xff]  ;;  %v764_v9 = vld [vmem:[%s1096_s1 + $0x68] sm:$0xff] }
   0xf   :  { %v782_v5 = vld [vmem:[%s1096_s1 + $0xf8] sm:$0xff]  ;;  %487 = vmatpush.bf16.msra.mxu2 %v774_v4  ;;  %v781_v7 = vld [vmem:[%s1096_s1 + $0xf0] sm:$0xff]  ;;  %v772_v10 = vld [vmem:[%s1096_s1 + $0xa8] sm:$0xff] }
  0x10   :  { %500 = vmatpush.bf16.msra.mxu3 %v782_v5  ;;  %v780_v11 = vld [vmem:[%s1096_s1 + $0xe8] sm:$0xff]  ;;  %v755_v12 = vld [vmem:[%s1096_s1 + $0x20] sm:$0xff]  ;;  %v754_v16 = vld [vmem:[%s1096_s1 + $0x18] sm:$0xff] }
  0x11   :  { %462 = vmatpush.bf16.msra.mxu0 %v757_v2  ;;  %v763_v13 = vld [vmem:[%s1096_s1 + $0x60] sm:$0xff]  ;;  %v762_v17 = vld [vmem:[%s1096_s1 + $0x58] sm:$0xff]  ;;  %v753_v20 = vld [vmem:[%s1096_s1 + $0x10] sm:$0xff] }
  0x12   :  { %475 = vmatpush.bf16.msra.mxu1 %v765_v3  ;;  %v771_v14 = vld [vmem:[%s1096_s1 + $0xa0] sm:$0xff]  ;;  %v770_v18 = vld [vmem:[%s1096_s1 + $0x98] sm:$0xff]  ;;  %v761_v21 = vld [vmem:[%s1096_s1 + $0x50] sm:$0xff] }
  0x13   :  { %488 = vmatpush.bf16.msra.mxu2 %v773_v6  ;;  %v779_v15 = vld [vmem:[%s1096_s1 + $0xe0] sm:$0xff]  ;;  %v778_v19 = vld [vmem:[%s1096_s1 + $0xd8] sm:$0xff]  ;;  %v769_v22 = vld [vmem:[%s1096_s1 + $0x90] sm:$0xff] }
  0x14   :  { %501 = vmatpush.bf16.msra.mxu3 %v781_v7  ;;  %v777_v23 = vld [vmem:[%s1096_s1 + $0xd0] sm:$0xff]  ;;  %v752_v24 = vld [vmem:[%s1096_s1 + $0x8] sm:$0xff]  ;;  %v751_v28 = vld [vmem:[%s1096_s1] sm:$0xff] }
  0x15   :  { %463 = vmatpush.bf16.msra.mxu0 %v756_v8  ;;  %v760_v25 = vld [vmem:[%s1096_s1 + $0x48] sm:$0xff]  ;;  %v759_v29 = vld [vmem:[%s1096_s1 + $0x40] sm:$0xff]  ;;  %v790_v32 = vld [vmem:[%s1096_s1 + $0x138] sm:$0xff] }
  0x16   :  { %476 = vmatpush.bf16.msra.mxu1 %v764_v9  ;;  %v768_v26 = vld [vmem:[%s1096_s1 + $0x88] sm:$0xff]  ;;  %v61_v30 = vld [vmem:[%s1095_s0] sm:$0xff]  ;;  %v798_v33 = vld [vmem:[%s1096_s1 + $0x178] sm:$0xff] }
  0x17   :  { %489 = vmatpush.bf16.msra.mxu2 %v772_v10  ;;  %v776_v27 = vld [vmem:[%s1096_s1 + $0xc8] sm:$0xff]  ;;  %v767_v34 = vld [vmem:[%s1096_s1 + $0x80] sm:$0xff]  ;;  %v67_v36 = vpack.c.bf16 %v61_v30, %v61_v30  ;;  %v63_v38 = vld [vmem:[%s1095_s0 + $0x10] sm:$0xff] }
  0x18   :  { %502 = vmatpush.bf16.msra.mxu3 %v780_v11  ;;  %v62_v31 = vld [vmem:[%s1095_s0 + $0x8] sm:$0xff]  ;;  %v775_v35 = vld [vmem:[%s1096_s1 + $0xc0] sm:$0xff]  ;;  %v64_v39 = vld [vmem:[%s1095_s0 + $0x18] sm:$0xff]  ;;  %v69_v42 = vpack.c.bf16 %v63_v38, %v63_v38 }
  0x19   :  { %464 = vmatpush.bf16.msra.mxu0 %v755_v12  ;;  %v68_v37 = vpack.c.bf16 %v62_v31, %v62_v31  ;;  %v789_v40 = vld [vmem:[%s1096_s1 + $0x130] sm:$0xff]  ;;  %v70_v43 = vpack.c.bf16 %v64_v39, %v64_v39  ;;  %v788_v44 = vld [vmem:[%s1096_s1 + $0x128] sm:$0xff]  ;;  %v787_v46 = vld [vmem:[%s1096_s1 + $0x120] sm:$0xff] }
  0x1a   :  { %477 = vmatpush.bf16.msra.mxu1 %v763_v13  ;;  %v797_v41 = vld [vmem:[%s1096_s1 + $0x170] sm:$0xff]  ;;  %v796_v45 = vld [vmem:[%s1096_s1 + $0x168] sm:$0xff]  ;;  %v795_v47 = vld [vmem:[%s1096_s1 + $0x160] sm:$0xff] }
  0x1b   :  { %490 = vmatpush.bf16.msra.mxu2 %v771_v14  ;;  %v786_v48 = vld [vmem:[%s1096_s1 + $0x118] sm:$0xff]  ;;  %v785_v50 = vld [vmem:[%s1096_s1 + $0x110] sm:$0xff]  ;;  %v784_v52 = vld [vmem:[%s1096_s1 + $0x108] sm:$0xff] }
  0x1c   :  { %503 = vmatpush.bf16.msra.mxu3 %v779_v15  ;;  %v794_v49 = vld [vmem:[%s1096_s1 + $0x158] sm:$0xff]  ;;  %v793_v51 = vld [vmem:[%s1096_s1 + $0x150] sm:$0xff]  ;;  %v792_v53 = vld [vmem:[%s1096_s1 + $0x148] sm:$0xff] }
  0x1d   :  { %465 = vmatpush.bf16.msra.mxu0 %v754_v16  ;;  %v783_v54 = vld [vmem:[%s1096_s1 + $0x100] sm:$0xff]  ;;  %v66_v57 = vld [vmem:[%s1095_s0 + $0x28] sm:$0xff] }
  0x1e   :  { %478 = vmatpush.bf16.msra.mxu1 %v762_v17  ;;  %v791_v55 = vld [vmem:[%s1096_s1 + $0x140] sm:$0xff]  ;;  %v72_v59 = vpack.c.bf16 %v66_v57, %v66_v57 }
  0x1f   :  { %491 = vmatpush.bf16.msra.mxu2 %v770_v18  ;;  %v65_v56 = vld [vmem:[%s1095_s0 + $0x20] sm:$0xff] }
  0x20   :  { %504 = vmatpush.bf16.msra.mxu3 %v778_v19  ;;  %v71_v58 = vpack.c.bf16 %v65_v56, %v65_v56  ;;  %v539_v62 = vld [vmem:[#allocation4] sm:$0x1]  ;;  %v540_v63 = vld [vmem:[#allocation6] sm:$0x1f]  ;;  %v802_v5 = vld [vmem:[#allocation2] ss:$0 sm:$0xff] }
  0x21   :  { %466 = vmatpush.bf16.msra.mxu0 %v753_v20  ;;  %v541_v0 = vadd.f32 %v540_v63, %v539_v62  ;;  %v544_v15 = vrot.slane %v540_v63, 1  ;;  %v549_v16 = vrot.slane %v540_v63, 5 }
  0x22   :  { %479 = vmatpush.bf16.msra.mxu1 %v761_v21 }
  0x23   :  { %492 = vmatpush.bf16.msra.mxu2 %v769_v22  ;;  %542 = vst [vmem:[%s1100_s5] sm:$0x1] %v541_v0 }
  0x24   :  { %505 = vmatpush.bf16.msra.mxu3 %v777_v23  ;;  %548 = vst [vmem:[%s1100_s5 + $0x5] sm:$0x1] %v541_v0 }
  0x25   :  { %467 = vmatpush.bf16.msra.mxu0 %v752_v24 }
  0x26   :  { %480 = vmatpush.bf16.msra.mxu1 %v760_v25 }
  0x27   :  { %493 = vmatpush.bf16.msra.mxu2 %v768_v26 }
  0x28   :  { %506 = vmatpush.bf16.msra.mxu3 %v776_v27 }
  0x29   :  { %468 = vmatpush.bf16.msra.mxu0 %v751_v28 }
  0x2a   :  { %481 = vmatpush.bf16.msra.mxu1 %v759_v29 }
  0x2b   :  { %494 = vmatpush.bf16.msra.mxu2 %v767_v34 }
  0x2c   :  { %507 = vmatpush.bf16.msra.mxu3 %v775_v35  ;;  %469 = vmatmul.bf16.vlgmr.msra.gmra.mxu0 %v67_v36 }
  0x2d   :  { %513 = vmatpush.bf16.msrb.mxu0 %v790_v32  ;;  %482 = vmatmul.bf16.vlgmr.msra.gmra.mxu1 %v68_v37 }
  0x2e   :  { %526 = vmatpush.bf16.msrb.mxu1 %v798_v33  ;;  %495 = vmatmul.bf16.vlgmr.msra.gmra.mxu2 %v69_v42 }
  0x2f   :  { %508 = vmatmul.bf16.vlgmr.msra.gmra.mxu3 %v70_v43 }
  0x31   :  { %514 = vmatpush.bf16.msrb.mxu0 %v789_v40 }
  0x32   :  { %527 = vmatpush.bf16.msrb.mxu1 %v797_v41 }
  0x35   :  { %515 = vmatpush.bf16.msrb.mxu0 %v788_v44 }
  0x36   :  { %528 = vmatpush.bf16.msrb.mxu1 %v796_v45 }
  0x39   :  { %516 = vmatpush.bf16.msrb.mxu0 %v787_v46 }
  0x3a   :  { %529 = vmatpush.bf16.msrb.mxu1 %v795_v47 }
  0x3d   :  { %517 = vmatpush.bf16.msrb.mxu0 %v786_v48 }
  0x3e   :  { %530 = vmatpush.bf16.msrb.mxu1 %v794_v49 }
  0x41   :  { %518 = vmatpush.bf16.msrb.mxu0 %v785_v50 }
  0x42   :  { %531 = vmatpush.bf16.msrb.mxu1 %v793_v51 }
  0x45   :  { %519 = vmatpush.bf16.msrb.mxu0 %v784_v52 }
  0x46   :  { %532 = vmatpush.bf16.msrb.mxu1 %v792_v53 }
  0x49   :  { %520 = vmatpush.bf16.msrb.mxu0 %v783_v54 }
  0x4a   :  { %533 = vmatpush.bf16.msrb.mxu1 %v791_v55 }
  0x4c   :  { %521 = vmatmul.bf16.vlgmr.msrb.gmra.mxu0 %v71_v58 }
  0x4d   :  { %534 = vmatmul.bf16.vlgmr.msrb.gmra.mxu1 %v72_v59 }
  0xa9   :  { %v470_v60 = vpop.f32.mrf.mxu0 }
  0xaa   :  { %v483_v61 = vpop.f32.mrf.mxu1  ;;  %v471_v6 = vadd.f32 %v802_v5, %v470_v60 }
  0xac   :  { %v484_v9 = vadd.f32 %v483_v61, %v471_v6 }
  0xb1   :  { %v472_v1 = vpop.f32.mrf.mxu0  ;;  %v496_v3 = vpop.f32.mrf.mxu2 }
  0xb2   :  { %v485_v2 = vpop.f32.mrf.mxu1  ;;  %v509_v4 = vpop.f32.mrf.mxu3  ;;  %v497_v10 = vadd.f32 %v496_v3, %v484_v9 }
  0xb4   :  { %v510_v11 = vadd.f32 %v509_v4, %v497_v10 }
  0xb9   :  { %v498_v7 = vpop.f32.mrf.mxu2 }
  0xba   :  { %v511_v8 = vpop.f32.mrf.mxu3 }
  0xc9   :  { %v522_v12 = vpop.f32.mrf.mxu0 }
  0xca   :  { %v535_v13 = vpop.f32.mrf.mxu1  ;;  %v523_v14 = vadd.f32 %v522_v12, %v510_v11 }
  0xcc   :  { %v536_v17 = vadd.f32 %v535_v13, %v523_v14 }
  0xce   :  { %v546_v18 = vadd.f32 %v544_v15, %v536_v17  ;;  %v551_v19 = vadd.f32 %v549_v16, %v536_v17 }
  0xd0   :  { %547 = vst [vmem:[%s1100_s5 + $0x1] sm:$0xf] %v546_v18 }
  0xd1   :  { %552 = vst [vmem:[%s1100_s5 + $0x2] sm:$0xf0] %v551_v19  ;;  %v524_v20 = vpop.f32.mrf.mxu0 }
  0xd2   :  { %v537_v21 = vpop.f32.mrf.mxu1 }
  0xd3   :  { %557 = vsyncpa [#allocation3], 1 }
  0xd4   :  { %558 = vsyncpa [#allocation5], 1 }

// kernel: vit_model_forward.7
= control target key start
LH: loop header
LB: loop body
LE: loop exit
PB: predicated region body
PF: predicated region fallthrough
CT: control target
= control target key end

     0   :  { %10 = vsyncpa [#allocation3], 0  ;;  %s448_s0 = inlined_call_operand.vmem [shape: f32[10,128], index: 0, kind: input, shape index: {}]   ;;  %s449_s1 = inlined_call_operand.vmem [shape: f32[1,128], index: 1, kind: input, shape index: {}]   ;;  %s450_s2 = inlined_call_operand.hbm [shape: f32[1,128], index: 2, kind: input, shape index: {}]   ;;  %s451_s3 = inlined_call_operand.hbm [shape: bf16[128,128], index: 3, kind: input, shape index: {}]   ;;  %s452_s4 = inlined_call_operand.hbm [shape: f32[1,128], index: 4, kind: input, shape index: {}]   ;;  %s453_s5 = inlined_call_operand.hbm [shape: f32[2,128], index: 5, kind: output, shape index: {}]  }
   0x1   :  { %11 = vsyncpa [#allocation6], 0  ;;  %s32_s20 = sshll.u32 %s451_s3, 4  ;;  %s33_s20 = int_to_ptr.hbm [resolvable:$true] %s32_s20 }
   0x2   :  { %12 = vsyncpa [#allocation4], 0  ;;  %s391_s21 = smov [#allocation5]   ;;  %s22_s25 = sshll.u32 %s450_s2, 4  ;;  %s23_s25 = int_to_ptr.hbm [resolvable:$true] %s22_s25 }
   0x3   :  { %s34_s22 = sshll.u32 %s391_s21, 4  ;;  %s392_s26 = smov 64   ;;  %s35_s22 = int_to_ptr.vmem [resolvable:$true] %s34_s22 }
   0x4   :  { %s393_s27 = smov 4   ;;  %s394_s28 = smov [#allocation2]  }
   0x5   :  { %40 = dma.hbm_to_vmem [thread:$0]  %s33_s20, 1024, %s35_s22, [#allocation6], %s392_s26, %s392_s26, %s393_s27  }
   0x6   :  { %s24_s29 = sshll.u32 %s394_s28, 4  ;;  %s46_s7 = sshll.u32 %s452_s4, 4  ;;  %s25_s29 = int_to_ptr.vmem [resolvable:$true] %s24_s29  ;;  %s47_s7 = int_to_ptr.hbm [resolvable:$true] %s46_s7 }
   0x7   :  { %27 = dma.hbm_to_vmem [thread:$0]  %s23_s25, 16, %s25_s29, [#allocation3]  }
   0x8   :  { %s395_s3 = smov [#allocation7]  }
   0x9   :  { %s48_s8 = sshll.u32 %s395_s3, 4  ;;  %s49_s8 = int_to_ptr.vmem [resolvable:$true] %s48_s8 }
   0xa   :  { %51 = dma.hbm_to_vmem [thread:$0]  %s47_s7, 16, %s49_s8, [#allocation6]  }
   0xb   :  { %385 = dma.done.wait [#allocation3], 16  }
   0xc   :  { %386 = vsyncadd [#allocation3], 4294967280 }
   0xd   :  { %387 = dma.done.wait [#allocation6], 1040  }
   0xe   :  { %388 = vsyncadd [#allocation6], 4294966256  ;;  %v64_v0 = vld [vmem:[%s448_s0] sm:$0xff]  ;;  %vm68_vm0 = vcmask 1040384   ;;  %vm72_vm1 = vcmask 1041408   ;;  %v396_v4 = vmov 128.0  }
   0xf   :  { %v66_v1 = vrot.slane %v64_v0, 4  ;;  %281 = vrcp.f32 %v396_v4  ;;  %v270_v5 = vld [vmem:[#allocation5 + $0x38] sm:$0xff]  ;;  %v269_v17 = vld [vmem:[#allocation5 + $0x30] sm:$0xff]  ;;  %v268_v18 = vld [vmem:[#allocation5 + $0x28] sm:$0xff]  ;;  %s219_s13 = sshll.u32 %s453_s5, 4  ;;  %s220_s13 = int_to_ptr.hbm [resolvable:$true] %s219_s13 }
  0x10   :  { %179 = vmatpush.bf16.msra.mxu0 %v270_v5  ;;  %v267_v19 = vld [vmem:[#allocation5 + $0x20] sm:$0xff]  ;;  %v266_v20 = vld [vmem:[#allocation5 + $0x18] sm:$0xff]  ;;  %v265_v21 = vld [vmem:[#allocation5 + $0x10] sm:$0xff] }
  0x11   :  { %v69_v2 = vsel %vm68_vm0, %v64_v0, %v66_v1  ;;  %v264_v22 = vld [vmem:[#allocation5 + $0x8] sm:$0xff]  ;;  %v263_v23 = vld [vmem:[#allocation5] sm:$0xff]  ;;  %v278_v33 = vld [vmem:[%s449_s1] ss:$0 sm:$0xff]  ;;  %s397_s1 = smov [#allocation8]  }
  0x12   :  { %v73_v3 = vsel %vm72_vm1, %v69_v2, 0.0  ;;  %v279_v36 = vld [vmem:[#allocation2] ss:$0 sm:$0xff]  ;;  %v280_v40 = vld [vmem:[#allocation7] ss:$0 sm:$0xff]  ;;  %s217_s10 = sshll.u32 %s397_s1, 4  ;;  %s218_s10 = int_to_ptr.vmem [resolvable:$true] %s217_s10 }
  0x13   :  { %74 = vadd.xlane.f32.xlu0 %v73_v3 }
  0x14   :  { %180 = vmatpush.bf16.msra.mxu0 %v269_v17 }
  0x15   :  { %v282_v6 = vpop.eup %281 }
  0x16   :  { %v77_v7 = vmul.f32 128.0, %v282_v6  ;;  %vm81_vm2 = vweird.f32 %v282_v6 }
  0x18   :  { %v78_v8 = vsub.f32 1.0, %v77_v7  ;;  %181 = vmatpush.bf16.msra.mxu0 %v268_v18 }
  0x1a   :  { %v79_v9 = vmul.f32 %v282_v6, %v78_v8 }
  0x1c   :  { %v80_v10 = vadd.f32 %v282_v6, %v79_v9  ;;  %182 = vmatpush.bf16.msra.mxu0 %v267_v19 }
  0x1e   :  { %v82_v11 = vsel %vm81_vm2, %v282_v6, %v80_v10 }
  0x20   :  { %183 = vmatpush.bf16.msra.mxu0 %v266_v20 }
  0x24   :  { %184 = vmatpush.bf16.msra.mxu0 %v265_v21 }
  0x28   :  { %185 = vmatpush.bf16.msra.mxu0 %v264_v22 }
  0x2c   :  { %186 = vmatpush.bf16.msra.mxu0 %v263_v23 }
  0x86   :  { %v75_v12 = vpop.xlane.xlu0 %74 }
  0x87   :  { %v83_v13 = vmul.f32 %v82_v11, %v75_v12 }
  0x89   :  { %v84_v14 = vsub.f32 %v69_v2, %v83_v13 }
  0x8b   :  { %v85_v15 = vmul.f32 %v84_v14, %v84_v14 }
  0x8d   :  { %v86_v16 = vsel %vm72_vm1, %v85_v15, 0.0 }
  0x8e   :  { %87 = vadd.xlane.f32.xlu0 %v86_v16 }
 0x101   :  { %v88_v24 = vpop.xlane.xlu0 %87 }
 0x102   :  { %v89_v25 = vmul.f32 %v88_v24, %v82_v11 }
 0x104   :  { %v90_v26 = vadd.f32 1e-06, %v89_v25 }
 0x106   :  { %283 = vrsqrt.f32 %v90_v26  ;;  %vm97_vm4 = vweird.f32 %v90_v26 }
 0x10c   :  { %v284_v27 = vpop.eup %283 }
 0x10d   :  { %v92_v28 = vmul.f32 %v284_v27, %v90_v26  ;;  %vm98_vm3 = vweird.f32 %v284_v27 }
 0x10e   :  { %vm99_vm5 = vmor %vm97_vm4, %vm98_vm3 }
 0x10f   :  { %v93_v29 = vmul.f32 %v284_v27, %v92_v28 }
 0x111   :  { %v94_v30 = vmul.f32 0.5, %v93_v29 }
 0x113   :  { %v95_v31 = vsub.f32 1.5, %v94_v30 }
 0x115   :  { %v96_v32 = vmul.f32 %v284_v27, %v95_v31 }
 0x117   :  { %v100_v34 = vsel %vm99_vm5, %v284_v27, %v96_v32 }
 0x118   :  { %v101_v35 = vmul.f32 %v100_v34, %v84_v14 }
 0x11a   :  { %v105_v37 = vmul.f32 %v278_v33, %v101_v35 }
 0x11c   :  { %v109_v38 = vadd.f32 %v279_v36, %v105_v37 }
 0x11e   :  { %v110_v39 = vpack.c.bf16 %v109_v38, %v109_v38 }
 0x120   :  { %187 = vmatmul.bf16.vlgmr.msra.gmra.mxu0 %v110_v39 }
 0x19d   :  { %v188_v41 = vpop.f32.mrf.mxu0 }
 0x19e   :  { %v189_v42 = vadd.f32 %v280_v40, %v188_v41 }
 0x1a0   :  { %v262_v43 = vmul.f32 -1.442695, %v189_v42 }
 0x1a2   :  { %285 = vpow2.f32 %v262_v43 }
 0x1a5   :  { %v190_v44 = vpop.f32.mrf.mxu0 }
 0x1a8   :  { %v286_v45 = vpop.eup %285 }
 0x1a9   :  { %v195_v46 = vadd.f32 1.0, %v286_v45 }
 0x1ab   :  { %287 = vrcp.f32 %v195_v46  ;;  %v207_v50 = vand.u32 2147483648, %v195_v46  ;;  %v205_v52 = vand.u32 2147483647, %v195_v46  ;;  %vm201_vm7 = vweird.f32 %v195_v46 }
 0x1ad   :  { %v208_v54 = vor.u32 1.1754944e-38, %v207_v50  ;;  %vm206_vm9 = vcmp.eq.f32.partialorder %v205_v52, 8.507059e+37 }
 0x1b1   :  { %v288_v47 = vpop.eup %287 }
 0x1b2   :  { %v197_v48 = vmul.f32 %v288_v47, %v195_v46  ;;  %vm202_vm6 = vweird.f32 %v288_v47 }
 0x1b3   :  { %vm203_vm8 = vmor %vm201_vm7, %vm202_vm6 }
 0x1b4   :  { %v198_v49 = vsub.f32 1.0, %v197_v48 }
 0x1b6   :  { %v199_v51 = vmul.f32 %v288_v47, %v198_v49 }
 0x1b8   :  { %v200_v53 = vadd.f32 %v288_v47, %v199_v51 }
 0x1ba   :  { %v204_v55 = vsel %vm203_vm8, %v288_v47, %v200_v53 }
 0x1bb   :  { %v209_v56 = vsel %vm206_vm9, %v208_v54, %v204_v55 }
 0x1bc   :  { %211 = vst [vmem:[#allocation8] sm:$0x3] %v209_v56 }
 0x1bd   :  { %222 = dma.vmem_to_hbm [thread:$0]  %s218_s10, 32, %s220_s13, [#allocation4]  }
 0x1be   :  { %389 = dma.done.wait [#allocation4], 32  }
 0x1bf   :  { %390 = vsyncadd [#allocation4], 4294967264 }
 0x1c0   :  { %227 = vsyncpa [#allocation3], 1 }
 0x1c1   :  { %228 = vsyncpa [#allocation6], 1 }
 0x1c2   :  { %229 = vsyncpa [#allocation4], 1 }

// kernel: vit_model_forward.5
= control target key start
LH: loop header
LB: loop body
LE: loop exit
PB: predicated region body
PF: predicated region fallthrough
CT: control target
= control target key end

     0   :  { %18 = vsyncpa [#allocation3], 0  ;;  %s3977_s0 = inlined_call_operand.vmem [shape: f32[10,128], index: 0, kind: input, shape index: {}, may-alias: {0,13}]   ;;  %s3978_s1 = inlined_call_operand.hbm [shape: f32[1,128], index: 1, kind: input, shape index: {}]   ;;  %s3979_s2 = inlined_call_operand.hbm [shape: f32[1,128], index: 2, kind: input, shape index: {}]   ;;  %s3980_s3 = inlined_call_operand.vmem [shape: bf16[128,384], index: 3, kind: input, shape index: {}]   ;;  %s3981_s4 = inlined_call_operand.hbm [shape: f32[1,384], index: 4, kind: input, shape index: {}]   ;;  %s3982_s5 = inlined_call_operand.hbm [shape: bf16[128,128], index: 5, kind: input, shape index: {}]   ;;  %s3983_s6 = inlined_call_operand.hbm [shape: f32[1,128], index: 6, kind: input, shape index: {}]   ;;  %s3984_s7 = inlined_call_operand.hbm [shape: f32[1,128], index: 7, kind: input, shape index: {}]   ;;  %s3985_s8 = inlined_call_operand.hbm [shape: f32[1,128], index: 8, kind: input, shape index: {}]   ;;  %s3986_s9 = inlined_call_operand.vmem [shape: bf16[128,512], index: 9, kind: input, shape index: {}]   ;;  %s3987_s10 = inlined_call_operand.hbm [shape: f32[1,512], index: 10, kind: input, shape index: {}]   ;;  %s3988_s11 = inlined_call_operand.vmem [shape: bf16[512,128], index: 11, kind: input, shape index: {}]   ;;  %s3989_s12 = inlined_call_operand.hbm [shape: f32[1,128], index: 12, kind: input, shape index: {}]   ;;  %s3990_s13 = inlined_call_operand.vmem [shape: f32[10,128], index: 13, kind: output, shape index: {}, may-alias: {0,13}]  }
   0x1   :  { %19 = vsyncpa [#allocation5], 0 }
   0x2   :  { %20 = vsyncpa [#allocation8], 0 }
   0x3   :  { %21 = vsyncpa [#allocation11], 0  ;;  %s41_s27 = sshll.u32 %s3979_s2, 4  ;;  %s42_s27 = int_to_ptr.hbm [resolvable:$true] %s41_s27 }
   0x4   :  { %22 = vsyncpa [#allocation14], 0  ;;  %s2880_s28 = smov [#allocation4]   ;;  %s64_s15 = sshll.u32 %s3982_s5, 4  ;;  %s65_s15 = int_to_ptr.hbm [resolvable:$true] %s64_s15 }
   0x5   :  { %s43_s29 = sshll.u32 %s2880_s28, 4  ;;  %s2881_s16 = smov [#allocation7]   ;;  %s44_s29 = int_to_ptr.vmem [resolvable:$true] %s43_s29 }
   0x6   :  { %46 = dma.hbm_to_vmem [thread:$0]  %s42_s27, 16, %s44_s29, [#allocation5]  }
   0x7   :  { %s66_s17 = sshll.u32 %s2881_s16, 4  ;;  %s2882_s18 = smov 64   ;;  %s67_s17 = int_to_ptr.vmem [resolvable:$true] %s66_s17 }
   0x8   :  { %s2883_s19 = smov 4   ;;  %s89_s21 = sshll.u32 %s3984_s7, 4  ;;  %s90_s21 = int_to_ptr.hbm [resolvable:$true] %s89_s21 }
   0x9   :  { %72 = dma.hbm_to_vmem [thread:$0]  %s65_s15, 1024, %s67_s17, [#allocation8], %s2882_s18, %s2882_s18, %s2883_s19  }
   0xa   :  { %s2884_s22 = smov [#allocation10]   ;;  %s113_s25 = sshll.u32 %s3987_s10, 4  ;;  %s114_s25 = int_to_ptr.hbm [resolvable:$true] %s113_s25 }
   0xb   :  { %s91_s23 = sshll.u32 %s2884_s22, 4  ;;  %s2885_s26 = smov [#allocation13]   ;;  %s92_s23 = int_to_ptr.vmem [resolvable:$true] %s91_s23 }
   0xc   :  { %94 = dma.hbm_to_vmem [thread:$0]  %s90_s21, 16, %s92_s23, [#allocation11]  }
   0xd   :  { %s115_s27 = sshll.u32 %s2885_s26, 4  ;;  %s30_s30 = sshll.u32 %s3978_s1, 4  ;;  %s116_s27 = int_to_ptr.vmem [resolvable:$true] %s115_s27  ;;  %s31_s30 = int_to_ptr.hbm [resolvable:$true] %s30_s30 }
   0xe   :  { %118 = dma.hbm_to_vmem [thread:$0]  %s114_s25, 64, %s116_s27, [#allocation14]  }
   0xf   :  { %s54_s15 = sshll.u32 %s3981_s4, 4  ;;  %s2886_s16 = smov [#allocation2]   ;;  %s55_s15 = int_to_ptr.hbm [resolvable:$true] %s54_s15 }
  0x10   :  { %s32_s17 = sshll.u32 %s2886_s16, 4  ;;  %s2887_s10 = smov [#allocation6]   ;;  %s33_s17 = int_to_ptr.vmem [resolvable:$true] %s32_s17 }
  0x11   :  { %35 = dma.hbm_to_vmem [thread:$0]  %s31_s30, 16, %s33_s17, [#allocation3]  }
  0x12   :  { %s56_s19 = sshll.u32 %s2887_s10, 4  ;;  %s78_s21 = sshll.u32 %s3983_s6, 4  ;;  %s57_s19 = int_to_ptr.vmem [resolvable:$true] %s56_s19  ;;  %s79_s21 = int_to_ptr.hbm [resolvable:$true] %s78_s21 }
  0x13   :  { %59 = dma.hbm_to_vmem [thread:$0]  %s55_s15, 48, %s57_s19, [#allocation5]  }
  0x14   :  { %s100_s23 = sshll.u32 %s3985_s8, 4  ;;  %s2888_s24 = smov [#allocation9]   ;;  %s101_s23 = int_to_ptr.hbm [resolvable:$true] %s100_s23 }
  0x15   :  { %s80_s4 = sshll.u32 %s2888_s24, 4  ;;  %s2889_s5 = smov [#allocation12]   ;;  %s81_s4 = int_to_ptr.vmem [resolvable:$true] %s80_s4 }
  0x16   :  { %83 = dma.hbm_to_vmem [thread:$0]  %s79_s21, 16, %s81_s4, [#allocation8]  }
  0x17   :  { %s102_s25 = sshll.u32 %s2889_s5, 4  ;;  %s126_s28 = sshll.u32 %s3989_s12, 4  ;;  %s103_s25 = int_to_ptr.vmem [resolvable:$true] %s102_s25  ;;  %s127_s28 = int_to_ptr.hbm [resolvable:$true] %s126_s28 }
  0x18   :  { %105 = dma.hbm_to_vmem [thread:$0]  %s101_s23, 16, %s103_s25, [#allocation11]  }
  0x19   :  { %s2890_s6 = smov [#allocation15]  }
  0x1a   :  { %s128_s29 = sshll.u32 %s2890_s6, 4  ;;  %s129_s29 = int_to_ptr.vmem [resolvable:$true] %s128_s29 }
  0x1b   :  { %131 = dma.hbm_to_vmem [thread:$0]  %s127_s28, 16, %s129_s29, [#allocation14]  }
  0x1c   :  { %2870 = dma.done.wait [#allocation3], 16  }
  0x1d   :  { %2871 = vsyncadd [#allocation3], 4294967280 }
  0x1e   :  { %2872 = dma.done.wait [#allocation5], 64  }
  0x1f   :  { %2873 = vsyncadd [#allocation5], 4294967232 }
  0x20   :  { %2874 = dma.done.wait [#allocation8], 1040  }
  0x21   :  { %2875 = vsyncadd [#allocation8], 4294966256 }
  0x22   :  { %2876 = dma.done.wait [#allocation11], 32  }
  0x23   :  { %2877 = vsyncadd [#allocation11], 4294967264 }
  0x24   :  { %2878 = dma.done.wait [#allocation14], 80  }
  0x25   :  { %2879 = vsyncadd [#allocation14], 4294967216  ;;  %vm175_vm0 = vcmask 1041408   ;;  %v2997_v0 = vld [vmem:[%s3977_s0 + $0x8] sm:$0x3]  ;;  %v3004_v2 = vld [vmem:[%s3977_s0] sm:$0xff] }
  0x26   :  { %v176_v1 = vsel %vm175_vm0, %v2997_v0, 0.0  ;;  %v2891_v3 = vmov 128.0   ;;  %v2142_v19 = vld [vmem:[%s3980_s3 + $0xa8] sm:$0xf]  ;;  %v2486_v20 = vld [vmem:[%s3980_s3 + $0xb0] sm:$0xf0] }
  0x27   :  { %177 = vadd.xlane.f32.xlu0 %v176_v1  ;;  %2596 = vrcp.f32 %v2891_v3  ;;  %v2485_v21 = vld [vmem:[%s3980_s3 + $0xac] sm:$0xf]  ;;  %v2143_v22 = vor.u32 %v2486_v20, %v2142_v19  ;;  %v2144_v23 = vld [vmem:[%s3980_s3 + $0xb4] sm:$0xf0]  ;;  %v2150_v24 = vld [vmem:[%s3980_s3 + $0xb0] sm:$0xf] }
  0x28   :  { %v2487_v25 = vld [vmem:[%s3980_s3 + $0xb8] sm:$0xf0]  ;;  %v2147_v26 = vor.u32 %v2485_v21, %v2144_v23  ;;  %v2130_v28 = vld [vmem:[%s3980_s3 + $0x90] sm:$0xf]  ;;  %v2482_v30 = vld [vmem:[%s3980_s3 + $0x94] sm:$0xf] }
  0x29   :  { %v2151_v27 = vor.u32 %v2487_v25, %v2150_v24  ;;  %402 = vmatpush.bf16.msra.mxu0 %v2143_v22  ;;  %v2483_v29 = vld [vmem:[%s3980_s3 + $0x98] sm:$0xf0]  ;;  %v2132_v32 = vld [vmem:[%s3980_s3 + $0x9c] sm:$0xf0]  ;;  %v2138_v33 = vld [vmem:[%s3980_s3 + $0x98] sm:$0xf] }
  0x2a   :  { %416 = vmatpush.bf16.msra.mxu1 %v2147_v26  ;;  %v2131_v31 = vor.u32 %v2483_v29, %v2130_v28  ;;  %v2484_v34 = vld [vmem:[%s3980_s3 + $0xa0] sm:$0xf0]  ;;  %v2135_v35 = vor.u32 %v2482_v30, %v2132_v32  ;;  %v2118_v37 = vld [vmem:[%s3980_s3 + $0x78] sm:$0xf]  ;;  %v2479_v39 = vld [vmem:[%s3980_s3 + $0x7c] sm:$0xf] }
  0x2b   :  { %430 = vmatpush.bf16.msra.mxu2 %v2151_v27  ;;  %v2139_v36 = vor.u32 %v2484_v34, %v2138_v33  ;;  %v2480_v38 = vld [vmem:[%s3980_s3 + $0x80] sm:$0xf0]  ;;  %v2120_v41 = vld [vmem:[%s3980_s3 + $0x84] sm:$0xf0]  ;;  %v2126_v42 = vld [vmem:[%s3980_s3 + $0x80] sm:$0xf] }
  0x2c   :  { %v2119_v40 = vor.u32 %v2480_v38, %v2118_v37  ;;  %v2481_v43 = vld [vmem:[%s3980_s3 + $0x88] sm:$0xf0]  ;;  %v2123_v44 = vor.u32 %v2479_v39, %v2120_v41  ;;  %v2106_v46 = vld [vmem:[%s3980_s3 + $0x60] sm:$0xf]  ;;  %v2476_v48 = vld [vmem:[%s3980_s3 + $0x64] sm:$0xf] }
  0x2d   :  { %v2597_v4 = vpop.eup %2596  ;;  %403 = vmatpush.bf16.msra.mxu0 %v2131_v31  ;;  %v2127_v45 = vor.u32 %v2481_v43, %v2126_v42  ;;  %v2477_v47 = vld [vmem:[%s3980_s3 + $0x68] sm:$0xf0]  ;;  %v2108_v50 = vld [vmem:[%s3980_s3 + $0x6c] sm:$0xf0]  ;;  %v2114_v51 = vld [vmem:[%s3980_s3 + $0x68] sm:$0xf] }
  0x2e   :  { %v180_v5 = vmul.f32 128.0, %v2597_v4  ;;  %vm184_vm1 = vweird.f32 %v2597_v4  ;;  %417 = vmatpush.bf16.msra.mxu1 %v2135_v35  ;;  %v2107_v49 = vor.u32 %v2477_v47, %v2106_v46  ;;  %v2478_v52 = vld [vmem:[%s3980_s3 + $0x70] sm:$0xf0]  ;;  %v2111_v53 = vor.u32 %v2476_v48, %v2108_v50  ;;  %v2094_v55 = vld [vmem:[%s3980_s3 + $0x48] sm:$0xf]  ;;  %s2894_s27 = smov 32  }
  0x2f   :  { %173 = vadd.xlane.f32.xlu0 %v3004_v2  ;;  %431 = vmatpush.bf16.msra.mxu2 %v2139_v36  ;;  %v2115_v54 = vor.u32 %v2478_v52, %v2114_v51  ;;  %v2474_v56 = vld [vmem:[%s3980_s3 + $0x50] sm:$0xf0]  ;;  %v2473_v57 = vld [vmem:[%s3980_s3 + $0x4c] sm:$0xf]  ;;  %v2096_v59 = vld [vmem:[%s3980_s3 + $0x54] sm:$0xf0] }
  0x30   :  { %v181_v6 = vsub.f32 1.0, %v180_v5  ;;  %v2095_v58 = vor.u32 %v2474_v56, %v2094_v55  ;;  %v2102_v60 = vld [vmem:[%s3980_s3 + $0x50] sm:$0xf]  ;;  %v2475_v61 = vld [vmem:[%s3980_s3 + $0x58] sm:$0xf0]  ;;  %v2099_v62 = vor.u32 %v2473_v57, %v2096_v59  ;;  %vm452_vm8 = vcmask 261120  }
  0x31   :  { %404 = vmatpush.bf16.msra.mxu0 %v2119_v40  ;;  %v2103_v63 = vor.u32 %v2475_v61, %v2102_v60  ;;  %v2082_v1 = vld [vmem:[%s3980_s3 + $0x30] sm:$0xf]  ;;  %v2471_v3 = vld [vmem:[%s3980_s3 + $0x38] sm:$0xf0]  ;;  %v2078_v19 = vld [vmem:[%s3980_s3 + $0x20] sm:$0xf] }
  0x32   :  { %v182_v7 = vmul.f32 %v2597_v4, %v181_v6  ;;  %418 = vmatpush.bf16.msra.mxu1 %v2123_v44  ;;  %v2083_v5 = vor.u32 %v2471_v3, %v2082_v1  ;;  %v2084_v6 = vld [vmem:[%s3980_s3 + $0x3c] sm:$0xf0]  ;;  %v2469_v20 = vld [vmem:[%s3980_s3 + $0x28] sm:$0xf0]  ;;  %v2464_v25 = vld [vmem:[%s3980_s3 + $0x4] sm:$0xf] }
  0x33   :  { %432 = vmatpush.bf16.msra.mxu2 %v2127_v45  ;;  %v2079_v22 = vor.u32 %v2469_v20, %v2078_v19  ;;  %v2058_v23 = vld [vmem:[%s3980_s3] sm:$0xf]  ;;  %v2465_v24 = vld [vmem:[%s3980_s3 + $0x8] sm:$0xf0]  ;;  %v2060_v28 = vld [vmem:[%s3980_s3 + $0xc] sm:$0xf0] }
  0x34   :  { %v183_v9 = vadd.f32 %v2597_v4, %v182_v7  ;;  %v2090_v7 = vld [vmem:[%s3980_s3 + $0x38] sm:$0xf]  ;;  %v2059_v27 = vor.u32 %v2465_v24, %v2058_v23  ;;  %v2066_v29 = vld [vmem:[%s3980_s3 + $0x8] sm:$0xf]  ;;  %v2466_v30 = vld [vmem:[%s3980_s3 + $0x10] sm:$0xf0]  ;;  %v2063_v32 = vor.u32 %v2464_v25, %v2060_v28 }
  0x35   :  { %405 = vmatpush.bf16.msra.mxu0 %v2107_v49  ;;  %v2067_v33 = vor.u32 %v2466_v30, %v2066_v29  ;;  %v2590_v51 = vld [vmem:[#allocation2] ss:$0 sm:$0xff]  ;;  %v2591_v56 = vld [vmem:[#allocation4] ss:$0 sm:$0xff]  ;;  %v266_v61 = vld [vmem:[#allocation6] sm:$0x7] }
  0x36   :  { %v3007_v10 = vsel %vm184_vm1, %v2597_v4, %v183_v9  ;;  %419 = vmatpush.bf16.msra.mxu1 %v2111_v53  ;;  %v2470_v4 = vld [vmem:[%s3980_s3 + $0x34] sm:$0xf]  ;;  %vm489_vm9 = vcmask 1042432   ;;  %vm472_vm10 = vcmask 36864   ;;  %vm485_vm11 = vcmask 39936  }
  0x37   :  { %433 = vmatpush.bf16.msra.mxu2 %v2115_v54  ;;  %v2087_v9 = vor.u32 %v2470_v4, %v2084_v6  ;;  %vm698_vm12 = vcmask 523264   ;;  %vm700_vm13 = vcmask 785408   ;;  %vm971_vm14 = vcmask 1044480  }
  0x39   :  { %406 = vmatpush.bf16.msra.mxu0 %v2095_v58 }
  0x3a   :  { %420 = vmatpush.bf16.msra.mxu1 %v2099_v62  ;;  %v268_v62 = vperm.slane %v266_v61, 0 }
  0x3b   :  { %434 = vmatpush.bf16.msra.mxu2 %v2103_v63  ;;  %v269_v63 = vperm.slane %v266_v61, 1 }
  0x3d   :  { %407 = vmatpush.bf16.msra.mxu0 %v2083_v5 }
  0x3e   :  { %421 = vmatpush.bf16.msra.mxu1 %v2087_v9 }
  0x9a   :  { %v178_v8 = vpop.xlane.xlu0 %177 }
  0x9b   :  { %v187_v13 = vmul.f32 %v3007_v10, %v178_v8  ;;  %v2472_v8 = vld [vmem:[%s3980_s3 + $0x40] sm:$0xf0] }
  0x9d   :  { %v3017_v16 = vsub.f32 %v2997_v0, %v187_v13  ;;  %v2468_v13 = vld [vmem:[%s3980_s3 + $0x20] sm:$0xf0] }
  0x9f   :  { %v191_v17 = vmul.f32 %v3017_v16, %v3017_v16 }
  0xa1   :  { %v194_v18 = vsel %vm175_vm0, %v191_v17, 0.0 }
  0xa2   :  { %v174_v11 = vpop.xlane.xlu0 %173 }
  0xa3   :  { %v186_v12 = vmul.f32 %v3007_v10, %v174_v11  ;;  %v2091_v11 = vor.u32 %v2472_v8, %v2090_v7 }
  0xa5   :  { %v3012_v14 = vsub.f32 %v3004_v2, %v186_v12  ;;  %435 = vmatpush.bf16.msra.mxu2 %v2091_v11  ;;  %v2070_v12 = vld [vmem:[%s3980_s3 + $0x18] sm:$0xf]  ;;  %v2892_v11 = vmov 65535  }
  0xa6   :  { %v2071_v17 = vor.u32 %v2468_v13, %v2070_v12  ;;  %v490_v12 = vsel %vm175_vm0, 4294967295, %v2892_v11 }
  0xa7   :  { %v190_v15 = vmul.f32 %v3012_v14, %v3012_v14 }
  0xa8   :  { %408 = vmatpush.bf16.msra.mxu0 %v2071_v17 }
  0xa9   :  { %192 = vadd.xlane.f32.xlu1 %v190_v15  ;;  %v2467_v15 = vld [vmem:[%s3980_s3 + $0x1c] sm:$0xf]  ;;  %436 = vmatpush.bf16.msra.mxu2 %v2079_v22 }
  0xac   :  { %409 = vmatpush.bf16.msra.mxu0 %v2059_v27 }
  0xad   :  { %437 = vmatpush.bf16.msra.mxu2 %v2067_v33 }
  0xb1   :  { %195 = vadd.xlane.f32.xlu1 %v194_v18  ;;  %v2072_v18 = vld [vmem:[%s3980_s3 + $0x24] sm:$0xf0]  ;;  %s2893_s3 = smov 96  }
  0xb2   :  { %v2075_v21 = vor.u32 %v2467_v15, %v2072_v18 }
  0xb4   :  { %422 = vmatpush.bf16.msra.mxu1 %v2075_v21  ;;  %v3174_v21 = vsel %vm489_vm9, %v490_v12, 0 }
  0xb8   :  { %423 = vmatpush.bf16.msra.mxu1 %v2063_v32 }
 0x11c   :  { %v193_v26 = vpop.xlane.xlu1 %192 }
 0x11d   :  { %v197_v31 = vmul.f32 %v193_v26, %v3007_v10 }
 0x11f   :  { %v199_v34 = vadd.f32 1e-06, %v197_v31 }
 0x121   :  { %2598 = vrsqrt.f32 %v199_v34  ;;  %vm207_vm3 = vweird.f32 %v199_v34 }
 0x124   :  { %v196_v35 = vpop.xlane.xlu1 %195 }
 0x125   :  { %v198_v36 = vmul.f32 %v196_v35, %v3007_v10 }
 0x127   :  { %v2599_v37 = vpop.eup %2598  ;;  %v200_v38 = vadd.f32 1e-06, %v198_v36 }
 0x128   :  { %v202_v39 = vmul.f32 %v2599_v37, %v199_v34  ;;  %vm208_vm2 = vweird.f32 %v2599_v37 }
 0x129   :  { %2600 = vrsqrt.f32 %v200_v38  ;;  %vm209_vm4 = vmor %vm207_vm3, %vm208_vm2  ;;  %vm217_vm6 = vweird.f32 %v200_v38 }
 0x12a   :  { %v203_v40 = vmul.f32 %v2599_v37, %v202_v39 }
 0x12c   :  { %v204_v41 = vmul.f32 0.5, %v203_v40 }
 0x12e   :  { %v205_v42 = vsub.f32 1.5, %v204_v41 }
 0x12f   :  { %v2601_v43 = vpop.eup %2600 }
 0x130   :  { %v206_v44 = vmul.f32 %v2599_v37, %v205_v42  ;;  %v212_v45 = vmul.f32 %v2601_v43, %v200_v38  ;;  %vm218_vm5 = vweird.f32 %v2601_v43 }
 0x131   :  { %vm219_vm7 = vmor %vm217_vm6, %vm218_vm5 }
 0x132   :  { %v213_v46 = vmul.f32 %v2601_v43, %v212_v45  ;;  %v210_v47 = vsel %vm209_vm4, %v2599_v37, %v206_v44 }
 0x133   :  { %v221_v50 = vmul.f32 %v210_v47, %v3012_v14 }
 0x134   :  { %v214_v48 = vmul.f32 0.5, %v213_v46 }
 0x135   :  { %v226_v55 = vmul.f32 %v2590_v51, %v221_v50 }
 0x136   :  { %v215_v49 = vsub.f32 1.5, %v214_v48 }
 0x137   :  { %v231_v58 = vadd.f32 %v2591_v56, %v226_v55 }
 0x138   :  { %v216_v52 = vmul.f32 %v2601_v43, %v215_v49 }
 0x13a   :  { %v220_v53 = vsel %vm219_vm7, %v2601_v43, %v216_v52 }
 0x13b   :  { %v222_v54 = vmul.f32 %v220_v53, %v3017_v16  ;;  %v270_v16 = vperm.slane %v266_v61, 2 }
 0x13d   :  { %v227_v57 = vmul.f32 %v2590_v51, %v222_v54 }
 0x13f   :  { %v232_v59 = vadd.f32 %v2591_v56, %v227_v57 }
 0x141   :  { %v233_v60 = vpack.c.bf16 %v232_v59, %v231_v58 }
 0x143   :  { %410 = vmatmul.bf16.vlgmr.msra.gmra.mxu0 %v233_v60  ;;  %424 = vmatmul.bf16.vlgmr.msra.gmra.mxu1 %v233_v60 }
 0x144   :  { %438 = vmatmul.bf16.vlgmr.msra.gmra.mxu2 %v233_v60 }
 0x1c0   :  { %v411_v14 = vpop.f32.mrf.mxu0  ;;  %v425_v1 = vpop.f32.mrf.mxu1 }
 0x1c1   :  { %v412_v3 = vadd.f32 %v411_v14, %v268_v62  ;;  %v426_v4 = vadd.f32 %v425_v1, %v269_v63 }
 0x1c3   :  { %v444_v5 = vmul.f32 0.17677669, %v412_v3  ;;  %v448_v6 = vpack.c.bf16 %v426_v4, %v426_v4 }
 0x1c5   :  { %v446_v7 = vpack.c.bf16 %v444_v5, %v444_v5  ;;  %v514_v8 = vunpack.c.l.b16 %v448_v6  ;;  %v457_v9 = vsel %vm452_vm8, %v448_v6, 0 }
 0x1c6   :  { %466 = vmatpush.bf16.xpose.msra.mxu3 %v457_v9 }
 0x1c7   :  { %v509_v13 = vunpack.c.l.b16 %v446_v7  ;;  %v439_v15 = vpop.f32.mrf.mxu2  ;;  %v3172_v17 = vpack.c.b16 %v514_v8, %v514_v8 }
 0x1c8   :  { %v440_v18 = vadd.f32 %v439_v15, %v270_v16  ;;  %v413_v19 = vpop.f32.mrf.mxu0  ;;  %v427_v20 = vpop.f32.mrf.mxu1 }
 0x1c9   :  { %v414_v22 = vadd.f32 %v413_v19, %v268_v62  ;;  %v428_v23 = vadd.f32 %v427_v20, %v269_v63  ;;  %516 = vrot.lane.b32.xlu0 %v3172_v17, %s2893_s3  ;;  %v3178_v24 = vpack.c.b16 %v509_v13, %v509_v13 }
 0x1ca   :  { %v450_v25 = vpack.c.bf16 %v440_v18, %v440_v18 }
 0x1cb   :  { %v445_v26 = vmul.f32 0.17677669, %v414_v22  ;;  %v449_v27 = vpack.c.bf16 %v428_v23, %v428_v23  ;;  %511 = vrot.lane.b32.xlu1 %v3178_v24, %s2893_s3 }
 0x1cc   :  { %v493_v28 = vand.u32 %v3174_v21, %v450_v25  ;;  %v3188_v41 = vunpack.c.l.b16 %v450_v25 }
 0x1cd   :  { %v447_v29 = vpack.c.bf16 %v445_v26, %v445_v26  ;;  %v714_v30 = vunpack.c.l.b16 %v449_v27  ;;  %2152 = vmatmul.msk.bf16.vlgmr.msra.gmra.mxu3 %vm452_vm8, %v446_v7 }
 0x1ce   :  { %502 = vmatpush.bf16.msrb.mxu3 %v493_v28 }
 0x1cf   :  { %v703_v31 = vunpack.c.l.b16 %v447_v29  ;;  %v715_v32 = vpack.c.b16 %v714_v30, %v514_v8  ;;  %v441_v33 = vpop.f32.mrf.mxu2 }
 0x1d0   :  { %v442_v34 = vadd.f32 %v441_v33, %v270_v16 }
 0x1d1   :  { %v704_v35 = vpack.c.b16 %v703_v31, %v509_v13  ;;  %v717_v36 = vshrl.u32 %v715_v32, 16  ;;  %v720_v37 = vshll.u32 %v715_v32, 16  ;;  %631 = vrot.lane.b32.xlu0 %v3172_v17, %s2894_s27 }
 0x1d2   :  { %v451_v38 = vpack.c.bf16 %v442_v34, %v442_v34 }
 0x1d3   :  { %v719_v39 = vrot.slane %v717_v36, 2  ;;  %v722_v40 = vrot.slane %v720_v37, 3  ;;  %629 = vrot.lane.b32.xlu1 %v3178_v24, %s2894_s27  ;;  %v706_v43 = vshrl.u32 %v704_v35, 16  ;;  %v709_v44 = vshll.u32 %v704_v35, 16 }
 0x1d4   :  { %v756_v42 = vunpack.c.l.b16 %v451_v38 }
 0x1d5   :  { %v723_v45 = vor.u32 %v722_v40, %v719_v39  ;;  %v708_v48 = vrot.slane %v706_v43, 2  ;;  %v711_v49 = vrot.slane %v709_v44, 3 }
 0x1d6   :  { %v3191_v46 = vpack.c.b16 %v756_v42, %v3188_v41  ;;  %v551_v42 = vpack.c.b16 %v3188_v41, %v3188_v41 }
 0x1d7   :  { %v728_v47 = vsel %vm452_vm8, %v723_v45, 0  ;;  %v712_v50 = vor.u32 %v711_v49, %v708_v48 }
 0x1d8   :  { %737 = vmatpush.bf16.xpose.msrb.mxu1 %v728_v47 }
 0x1d9   :  { %787 = vrot.lane.b32.xlu0 %v723_v45, %s2893_s3 }
 0x1db   :  { %843 = vrot.lane.b32.xlu1 %v723_v45, %s2882_s18 }
 0x1df   :  { %2160 = vmatmul.msk.bf16.vlgmr.msrb.gmra.mxu1 %vm452_vm8, %v712_v50 }
 0x1e1   :  { %899 = vrot.lane.b32.xlu0 %v723_v45, %s2894_s27 }
 0x1e3   :  { %897 = vrot.lane.b32.xlu1 %v712_v50, %s2894_s27 }
 0x23b   :  { %v517_v51 = vpop.permute.xlu0 %516 }
 0x23c   :  { %v522_v52 = vsel %vm452_vm8, %v517_v51, 0 }
 0x23d   :  { %v512_v53 = vpop.permute.xlu1 %511  ;;  %531 = vmatpush.bf16.xpose.msra.mxu3 %v522_v52  ;;  %v759_v52 = vshrl.u32 %v3191_v46, 16 }
 0x243   :  { %v632_v11 = vpop.permute.xlu0 %631 }
 0x244   :  { %v637_v13 = vsel %vm452_vm8, %v632_v11, 0 }
 0x245   :  { %v630_v54 = vpop.permute.xlu1 %629 }
 0x24b   :  { %v788_v18 = vpop.permute.xlu0 %787 }
 0x24c   :  { %v793_v19 = vsel %vm452_vm8, %v788_v18, 0 }
 0x24d   :  { %v844_v55 = vpop.permute.xlu1 %843 }
 0x24e   :  { %v849_v56 = vsel %vm452_vm8, %v844_v55, 0  ;;  %v761_v55 = vrot.slane %v759_v52, 2 }
 0x24f   :  { %858 = vmatpush.bf16.xpose.msra.mxu1 %v849_v56 }
 0x250   :  { %v468_v57 = vpop.f32.mrf.mxu3 }
 0x251   :  { %v473_v58 = vsel %vm472_vm10, %v468_v57, -inf }
 0x252   :  { %474 = vmax.xlane.f32.xlu2 %v473_v58 }
 0x253   :  { %v900_v20 = vpop.permute.xlu0 %899 }
 0x254   :  { %v905_v22 = vsel %vm452_vm8, %v900_v20, 0 }
 0x255   :  { %v898_v23 = vpop.permute.xlu1 %897 }
 0x258   :  { %v470_v59 = vpop.f32.mrf.mxu3 }
 0x25c   :  { %v3202_v60 = vpop.f32.mrf.mxu1 }
 0x25d   :  { %v743_v61 = vsel %vm472_vm10, %v3202_v60, -inf }
 0x25e   :  { %744 = vmax.xlane.f32.xlu0 %v743_v61 }
 0x264   :  { %v741_v62 = vpop.f32.mrf.mxu1 }
 0x26a   :  { %575 = vrot.lane.b32.xlu2 %v3172_v17, %s2882_s18 }
 0x2c5   :  { %v475_v63 = vpop.xlane.xlu2 %474 }
 0x2c6   :  { %v476_v14 = vsub.f32 %v468_v57, %v475_v63 }
 0x2c8   :  { %v477_v1 = vmul.f32 1.442695, %v476_v14 }
 0x2ca   :  { %2602 = vpow2.f32 %v477_v1 }
 0x2cd   :  { %v576_v3 = vpop.permute.xlu2 %575 }
 0x2ce   :  { %v581_v4 = vsel %vm452_vm8, %v576_v3, 0 }
 0x2cf   :  { %590 = vmatpush.bf16.xpose.msrb.mxu2 %v581_v4 }
 0x2d0   :  { %v2603_v5 = vpop.eup %2602 }
 0x2d1   :  { %v479_v6 = vsel %vm472_vm10, %v2603_v5, 0.0  ;;  %v745_v45 = vpop.xlane.xlu0 %744 }
 0x2d2   :  { %480 = vadd.xlane.f32.xlu2 %v479_v6  ;;  %v746_v47 = vsub.f32 %v3202_v60, %v745_v45 }
 0x2d4   :  { %v747_v48 = vmul.f32 1.442695, %v746_v47 }
 0x2ea   :  { %573 = vrot.lane.b32.xlu2 %v3178_v24, %s2882_s18 }
 0x2f2   :  { %785 = vrot.lane.b32.xlu2 %v712_v50, %s2893_s3 }
 0x2fa   :  { %841 = vrot.lane.b32.xlu2 %v712_v50, %s2882_s18 }
 0x345   :  { %v481_v16 = vpop.xlane.xlu2 %480 }
 0x346   :  { %2604 = vrcp.f32 %v481_v16 }
 0x347   :  { %2606 = vpow2.f32 %v747_v48 }
 0x34c   :  { %v2605_v7 = vpop.eup %2604 }
 0x34d   :  { %v483_v8 = vmul.f32 %v2605_v7, %v2603_v5  ;;  %v574_v9 = vpop.permute.xlu2 %573  ;;  %v3241_v49 = vpop.eup %2606 }
 0x34e   :  { %2156 = vmatmul.msk.bf16.vlgmr.msrb.gmra.mxu2 %vm452_vm8, %v574_v9  ;;  %v749_v50 = vsel %vm472_vm10, %v3241_v49, 0.0 }
 0x34f   :  { %v484_v12 = vpack.c.bf16 %v483_v8, %v483_v8 }
 0x351   :  { %2153 = vmatmul.msk.bf16.vlgmr.msrb.gmra.mxu3 %vm485_vm11, %v484_v12 }
 0x352   :  { %646 = vmatpush.bf16.xpose.msrb.mxu3 %v637_v13 }
 0x355   :  { %v786_v15 = vpop.permute.xlu2 %785 }
 0x35d   :  { %v842_v17 = vpop.permute.xlu2 %841 }
 0x35e   :  { %2164 = vmatmul.msk.bf16.vlgmr.msra.gmra.mxu1 %vm452_vm8, %v842_v17 }
 0x361   :  { %2154 = vmatmul.msk.bf16.vlgmr.msra.gmra.mxu3 %vm452_vm8, %v512_v53  ;;  %v762_v53 = vshll.u32 %v3191_v46, 16 }
 0x362   :  { %802 = vmatpush.bf16.xpose.msra.mxu3 %v793_v19 }
 0x363   :  { %v764_v56 = vrot.slane %v762_v53, 3 }
 0x365   :  { %v3247_v57 = vor.u32 %v764_v56, %v761_v55 }
 0x367   :  { %v770_v9 = vand.u32 %v3247_v57, %v3174_v21 }
 0x371   :  { %2158 = vmatmul.msk.bf16.vlgmr.msrb.gmra.mxu3 %vm452_vm8, %v630_v54 }
 0x372   :  { %914 = vmatpush.bf16.xpose.msrb.mxu3 %v905_v22 }
 0x381   :  { %2162 = vmatmul.msk.bf16.vlgmr.msra.gmra.mxu3 %vm452_vm8, %v786_v15 }
 0x391   :  { %2166 = vmatmul.msk.bf16.vlgmr.msrb.gmra.mxu3 %vm452_vm8, %v898_v23 }
 0x3d1   :  { %v592_v24 = vpop.f32.mrf.mxu2 }
 0x3d2   :  { %v596_v25 = vsel %vm472_vm10, %v592_v24, -inf }
 0x3d3   :  { %597 = vmax.xlane.f32.xlu2 %v596_v25 }
 0x3d4   :  { %v3225_v26 = vpop.f32.mrf.mxu3 }
 0x3d9   :  { %v594_v27 = vpop.f32.mrf.mxu2 }
 0x3db   :  { %v3227_v28 = vpop.f32.mrf.mxu1 }
 0x3dc   :  { %v506_v29 = vpop.f32.mrf.mxu3  ;;  %v864_v30 = vsel %vm472_vm10, %v3227_v28, -inf }
 0x3dd   :  { %865 = vmax.xlane.f32.xlu1 %v864_v30 }
 0x3e3   :  { %v862_v31 = vpop.f32.mrf.mxu1 }
 0x3e4   :  { %v533_v32 = vpop.f32.mrf.mxu3 }
 0x3e5   :  { %v537_v33 = vsel %vm472_vm10, %v533_v32, -inf }
 0x3e6   :  { %538 = vmax.xlane.f32.xlu0 %v537_v33 }
 0x3ec   :  { %v535_v34 = vpop.f32.mrf.mxu3 }
 0x3f4   :  { %v648_v35 = vpop.f32.mrf.mxu3 }
 0x3f5   :  { %v652_v36 = vsel %vm472_vm10, %v648_v35, -inf }
 0x3f6   :  { %653 = vmax.xlane.f32.xlu1 %v652_v36 }
 0x3fc   :  { %v650_v37 = vpop.f32.mrf.mxu3 }
 0x404   :  { %v804_v38 = vpop.f32.mrf.mxu3 }
 0x405   :  { %v808_v39 = vsel %vm472_vm10, %v804_v38, -inf }
 0x406   :  { %809 = vmax.xlane.f32.xlu2 %v808_v39 }
 0x40c   :  { %v806_v40 = vpop.f32.mrf.mxu3 }
 0x40f   :  { %552 = vrot.lane.b32.xlu1 %v551_v42, %s2893_s3 }
 0x414   :  { %v3237_v43 = vpop.f32.mrf.mxu3 }
 0x415   :  { %v920_v17 = vsel %vm472_vm10, %v3237_v43, -inf }
 0x41c   :  { %v918_v44 = vpop.f32.mrf.mxu3 }
 0x41e   :  { %608 = vrot.lane.b32.xlu2 %v551_v42, %s2882_s18 }
 0x439   :  { %750 = vadd.xlane.f32.xlu1 %v749_v50 }
 0x446   :  { %v598_v51 = vpop.xlane.xlu2 %597 }
 0x447   :  { %v599_v41 = vsub.f32 %v592_v24, %v598_v51 }
 0x449   :  { %v600_v54 = vmul.f32 1.442695, %v599_v41 }
 0x44b   :  { %2608 = vpow2.f32 %v600_v54 }
 0x450   :  { %v866_v14 = vpop.xlane.xlu1 %865 }
 0x451   :  { %v2609_v58 = vpop.eup %2608  ;;  %v867_v20 = vsub.f32 %v3227_v28, %v866_v14 }
 0x452   :  { %876 = vrot.lane.b32.xlu1 %v3247_v57, %s2882_s18  ;;  %v602_v59 = vsel %vm472_vm10, %v2609_v58, 0.0 }
 0x453   :  { %603 = vadd.xlane.f32.xlu0 %v602_v59  ;;  %v868_v24 = vmul.f32 1.442695, %v867_v20 }
 0x459   :  { %v539_v60 = vpop.xlane.xlu0 %538 }
 0x45a   :  { %v540_v61 = vsub.f32 %v533_v32, %v539_v60 }
 0x45c   :  { %v541_v62 = vmul.f32 1.442695, %v540_v61 }
 0x45e   :  { %2610 = vpow2.f32 %v541_v62 }
 0x464   :  { %v2611_v63 = vpop.eup %2610 }
 0x465   :  { %v543_v46 = vsel %vm472_vm10, %v2611_v63, 0.0 }
 0x466   :  { %544 = vadd.xlane.f32.xlu2 %v543_v46 }
 0x467   :  { %664 = vrot.lane.b32.xlu0 %v551_v42, %s2894_s27 }
 0x469   :  { %v654_v1 = vpop.xlane.xlu1 %653 }
 0x46a   :  { %v655_v13 = vsub.f32 %v648_v35, %v654_v1 }
 0x46c   :  { %v656_v15 = vmul.f32 1.442695, %v655_v13 }
 0x479   :  { %v810_v3 = vpop.xlane.xlu2 %809 }
 0x47a   :  { %v811_v4 = vsub.f32 %v804_v38, %v810_v3 }
 0x47c   :  { %v812_v5 = vmul.f32 1.442695, %v811_v4 }
 0x47e   :  { %2612 = vpow2.f32 %v812_v5 }
 0x47f   :  { %2614 = vpow2.f32 %v656_v15 }
 0x481   :  { %v553_v6 = vpop.permute.xlu1 %552  ;;  %v609_v16 = vpop.permute.xlu2 %608 }
 0x482   :  { %v558_v7 = vand.u32 %v553_v6, %v3174_v21  ;;  %v614_v8 = vand.u32 %v609_v16, %v3174_v21 }
 0x484   :  { %v3258_v11 = vpop.eup %2612  ;;  %567 = vmatpush.bf16.msrb.mxu0 %v558_v7  ;;  %623 = vmatpush.bf16.msra.mxu2 %v614_v8 }
 0x485   :  { %v814_v12 = vsel %vm472_vm10, %v3258_v11, 0.0  ;;  %v2615_v18 = vpop.eup %2614 }
 0x486   :  { %815 = vadd.xlane.f32.xlu2 %v814_v12  ;;  %v658_v19 = vsel %vm472_vm10, %v2615_v18, 0.0 }
 0x488   :  { %779 = vmatpush.bf16.msrb.mxu2 %v770_v9 }
 0x491   :  { %921 = vmax.xlane.f32.xlu0 %v920_v17 }
 0x499   :  { %659 = vadd.xlane.f32.xlu0 %v658_v19 }
 0x4ac   :  { %v751_v22 = vpop.xlane.xlu1 %750 }
 0x4ad   :  { %820 = vrot.lane.b32.xlu0 %v3247_v57, %s2893_s3 }
 0x4c4   :  { %v877_v27 = vpop.permute.xlu1 %876 }
 0x4c5   :  { %v882_v31 = vand.u32 %v877_v27, %v3174_v21  ;;  %v2492_v27 = vld [vmem:[#allocation7 + $0x20] sm:$0xff] }
 0x4c6   :  { %v604_v23 = vpop.xlane.xlu0 %603 }
 0x4c7   :  { %2616 = vrcp.f32 %v604_v23  ;;  %v2495_v23 = vld [vmem:[#allocation7 + $0x38] sm:$0xff] }
 0x4c8   :  { %2618 = vpow2.f32 %v868_v24  ;;  %1042 = vmatpush.bf16.msrb.mxu1 %v2495_v23  ;;  %v2494_v24 = vld [vmem:[#allocation7 + $0x30] sm:$0xff] }
 0x4c9   :  { %2620 = vrcp.f32 %v751_v22 }
 0x4cc   :  { %1043 = vmatpush.bf16.msrb.mxu1 %v2494_v24  ;;  %v2521_v24 = vld [vmem:[%s3986_s9 + $0xcc] sm:$0xf] }
 0x4cd   :  { %v2617_v25 = vpop.eup %2616 }
 0x4ce   :  { %v606_v29 = vmul.f32 %v2617_v25, %v2609_v58  ;;  %v2619_v32 = vpop.eup %2618  ;;  %v2493_v25 = vld [vmem:[#allocation7 + $0x28] sm:$0xff] }
 0x4cf   :  { %v870_v33 = vsel %vm472_vm10, %v2619_v32, 0.0  ;;  %v2621_v28 = vpop.eup %2620 }
 0x4d0   :  { %v607_v30 = vpack.c.bf16 %v606_v29, %v606_v29  ;;  %v753_v37 = vmul.f32 %v2621_v28, %v3241_v49  ;;  %1044 = vmatpush.bf16.msrb.mxu1 %v2493_v25  ;;  %v2491_v29 = vld [vmem:[#allocation7 + $0x18] sm:$0xff]  ;;  %v2308_v25 = vld [vmem:[%s3986_s9 + $0xd8] sm:$0xf0] }
 0x4d2   :  { %2157 = vmatmul.msk.bf16.vlgmr.msra.gmra.mxu2 %vm485_vm11, %v607_v30  ;;  %v754_v39 = vpack.c.bf16 %v753_v37, %v753_v37  ;;  %v2490_v30 = vld [vmem:[#allocation7 + $0x10] sm:$0xff] }
 0x4d3   :  { %891 = vmatpush.bf16.msra.mxu2 %v882_v31  ;;  %v2489_v31 = vld [vmem:[#allocation7 + $0x8] sm:$0xff] }
 0x4d4   :  { %1045 = vmatpush.bf16.msrb.mxu1 %v2492_v27  ;;  %v2311_v27 = vor.u32 %v2521_v24, %v2308_v25  ;;  %v2503_v24 = vld [vmem:[%s3986_s9 + $0x34] sm:$0xf0] }
 0x4d7   :  { %871 = vadd.xlane.f32.xlu0 %v870_v33 }
 0x4d8   :  { %1046 = vmatpush.bf16.msrb.mxu1 %v2491_v29  ;;  %v2282_v29 = vld [vmem:[%s3986_s9 + $0xa0] sm:$0xf] }
 0x4d9   :  { %v665_v34 = vpop.permute.xlu0 %664  ;;  %v545_v35 = vpop.xlane.xlu2 %544 }
 0x4da   :  { %v670_v36 = vand.u32 %v665_v34, %v3174_v21  ;;  %2622 = vrcp.f32 %v545_v35 }
 0x4dc   :  { %679 = vmatpush.bf16.msra.mxu0 %v670_v36  ;;  %1047 = vmatpush.bf16.msrb.mxu1 %v2490_v30  ;;  %v2518_v30 = vld [vmem:[%s3986_s9 + $0xac] sm:$0xf0] }
 0x4e0   :  { %v2623_v38 = vpop.eup %2622  ;;  %1048 = vmatpush.bf16.msrb.mxu1 %v2489_v31  ;;  %v2516_v31 = vld [vmem:[%s3986_s9 + $0xa4] sm:$0xf] }
 0x4e1   :  { %v547_v40 = vmul.f32 %v2623_v38, %v2611_v63 }
 0x4e2   :  { %2161 = vmatmul.msk.bf16.vlgmr.msrb.gmra.mxu2 %vm485_vm11, %v754_v39 }
 0x4e3   :  { %v548_v42 = vpack.c.bf16 %v547_v40, %v547_v40 }
 0x4e5   :  { %2155 = vmatmul.msk.bf16.vlgmr.msrb.gmra.mxu0 %vm485_vm11, %v548_v42 }
 0x4f9   :  { %v816_v52 = vpop.xlane.xlu2 %815 }
 0x504   :  { %v922_v44 = vpop.xlane.xlu0 %921 }
 0x505   :  { %v923_v45 = vsub.f32 %v3237_v43, %v922_v44 }
 0x507   :  { %v924_v47 = vmul.f32 1.442695, %v923_v45 }
 0x509   :  { %2624 = vpow2.f32 %v924_v47 }
 0x50c   :  { %v660_v48 = vpop.xlane.xlu0 %659 }
 0x50d   :  { %2626 = vrcp.f32 %v660_v48 }
 0x50e   :  { %2628 = vrcp.f32 %v816_v52  ;;  %v2592_v52 = vld [vmem:[#allocation9] ss:$0 sm:$0xff] }
 0x50f   :  { %v2625_v50 = vpop.eup %2624 }
 0x510   :  { %v926_v51 = vsel %vm472_vm10, %v2625_v50, 0.0 }
 0x511   :  { %927 = vadd.xlane.f32.xlu2 %v926_v51 }
 0x513   :  { %v2627_v49 = vpop.eup %2626 }
 0x514   :  { %v662_v41 = vmul.f32 %v2627_v49, %v2615_v18  ;;  %v2629_v54 = vpop.eup %2628 }
 0x515   :  { %v818_v43 = vmul.f32 %v2629_v54, %v3258_v11 }
 0x516   :  { %v663_v53 = vpack.c.bf16 %v662_v41, %v662_v41 }
 0x517   :  { %v819_v58 = vpack.c.bf16 %v818_v43, %v818_v43 }
 0x518   :  { %2159 = vmatmul.msk.bf16.vlgmr.msra.gmra.mxu0 %vm485_vm11, %v663_v53 }
 0x51f   :  { %v821_v55 = vpop.permute.xlu0 %820 }
 0x520   :  { %v826_v56 = vand.u32 %v821_v55, %v3174_v21 }
 0x522   :  { %835 = vmatpush.bf16.msrb.mxu0 %v826_v56 }
 0x528   :  { %2163 = vmatmul.msk.bf16.vlgmr.msrb.gmra.mxu0 %vm485_vm11, %v819_v58 }
 0x529   :  { %932 = vrot.lane.b32.xlu2 %v3247_v57, %s2894_s27 }
 0x54a   :  { %v872_v59 = vpop.xlane.xlu0 %871 }
 0x54b   :  { %2630 = vrcp.f32 %v872_v59 }
 0x551   :  { %v2631_v60 = vpop.eup %2630 }
 0x552   :  { %v874_v61 = vmul.f32 %v2631_v60, %v2619_v32  ;;  %v2488_v32 = vld [vmem:[#allocation7] sm:$0xff] }
 0x553   :  { %1049 = vmatpush.bf16.msrb.mxu1 %v2488_v32  ;;  %v2283_v32 = vor.u32 %v2518_v30, %v2282_v29  ;;  %v2501_v29 = vld [vmem:[%s3986_s9 + $0x2c] sm:$0xf]  ;;  %v2228_v30 = vld [vmem:[%s3986_s9 + $0x38] sm:$0xf0] }
 0x554   :  { %v875_v62 = vpack.c.bf16 %v874_v61, %v874_v61 }
 0x555   :  { %v625_v63 = vpop.f32.mrf.mxu2 }
 0x556   :  { %2165 = vmatmul.msk.bf16.vlgmr.msra.gmra.mxu2 %vm485_vm11, %v875_v62 }
 0x55d   :  { %v627_v46 = vpop.f32.mrf.mxu2 }
 0x562   :  { %v569_v14 = vpop.f32.mrf.mxu0 }
 0x565   :  { %v781_v1 = vpop.f32.mrf.mxu2 }
 0x56a   :  { %v571_v3 = vpop.f32.mrf.mxu0 }
 0x56b   :  { %v2526_v3 = vld [vmem:[%s3986_s9 + $0xec] sm:$0xf0] }
 0x56d   :  { %v783_v4 = vpop.f32.mrf.mxu2 }
 0x56e   :  { %v2524_v4 = vld [vmem:[%s3986_s9 + $0xe4] sm:$0xf] }
 0x584   :  { %v928_v5 = vpop.xlane.xlu2 %927 }
 0x585   :  { %2632 = vrcp.f32 %v928_v5 }
 0x58b   :  { %v2633_v6 = vpop.eup %2632 }
 0x58c   :  { %v930_v16 = vmul.f32 %v2633_v6, %v2625_v50  ;;  %v933_v7 = vpop.permute.xlu2 %932  ;;  %v2316_v6 = vld [vmem:[%s3986_s9 + $0xf0] sm:$0xf0] }
 0x58d   :  { %v938_v57 = vand.u32 %v933_v7, %v3174_v21  ;;  %v2527_v7 = vld [vmem:[%s3986_s9 + $0xf4] sm:$0xf0] }
 0x58e   :  { %v931_v8 = vpack.c.bf16 %v930_v16, %v930_v16  ;;  %v2322_v16 = vld [vmem:[%s3986_s9 + $0xe8] sm:$0xf] }
 0x58f   :  { %947 = vmatpush.bf16.msra.mxu0 %v938_v57  ;;  %v2319_v57 = vor.u32 %v2524_v4, %v2316_v6  ;;  %v2506_v4 = vld [vmem:[%s3986_s9 + $0x4c] sm:$0xf0] }
 0x591   :  { %1329 = vmatpush.bf16.msra.mxu3 %v2319_v57  ;;  %v2507_v57 = vld [vmem:[%s3986_s9 + $0x54] sm:$0xf0] }
 0x592   :  { %2167 = vmatmul.msk.bf16.vlgmr.msra.gmra.mxu0 %vm485_vm11, %v931_v8  ;;  %v2323_v8 = vor.u32 %v2527_v7, %v2322_v16  ;;  %v2236_v16 = vld [vmem:[%s3986_s9 + $0x50] sm:$0xf0]  ;;  %v2242_v7 = vld [vmem:[%s3986_s9 + $0x48] sm:$0xf] }
 0x594   :  { %1343 = vmatpush.bf16.msrb.mxu0 %v2323_v8 }
 0x595   :  { %v681_v9 = vpop.f32.mrf.mxu0 }
 0x59d   :  { %v683_v11 = vpop.f32.mrf.mxu0 }
 0x59e   :  { %v2324_v11 = vld [vmem:[%s3986_s9 + $0xf8] sm:$0xf0] }
 0x5a5   :  { %v837_v12 = vpop.f32.mrf.mxu0 }
 0x5a6   :  { %v2575_v13 = vpack.i.bf16 %v569_v14, %v837_v12 }
 0x5a8   :  { %2576 = vrot.lane.b32.xlu0 %v2575_v13, %s2894_s27  ;;  %v2298_v13 = vld [vmem:[%s3986_s9 + $0xc0] sm:$0xf] }
 0x5ad   :  { %v839_v15 = vpop.f32.mrf.mxu0 }
 0x5ae   :  { %v2522_v15 = vld [vmem:[%s3986_s9 + $0xcc] sm:$0xf0] }
 0x5d9   :  { %v893_v17 = vpop.f32.mrf.mxu2 }
 0x5da   :  { %v2580_v18 = vpack.i.bf16 %v625_v63, %v893_v17  ;;  %v2520_v17 = vld [vmem:[%s3986_s9 + $0xc4] sm:$0xf] }
 0x5dc   :  { %2581 = vrot.lane.b32.xlu1 %v2580_v18, %s2882_s18  ;;  %v2299_v18 = vor.u32 %v2522_v15, %v2298_v13 }
 0x5e1   :  { %v895_v19 = vpop.f32.mrf.mxu2 }
 0x5e2   :  { %v2300_v19 = vld [vmem:[%s3986_s9 + $0xd0] sm:$0xf0] }
 0x60f   :  { %v949_v20 = vpop.f32.mrf.mxu0 }
 0x610   :  { %v2585_v22 = vpack.i.bf16 %v681_v9, %v949_v20  ;;  %v2525_v9 = vld [vmem:[%s3986_s9 + $0xec] sm:$0xf]  ;;  %v2306_v20 = vld [vmem:[%s3986_s9 + $0xc8] sm:$0xf] }
 0x611   :  { %v2327_v12 = vor.u32 %v2525_v9, %v2324_v11  ;;  %v2243_v9 = vor.u32 %v2507_v57, %v2242_v7  ;;  %v2505_v11 = vld [vmem:[%s3986_s9 + $0x4c] sm:$0xf] }
 0x612   :  { %2586 = vrot.lane.b32.xlu1 %v2585_v22, %s2893_s3  ;;  %v2523_v22 = vld [vmem:[%s3986_s9 + $0xd4] sm:$0xf0]  ;;  %v3510_v7 = vld [vmem:[#allocation13] sm:$0xf] }
 0x613   :  { %1357 = vmatpush.bf16.msra.mxu1 %v2327_v12  ;;  %v2307_v23 = vor.u32 %v2523_v22, %v2306_v20  ;;  %v2244_v12 = vld [vmem:[%s3986_s9 + $0x58] sm:$0xf0]  ;;  %v1150_v57 = vperm.slane %v3510_v7, 3 }
 0x614   :  { %v2247_v13 = vor.u32 %v2505_v11, %v2244_v12  ;;  %v1147_v12 = vperm.slane %v3510_v7, 0 }
 0x615   :  { %1344 = vmatpush.bf16.msrb.mxu0 %v2307_v23  ;;  %v2226_v23 = vld [vmem:[%s3986_s9 + $0x28] sm:$0xf] }
 0x617   :  { %v951_v21 = vpop.f32.mrf.mxu0  ;;  %1358 = vmatpush.bf16.msra.mxu1 %v2311_v27  ;;  %v2227_v27 = vor.u32 %v2503_v24, %v2226_v23 }
 0x618   :  { %v2303_v21 = vor.u32 %v2520_v17, %v2300_v19  ;;  %v2218_v17 = vld [vmem:[%s3986_s9 + $0x20] sm:$0xf]  ;;  %v2500_v19 = vld [vmem:[%s3986_s9 + $0x24] sm:$0xf] }
 0x61a   :  { %v2577_v28 = vpop.permute.xlu0 %2576  ;;  %1330 = vmatpush.bf16.msra.mxu3 %v2303_v21  ;;  %v2220_v21 = vld [vmem:[%s3986_s9 + $0x30] sm:$0xf0] }
 0x61b   :  { %v2578_v34 = vunpack.i.l.bf16 %v2577_v28  ;;  %v2579_v36 = vunpack.i.h.bf16 %v2577_v28  ;;  %v2290_v28 = vld [vmem:[%s3986_s9 + $0xa8] sm:$0xf]  ;;  %v2223_v25 = vor.u32 %v2500_v19, %v2220_v21 }
 0x61d   :  { %v965_v39 = vsel %vm452_vm8, %v781_v1, %v2578_v34  ;;  %v697_v45 = vsel %vm452_vm8, %v3225_v26, %v2579_v36  ;;  %v2314_v1 = vld [vmem:[%s3986_s9 + $0xe0] sm:$0xf]  ;;  %v2519_v34 = vld [vmem:[%s3986_s9 + $0xb4] sm:$0xf0] }
 0x61e   :  { %v2315_v5 = vor.u32 %v2526_v3, %v2314_v1  ;;  %v2291_v36 = vor.u32 %v2519_v34, %v2290_v28  ;;  %v2234_v3 = vld [vmem:[%s3986_s9 + $0x40] sm:$0xf]  ;;  %v2498_v28 = vld [vmem:[%s3986_s9 + $0xc] sm:$0xf0]  ;;  %v2496_v34 = vld [vmem:[%s3986_s9 + $0x4] sm:$0xf] }
 0x61f   :  { %v2235_v6 = vor.u32 %v2506_v4, %v2234_v3  ;;  %v2594_v3 = vld [vmem:[#allocation12] ss:$0 sm:$0xff] }
 0x620   :  { %1315 = vmatpush.bf16.msrb.mxu2 %v2315_v5  ;;  %1345 = vmatpush.bf16.msrb.mxu0 %v2291_v36  ;;  %v2504_v5 = vld [vmem:[%s3986_s9 + $0x44] sm:$0xf]  ;;  %v2204_v36 = vld [vmem:[%s3986_s9 + $0x10] sm:$0xf0] }
 0x621   :  { %v2239_v8 = vor.u32 %v2504_v5, %v2236_v16 }
 0x624   :  { %1316 = vmatpush.bf16.msrb.mxu2 %v2299_v18  ;;  %v2502_v18 = vld [vmem:[%s3986_s9 + $0x2c] sm:$0xf0] }
 0x625   :  { %v2219_v22 = vor.u32 %v2502_v18, %v2218_v17  ;;  %v1148_v17 = vperm.slane %v3510_v7, 1 }
 0x628   :  { %1317 = vmatpush.bf16.msrb.mxu2 %v2283_v32 }
 0x64e   :  { %v2582_v33 = vpop.permute.xlu1 %2581 }
 0x64f   :  { %v2583_v35 = vunpack.i.l.bf16 %v2582_v33  ;;  %v2584_v37 = vunpack.i.h.bf16 %v2582_v33  ;;  %v2284_v33 = vld [vmem:[%s3986_s9 + $0xb0] sm:$0xf0] }
 0x651   :  { %v966_v44 = vsel %vm698_vm12, %v965_v39, %v2583_v35  ;;  %v699_v48 = vsel %vm698_vm12, %v697_v45, %v2584_v37  ;;  %v2287_v35 = vor.u32 %v2516_v31, %v2284_v33  ;;  %v2517_v37 = vld [vmem:[%s3986_s9 + $0xac] sm:$0xf]  ;;  %v2202_v31 = vld [vmem:[%s3986_s9] sm:$0xf]  ;;  %v2231_v33 = vor.u32 %v2501_v29, %v2228_v30 }
 0x653   :  { %1331 = vmatpush.bf16.msra.mxu3 %v2287_v35  ;;  %v2203_v35 = vor.u32 %v2498_v28, %v2202_v31 }
 0x684   :  { %v2587_v38 = vpop.permute.xlu1 %2586 }
 0x685   :  { %v2589_v40 = vunpack.i.h.bf16 %v2587_v38  ;;  %v2588_v42 = vunpack.i.l.bf16 %v2587_v38  ;;  %v2292_v38 = vld [vmem:[%s3986_s9 + $0xb8] sm:$0xf0] }
 0x686   :  { %v2295_v39 = vor.u32 %v2517_v37, %v2292_v38  ;;  %v2210_v37 = vld [vmem:[%s3986_s9 + $0x8] sm:$0xf]  ;;  %v2499_v38 = vld [vmem:[%s3986_s9 + $0x14] sm:$0xf0] }
 0x687   :  { %v967_v47 = vsel %vm700_vm13, %v966_v44, %v2588_v42  ;;  %v701_v51 = vsel %vm700_vm13, %v699_v48, %v2589_v40  ;;  %v2266_v40 = vld [vmem:[%s3986_s9 + $0x80] sm:$0xf]  ;;  %v2514_v42 = vld [vmem:[%s3986_s9 + $0x8c] sm:$0xf0]  ;;  %v2512_v44 = vld [vmem:[%s3986_s9 + $0x84] sm:$0xf] }
 0x688   :  { %v969_v50 = vrot.slane %v967_v47, 3  ;;  %1359 = vmatpush.bf16.msra.mxu1 %v2295_v39  ;;  %v2267_v45 = vor.u32 %v2514_v42, %v2266_v40  ;;  %v2268_v47 = vld [vmem:[%s3986_s9 + $0x90] sm:$0xf0]  ;;  %v2274_v48 = vld [vmem:[%s3986_s9 + $0x88] sm:$0xf]  ;;  %v2207_v39 = vor.u32 %v2496_v34, %v2204_v36  ;;  %v2211_v40 = vor.u32 %v2499_v38, %v2210_v37 }
 0x689   :  { %v2497_v42 = vld [vmem:[%s3986_s9 + $0xc] sm:$0xf] }
 0x68a   :  { %v972_v49 = vsel %vm971_vm14, %v701_v51, %v969_v50  ;;  %v2271_v51 = vor.u32 %v2512_v44, %v2268_v47  ;;  %1318 = vmatpush.bf16.msrb.mxu2 %v2267_v45  ;;  %v2212_v44 = vld [vmem:[%s3986_s9 + $0x18] sm:$0xf0] }
 0x68b   :  { %v973_v41 = vpack.c.bf16 %v969_v50, %v972_v49  ;;  %v2515_v50 = vld [vmem:[%s3986_s9 + $0x94] sm:$0xf0]  ;;  %v2215_v45 = vor.u32 %v2497_v42, %v2212_v44 }
 0x68c   :  { %v2275_v49 = vor.u32 %v2515_v50, %v2274_v48  ;;  %1332 = vmatpush.bf16.msra.mxu3 %v2271_v51 }
 0x68d   :  { %1050 = vmatmul.bf16.vlgmr.msrb.gmra.mxu1 %v973_v41  ;;  %v2513_v41 = vld [vmem:[%s3986_s9 + $0x8c] sm:$0xf] }
 0x68e   :  { %1346 = vmatpush.bf16.msrb.mxu0 %v2275_v49 }
 0x70a   :  { %v1051_v53 = vpop.f32.mrf.mxu1 }
 0x70b   :  { %v1052_v54 = vadd.f32 %v2592_v52, %v1051_v53 }
 0x70d   :  { %v3293_v55 = vadd.f32 %v1052_v54, %v3004_v2  ;;  %v2250_v54 = vld [vmem:[%s3986_s9 + $0x60] sm:$0xf] }
 0x70f   :  { %1060 = vadd.xlane.f32.xlu1 %v3293_v55 }
 0x712   :  { %v1053_v56 = vpop.f32.mrf.mxu1 }
 0x713   :  { %v1054_v43 = vadd.f32 %v2592_v52, %v1053_v56  ;;  %v2276_v52 = vld [vmem:[%s3986_s9 + $0x98] sm:$0xf0]  ;;  %v2510_v56 = vld [vmem:[%s3986_s9 + $0x6c] sm:$0xf0] }
 0x714   :  { %v2279_v53 = vor.u32 %v2513_v41, %v2276_v52 }
 0x715   :  { %v3297_v26 = vadd.f32 %v1054_v43, %v2997_v0  ;;  %v2508_v43 = vld [vmem:[%s3986_s9 + $0x64] sm:$0xf] }
 0x716   :  { %1360 = vmatpush.bf16.msra.mxu1 %v2279_v53 }
 0x717   :  { %v1062_v58 = vsel %vm175_vm0, %v3297_v26, 0.0 }
 0x718   :  { %1063 = vadd.xlane.f32.xlu2 %v1062_v58  ;;  %v2251_v58 = vor.u32 %v2510_v56, %v2250_v54 }
 0x71a   :  { %1319 = vmatpush.bf16.msrb.mxu2 %v2251_v58 }
 0x71e   :  { %1320 = vmatpush.bf16.msrb.mxu2 %v2235_v6 }
 0x722   :  { %1321 = vmatpush.bf16.msrb.mxu2 %v2219_v22 }
 0x726   :  { %1322 = vmatpush.bf16.msrb.mxu2 %v2203_v35 }
 0x782   :  { %v1061_v59 = vpop.xlane.xlu1 %1060 }
 0x783   :  { %v1065_v60 = vmul.f32 %v1061_v59, %v3007_v10  ;;  %v2252_v59 = vld [vmem:[%s3986_s9 + $0x70] sm:$0xf0] }
 0x785   :  { %v3303_v61 = vsub.f32 %v3293_v55, %v1065_v60  ;;  %v2258_v60 = vld [vmem:[%s3986_s9 + $0x68] sm:$0xf] }
 0x787   :  { %v1069_v2 = vmul.f32 %v3303_v61, %v3303_v61 }
 0x789   :  { %1071 = vadd.xlane.f32.xlu0 %v1069_v2  ;;  %v2511_v2 = vld [vmem:[%s3986_s9 + $0x74] sm:$0xf0] }
 0x78b   :  { %v1064_v62 = vpop.xlane.xlu2 %1063 }
 0x78c   :  { %v1066_v63 = vmul.f32 %v1064_v62, %v3007_v10  ;;  %v2255_v62 = vor.u32 %v2508_v43, %v2252_v59 }
 0x78e   :  { %v3309_v0 = vsub.f32 %v3297_v26, %v1066_v63  ;;  %v2259_v63 = vor.u32 %v2511_v2, %v2258_v60  ;;  %1333 = vmatpush.bf16.msra.mxu3 %v2255_v62 }
 0x790   :  { %v1070_v46 = vmul.f32 %v3309_v0, %v3309_v0  ;;  %1347 = vmatpush.bf16.msrb.mxu0 %v2259_v63 }
 0x792   :  { %v1073_v14 = vsel %vm175_vm0, %v1070_v46, 0.0  ;;  %v2509_v46 = vld [vmem:[%s3986_s9 + $0x6c] sm:$0xf]  ;;  %1334 = vmatpush.bf16.msra.mxu3 %v2239_v8 }
 0x793   :  { %1074 = vadd.xlane.f32.xlu2 %v1073_v14  ;;  %v2260_v14 = vld [vmem:[%s3986_s9 + $0x78] sm:$0xf0] }
 0x794   :  { %v2263_v1 = vor.u32 %v2509_v46, %v2260_v14  ;;  %1348 = vmatpush.bf16.msrb.mxu0 %v2243_v9 }
 0x796   :  { %1361 = vmatpush.bf16.msra.mxu1 %v2263_v1  ;;  %1335 = vmatpush.bf16.msra.mxu3 %v2223_v25 }
 0x798   :  { %1349 = vmatpush.bf16.msrb.mxu0 %v2227_v27 }
 0x79a   :  { %1362 = vmatpush.bf16.msra.mxu1 %v2247_v13  ;;  %1336 = vmatpush.bf16.msra.mxu3 %v2207_v39 }
 0x79c   :  { %1350 = vmatpush.bf16.msrb.mxu0 %v2211_v40 }
 0x79e   :  { %1363 = vmatpush.bf16.msra.mxu1 %v2231_v33 }
 0x7a2   :  { %1364 = vmatpush.bf16.msra.mxu1 %v2215_v45 }
 0x7fc   :  { %v1072_v15 = vpop.xlane.xlu0 %1071 }
 0x7fd   :  { %v1076_v20 = vmul.f32 %v1072_v15, %v3007_v10 }
 0x7ff   :  { %v1078_v32 = vadd.f32 1e-06, %v1076_v20 }
 0x801   :  { %2634 = vrsqrt.f32 %v1078_v32  ;;  %vm1086_vm0 = vweird.f32 %v1078_v32 }
 0x806   :  { %v1075_v47 = vpop.xlane.xlu2 %1074 }
 0x807   :  { %v2635_v48 = vpop.eup %2634  ;;  %v1077_v50 = vmul.f32 %v1075_v47, %v3007_v10  ;;  %v2593_v10 = vld [vmem:[#allocation10] ss:$0 sm:$0xff] }
 0x808   :  { %v1081_v51 = vmul.f32 %v2635_v48, %v1078_v32  ;;  %vm1087_vm15 = vweird.f32 %v2635_v48 }
 0x809   :  { %v1079_v49 = vadd.f32 1e-06, %v1077_v50  ;;  %vm1088_vm1 = vmor %vm1086_vm0, %vm1087_vm15 }
 0x80a   :  { %v1082_v41 = vmul.f32 %v2635_v48, %v1081_v51 }
 0x80b   :  { %2636 = vrsqrt.f32 %v1079_v49  ;;  %vm1096_vm3 = vweird.f32 %v1079_v49 }
 0x80c   :  { %v1083_v52 = vmul.f32 0.5, %v1082_v41 }
 0x80e   :  { %v1084_v53 = vsub.f32 1.5, %v1083_v52 }
 0x810   :  { %v1085_v56 = vmul.f32 %v2635_v48, %v1084_v53 }
 0x811   :  { %v2637_v54 = vpop.eup %2636 }
 0x812   :  { %v1091_v43 = vmul.f32 %v2637_v54, %v1079_v49  ;;  %v1089_v59 = vsel %vm1088_vm1, %v2635_v48, %v1085_v56  ;;  %vm1097_vm2 = vweird.f32 %v2637_v54 }
 0x813   :  { %v1100_v62 = vmul.f32 %v1089_v59, %v3303_v61  ;;  %vm1098_vm4 = vmor %vm1096_vm3, %vm1097_vm2  ;;  %v1149_v61 = vperm.slane %v3510_v7, 2  ;;  %v2554_v7 = vld [vmem:[%s3988_s11 + $0xd0] sm:$0xff] }
 0x814   :  { %v1092_v58 = vmul.f32 %v2637_v54, %v1091_v43 }
 0x815   :  { %v1105_v1 = vmul.f32 %v2593_v10, %v1100_v62 }
 0x816   :  { %v1093_v60 = vmul.f32 0.5, %v1092_v58 }
 0x817   :  { %v1110_v5 = vadd.f32 %v2594_v3, %v1105_v1 }
 0x818   :  { %v1094_v2 = vsub.f32 1.5, %v1093_v60 }
 0x81a   :  { %v1095_v63 = vmul.f32 %v2637_v54, %v1094_v2 }
 0x81c   :  { %v1099_v46 = vsel %vm1098_vm4, %v2637_v54, %v1095_v63 }
 0x81d   :  { %v1101_v14 = vmul.f32 %v1099_v46, %v3309_v0 }
 0x81f   :  { %v1106_v4 = vmul.f32 %v2593_v10, %v1101_v14 }
 0x821   :  { %v1111_v6 = vadd.f32 %v2594_v3, %v1106_v4 }
 0x823   :  { %v1112_v16 = vpack.c.bf16 %v1111_v6, %v1110_v5 }
 0x825   :  { %1323 = vmatmul.bf16.vlgmr.msrb.gmra.mxu2 %v1112_v16  ;;  %1337 = vmatmul.bf16.vlgmr.msra.gmra.mxu3 %v1112_v16 }
 0x826   :  { %1351 = vmatmul.bf16.vlgmr.msrb.gmra.mxu0 %v1112_v16  ;;  %1365 = vmatmul.bf16.vlgmr.msra.gmra.mxu1 %v1112_v16 }
 0x8a3   :  { %v1352_v8 = vpop.f32.mrf.mxu0  ;;  %v1366_v9 = vpop.f32.mrf.mxu1 }
 0x8a4   :  { %v3514_v11 = vadd.f32 %v1352_v8, %v1149_v61  ;;  %v3518_v0 = vadd.f32 %v1366_v9, %v1150_v57 }
 0x8a6   :  { %v3522_v13 = vmul.f32 0.70710677, %v3514_v11  ;;  %v3525_v15 = vmul.f32 0.70710677, %v3518_v0 }
 0x8a8   :  { %v1467_v18 = vmul.f32 %v3522_v13, %v3522_v13  ;;  %v1507_v19 = vmul.f32 %v3525_v15, %v3525_v15  ;;  %v1324_v20 = vpop.f32.mrf.mxu2  ;;  %v1338_v22 = vpop.f32.mrf.mxu3 }
 0x8a9   :  { %v3534_v21 = vadd.f32 %v1324_v20, %v1147_v12  ;;  %v3542_v25 = vadd.f32 %v1338_v22, %v1148_v17 }
 0x8aa   :  { %v3536_v23 = vmin.f32 %v1467_v18, 16.0  ;;  %v3538_v24 = vmin.f32 %v1507_v19, 16.0 }
 0x8ab   :  { %v3545_v27 = vmul.f32 0.70710677, %v3534_v21  ;;  %v3554_v34 = vmul.f32 0.70710677, %v3542_v25  ;;  %v1354_v53 = vpop.f32.mrf.mxu0 }
 0x8ac   :  { %v1480_v29 = vmul.f32 3.8918573e-05, %v3536_v23  ;;  %v1469_v30 = vmul.f32 2.1237322e-06, %v3536_v23  ;;  %v1509_v31 = vmul.f32 2.1237322e-06, %v3538_v24  ;;  %v3572_v2 = vadd.f32 %v1354_v53, %v1149_v61 }
 0x8ad   :  { %v1520_v32 = vmul.f32 3.8918573e-05, %v3538_v24  ;;  %v1387_v33 = vmul.f32 %v3545_v27, %v3545_v27  ;;  %v1427_v45 = vmul.f32 %v3554_v34, %v3554_v34 }
 0x8ae   :  { %v1481_v28 = vadd.f32 0.001143296, %v1480_v29  ;;  %v1470_v38 = vadd.f32 0.00028619796, %v1469_v30  ;;  %v1510_v39 = vadd.f32 0.00028619796, %v1509_v31  ;;  %v1368_v29 = vpop.f32.mrf.mxu1 }
 0x8af   :  { %v1521_v35 = vadd.f32 0.001143296, %v1520_v32  ;;  %v3556_v36 = vmin.f32 %v1387_v33, 16.0  ;;  %v3568_v56 = vmin.f32 %v1427_v45, 16.0  ;;  %v3579_v5 = vmul.f32 0.70710677, %v3572_v2 }
 0x8b0   :  { %v1482_v37 = vmul.f32 %v1481_v28, %v3536_v23  ;;  %v1471_v51 = vmul.f32 %v1470_v38, %v3536_v23  ;;  %v1511_v49 = vmul.f32 %v1510_v39, %v3538_v24 }
 0x8b1   :  { %v1522_v40 = vmul.f32 %v1521_v35, %v3538_v24  ;;  %v1400_v42 = vmul.f32 3.8918573e-05, %v3556_v36  ;;  %v1389_v60 = vmul.f32 2.1237322e-06, %v3556_v36  ;;  %v1429_v14 = vmul.f32 2.1237322e-06, %v3568_v56 }
 0x8b2   :  { %v1483_v44 = vadd.f32 0.014752088, %v1482_v37  ;;  %v1472_v62 = vadd.f32 0.0036580483, %v1471_v51  ;;  %v1512_v10 = vadd.f32 0.0036580483, %v1511_v49  ;;  %v1627_v22 = vmul.f32 %v3579_v5, %v3579_v5 }
 0x8b3   :  { %v1523_v47 = vadd.f32 0.014752088, %v1522_v40  ;;  %v1401_v48 = vadd.f32 0.001143296, %v1400_v42  ;;  %v1390_v4 = vadd.f32 0.00028619796, %v1389_v60  ;;  %v3595_v37 = vadd.f32 %v1368_v29, %v1150_v57 }
 0x8b4   :  { %v1484_v50 = vmul.f32 %v1483_v44, %v3536_v23  ;;  %v1473_v6 = vmul.f32 %v1472_v62, %v3536_v23  ;;  %v1513_v16 = vmul.f32 %v1512_v10, %v3538_v24  ;;  %v1430_v8 = vadd.f32 0.00028619796, %v1429_v14 }
 0x8b5   :  { %v1524_v41 = vmul.f32 %v1523_v47, %v3538_v24  ;;  %v1402_v52 = vmul.f32 %v1401_v48, %v3556_v36  ;;  %v1440_v9 = vmul.f32 3.8918573e-05, %v3568_v56  ;;  %v1391_v20 = vmul.f32 %v1390_v4, %v3556_v36 }
 0x8b6   :  { %v1485_v54 = vadd.f32 0.112945676, %v1484_v50  ;;  %v1474_v30 = vadd.f32 0.05243302, %v1473_v6  ;;  %v1514_v31 = vadd.f32 0.05243302, %v1513_v16  ;;  %v1431_v33 = vmul.f32 %v1430_v8, %v3568_v56  ;;  %v1326_v50 = vpop.f32.mrf.mxu2 }
 0x8b7   :  { %v1525_v43 = vadd.f32 0.112945676, %v1524_v41  ;;  %v1403_v58 = vadd.f32 0.014752088, %v1402_v52  ;;  %v1441_v28 = vadd.f32 0.001143296, %v1440_v9 }
 0x8b8   :  { %v1486_v59 = vmul.f32 %v1485_v54, %v3536_v23  ;;  %v1392_v38 = vadd.f32 0.0036580483, %v1391_v20  ;;  %v3597_v39 = vmin.f32 %v1627_v22, 16.0  ;;  %v1475_v40 = vmul.f32 %v1474_v30, %v3536_v23 }
 0x8b9   :  { %v1526_v46 = vmul.f32 %v1525_v43, %v3538_v24  ;;  %v1404_v1 = vmul.f32 %v1403_v58, %v3556_v36  ;;  %v1515_v42 = vmul.f32 %v1514_v31, %v3538_v24  ;;  %v1432_v45 = vadd.f32 0.0036580483, %v1431_v33 }
 0x8ba   :  { %v1487_v63 = vadd.f32 0.4994258, %v1486_v59  ;;  %v1442_v47 = vmul.f32 %v1441_v28, %v3568_v56  ;;  %v1629_v48 = vmul.f32 2.1237322e-06, %v3597_v39  ;;  %v1640_v49 = vmul.f32 3.8918573e-05, %v3597_v39 }
 0x8bb   :  { %v1527_v61 = vadd.f32 0.4994258, %v1526_v46  ;;  %v1405_v19 = vadd.f32 0.112945676, %v1404_v1  ;;  %v3607_v57 = vmul.f32 0.70710677, %v3595_v37  ;;  %v1393_v41 = vmul.f32 %v1392_v38, %v3556_v36 }
 0x8bc   :  { %v1488_v3 = vmul.f32 %v1487_v63, %v3536_v23  ;;  %v1476_v53 = vadd.f32 0.18741608, %v1475_v40  ;;  %v3614_v54 = vadd.f32 %v1326_v50, %v1147_v12  ;;  %v1516_v43 = vadd.f32 0.18741608, %v1515_v42 }
 0x8bd   :  { %v1528_v32 = vmul.f32 %v1527_v61, %v3538_v24  ;;  %v1406_v35 = vmul.f32 %v1405_v19, %v3556_v36  ;;  %v1433_v58 = vmul.f32 %v1432_v45, %v3568_v56  ;;  %v1443_v59 = vadd.f32 0.014752088, %v1442_v47 }
 0x8be   :  { %v3584_v18 = vadd.f32 1.0, %v1488_v3  ;;  %v1630_v60 = vadd.f32 0.00028619796, %v1629_v48  ;;  %v1641_v10 = vadd.f32 0.001143296, %v1640_v49  ;;  %v1667_v63 = vmul.f32 %v3607_v57, %v3607_v57 }
 0x8bf   :  { %v3601_v44 = vadd.f32 1.0, %v1528_v32  ;;  %v1407_v51 = vadd.f32 0.4994258, %v1406_v35  ;;  %v1394_v14 = vadd.f32 0.05243302, %v1393_v41  ;;  %v1477_v12 = vmul.f32 %v1476_v53, %v3536_v23 }
 0x8c0   :  { %2638 = vrcp.f32 %v3584_v18  ;;  %v1631_v1 = vmul.f32 %v1630_v60, %v3597_v39  ;;  %v1517_v3 = vmul.f32 %v1516_v43, %v3538_v24  ;;  %v1434_v4 = vadd.f32 0.05243302, %v1433_v58  ;;  %v2551_v43 = vld [vmem:[%s3988_s11 + $0xb8] sm:$0xff] }
 0x8c1   :  { %2640 = vrcp.f32 %v3601_v44  ;;  %v1408_v62 = vmul.f32 %v1407_v51, %v3556_v36  ;;  %v1642_v6 = vmul.f32 %v1641_v10, %v3597_v39  ;;  %v1444_v61 = vmul.f32 %v1443_v59, %v3568_v56  ;;  %2015 = vmatpush.bf16.msra.mxu0 %v2551_v43  ;;  %v1340_v43 = vpop.f32.mrf.mxu3 }
 0x8c2   :  { %v3630_v8 = vmin.f32 %v1667_v63, 16.0  ;;  %v3633_v9 = vmul.f32 0.70710677, %v3614_v54  ;;  %v3636_v19 = vmul.f32 0.5, %v3514_v11  ;;  %v1395_v20 = vmul.f32 %v1394_v14, %v3556_v36 }
 0x8c3   :  { %v3627_v16 = vadd.f32 1.0, %v1408_v62  ;;  %v1478_v24 = vadd.f32 1.1283791, %v1477_v12  ;;  %v3642_v29 = vmul.f32 0.5, %v3518_v0  ;;  %v3645_v30 = vmul.f32 0.5, %v3572_v2 }
 0x8c4   :  { %v1632_v31 = vadd.f32 0.0036580483, %v1631_v1  ;;  %v1499_v32 = vand.u32 2147483647, %v3584_v18  ;;  %v1518_v33 = vadd.f32 1.1283791, %v1517_v3  ;;  %v3649_v28 = vmul.f32 %v1434_v4, %v3568_v56 }
 0x8c5   :  { %v1643_v11 = vadd.f32 0.014752088, %v1642_v6  ;;  %2642 = vrcp.f32 %v3627_v16  ;;  %v1445_v35 = vadd.f32 0.112945676, %v1444_v61  ;;  %v1669_v38 = vmul.f32 2.1237322e-06, %v3630_v8 }
 0x8c6   :  { %v3610_v52 = vpop.eup %2638  ;;  %v1547_v0 = vmul.f32 %v3633_v9, %v3633_v9  ;;  %v1396_v42 = vadd.f32 0.18741608, %v1395_v20  ;;  %v3660_v47 = vmul.f32 %v1478_v24, %v3522_v13  ;;  %v1633_v48 = vmul.f32 %v1632_v31, %v3597_v39  ;;  %v2559_v13 = vld [vmem:[%s3988_s11 + $0xf8] sm:$0xff]  ;;  %v2550_v20 = vld [vmem:[%s3988_s11 + $0xb0] sm:$0xff] }
 0x8c7   :  { %v1491_v46 = vmul.f32 %v3610_v52, %v3584_v18  ;;  %v3639_v22 = vpop.eup %2640  ;;  %v1644_v45 = vmul.f32 %v1643_v11, %v3597_v39  ;;  %v1680_v50 = vmul.f32 3.8918573e-05, %v3630_v8  ;;  %vm1495_vm5 = vweird.f32 %v3584_v18  ;;  %2029 = vmatpush.bf16.msrb.mxu1 %v2559_v13  ;;  %2016 = vmatpush.bf16.msra.mxu0 %v2550_v20  ;;  %v2549_v13 = vld [vmem:[%s3988_s11 + $0xa8] sm:$0xff] }
 0x8c8   :  { %v1531_v2 = vmul.f32 %v3639_v22, %v3601_v44  ;;  %v3664_v51 = vmin.f32 %v1547_v0, 16.0  ;;  %v1501_v49 = vand.u32 2147483648, %v3584_v18  ;;  %v3669_v41 = vmul.f32 %v1518_v33, %v3525_v15  ;;  %v2558_v18 = vld [vmem:[%s3988_s11 + $0xf0] sm:$0xff] }
 0x8c9   :  { %v1492_v23 = vsub.f32 1.0, %v1491_v46  ;;  %v1670_v53 = vadd.f32 0.00028619796, %v1669_v38  ;;  %vm3677_vm6 = vcmp.eq.f32.partialorder %v1499_v32, 8.507059e+37  ;;  %v1539_v59 = vand.u32 2147483647, %v3601_v44 }
 0x8ca   :  { %v1446_v60 = vmul.f32 %v1445_v35, %v3568_v56  ;;  %v1645_v62 = vadd.f32 0.112945676, %v1644_v45  ;;  %vm1496_vm7 = vweird.f32 %v3610_v52  ;;  %v1532_v10 = vsub.f32 1.0, %v1531_v2  ;;  %v2543_v2 = vld [vmem:[%s3988_s11 + $0x78] sm:$0xff] }
 0x8cb   :  { %v1493_v40 = vmul.f32 %v3610_v52, %v1492_v23  ;;  %v1541_v63 = vand.u32 2147483648, %v3601_v44  ;;  %v3686_v46 = vpop.eup %2642  ;;  %v1634_v14 = vadd.f32 0.05243302, %v1633_v48  ;;  %v1681_v1 = vadd.f32 0.001143296, %v1680_v50  ;;  %vm3701_vm9 = vmor %vm1495_vm5, %vm1496_vm7  ;;  %2030 = vmatpush.bf16.msrb.mxu1 %v2558_v18  ;;  %2001 = vmatpush.bf16.msrb.mxu3 %v2543_v2  ;;  %v2541_v2 = vld [vmem:[%s3988_s11 + $0x68] sm:$0xff] }
 0x8cc   :  { %v1646_v12 = vmul.f32 %v1645_v62, %v3597_v39  ;;  %v1549_v3 = vmul.f32 2.1237322e-06, %v3664_v51  ;;  %v1502_v4 = vor.u32 1.1754944e-38, %v1501_v49  ;;  %vm1535_vm8 = vweird.f32 %v3601_v44  ;;  %2017 = vmatpush.bf16.msra.mxu0 %v2549_v13 }
 0x8cd   :  { %v1494_v15 = vadd.f32 %v3610_v52, %v1493_v40  ;;  %v1397_v6 = vmul.f32 %v1396_v42, %v3556_v36  ;;  %v1671_v61 = vmul.f32 %v1670_v53, %v3630_v8  ;;  %v1560_v23 = vmul.f32 3.8918573e-05, %v3664_v51  ;;  %v2535_v40 = vld [vmem:[%s3988_s11 + $0x38] sm:$0xff] }
 0x8ce   :  { %v1447_v31 = vadd.f32 0.4994258, %v1446_v60  ;;  %v1647_v32 = vadd.f32 0.4994258, %v1646_v12  ;;  %v1682_v36 = vmul.f32 %v1681_v1, %v3630_v8  ;;  %v1550_v33 = vadd.f32 0.00028619796, %v1549_v3  ;;  %1987 = vmatpush.bf16.msra.mxu2 %v2535_v40 }
 0x8cf   :  { %v1498_v11 = vsel %vm3701_vm9, %v3610_v52, %v1494_v15  ;;  %v1533_v35 = vmul.f32 %v3639_v22, %v1532_v10  ;;  %v1411_v38 = vmul.f32 %v3686_v46, %v3627_v16  ;;  %v1561_v0 = vadd.f32 0.001143296, %v1560_v23  ;;  %v2557_v60 = vld [vmem:[%s3988_s11 + $0xe8] sm:$0xff]  ;;  %v2542_v23 = vld [vmem:[%s3988_s11 + $0x70] sm:$0xff] }
 0x8d0   :  { %v1635_v52 = vmul.f32 %v1634_v14, %v3597_v39  ;;  %v1648_v42 = vmul.f32 %v1647_v32, %v3597_v39  ;;  %v1683_v45 = vadd.f32 0.014752088, %v1682_v36  ;;  %v1551_v48 = vmul.f32 %v1550_v33, %v3664_v51  ;;  %2031 = vmatpush.bf16.msrb.mxu1 %v2557_v60  ;;  %v2548_v33 = vld [vmem:[%s3988_s11 + $0xa0] sm:$0xff]  ;;  %2002 = vmatpush.bf16.msrb.mxu3 %v2542_v23  ;;  %v2533_v40 = vld [vmem:[%s3988_s11 + $0x28] sm:$0xff] }
 0x8d1   :  { %vm1536_vm10 = vweird.f32 %v3639_v22  ;;  %vm3725_vm11 = vcmp.eq.f32.partialorder %v1539_v59, 8.507059e+37  ;;  %v1672_v49 = vadd.f32 0.0036580483, %v1671_v61  ;;  %v1562_v53 = vmul.f32 %v1561_v0, %v3664_v51  ;;  %v2534_v61 = vld [vmem:[%s3988_s11 + $0x30] sm:$0xff]  ;;  %2018 = vmatpush.bf16.msra.mxu0 %v2548_v33 }
 0x8d2   :  { %v1421_v62 = vand.u32 2147483648, %v3627_v16  ;;  %v1448_v59 = vmul.f32 %v1447_v31, %v3568_v56  ;;  %v3738_v15 = vadd.f32 1.0, %v1648_v42  ;;  %v1684_v10 = vmul.f32 %v1683_v45, %v3630_v8  ;;  %1988 = vmatpush.bf16.msra.mxu2 %v2534_v61  ;;  %vm3765_vm12 = vmor %vm1535_vm8, %vm1536_vm10  ;;  %v2546_v33 = vld [vmem:[%s3988_s11 + $0x90] sm:$0xff] }
 0x8d3   :  { %v1503_v14 = vsel %vm3677_vm6, %v1502_v4, %v1498_v11  ;;  %v1534_v12 = vadd.f32 %v3639_v22, %v1533_v35  ;;  %v1552_v1 = vadd.f32 0.0036580483, %v1551_v48  ;;  %v1563_v3 = vadd.f32 0.014752088, %v1562_v53  ;;  %v2556_v35 = vld [vmem:[%s3988_s11 + $0xe0] sm:$0xff] }
 0x8d4   :  { %v1412_v20 = vsub.f32 1.0, %v1411_v38  ;;  %v1636_v24 = vadd.f32 0.18741608, %v1635_v52  ;;  %2644 = vrcp.f32 %v3738_v15  ;;  %v3753_v58 = vadd.f32 %v1340_v43, %v1148_v17  ;;  %2032 = vmatpush.bf16.msrb.mxu1 %v2556_v35  ;;  %2003 = vmatpush.bf16.msrb.mxu3 %v2541_v2 }
 0x8d5   :  { %v1542_v4 = vor.u32 1.1754944e-38, %v1541_v63  ;;  %v3755_v31 = vadd.f32 1.1283791, %v1397_v6  ;;  %v1673_v32 = vmul.f32 %v1672_v49, %v3630_v8  ;;  %v1685_v36 = vadd.f32 0.112945676, %v1684_v10  ;;  %v2547_v49 = vld [vmem:[%s3988_s11 + $0x98] sm:$0xff] }
 0x8d6   :  { %v1419_v17 = vand.u32 2147483647, %v3627_v16  ;;  %v3770_v63 = vor.u32 1.1754944e-38, %v1421_v62  ;;  %v3772_v6 = vadd.f32 1.0, %v1448_v59  ;;  %v1564_v11 = vmul.f32 %v1563_v3, %v3664_v51  ;;  %1989 = vmatpush.bf16.msra.mxu2 %v2533_v40  ;;  %2019 = vmatpush.bf16.msra.mxu0 %v2547_v49  ;;  %v2531_v40 = vld [vmem:[%s3988_s11 + $0x18] sm:$0xff]  ;;  %v2552_v59 = vld [vmem:[%s3988_s11 + $0xc0] sm:$0xff] }
 0x8d7   :  { %v3779_v38 = vmul.f32 %v1503_v14, %v3660_v47  ;;  %v1538_v44 = vsel %vm3765_vm12, %v3639_v22, %v1534_v12  ;;  %v1686_v0 = vmul.f32 %v1685_v36, %v3630_v8  ;;  %v1553_v18 = vmul.f32 %v1552_v1, %v3664_v51  ;;  %v2532_v12 = vld [vmem:[%s3988_s11 + $0x20] sm:$0xff] }
 0x8d8   :  { %v1413_v47 = vmul.f32 %v3686_v46, %v1412_v20  ;;  %v1637_v52 = vmul.f32 %v1636_v24, %v3597_v39  ;;  %v1565_v42 = vadd.f32 0.112945676, %v1564_v11  ;;  %v3795_v22 = vmul.f32 0.70710677, %v3753_v58  ;;  %v2555_v39 = vld [vmem:[%s3988_s11 + $0xd8] sm:$0xff]  ;;  %v2540_v1 = vld [vmem:[%s3988_s11 + $0x60] sm:$0xff] }
 0x8d9   :  { %vm1415_vm13 = vweird.f32 %v3627_v16  ;;  %vm1416_vm14 = vweird.f32 %v3686_v46  ;;  %v1674_v45 = vadd.f32 0.05243302, %v1673_v32  ;;  %v1687_v48 = vadd.f32 0.4994258, %v1686_v0  ;;  %2033 = vmatpush.bf16.msrb.mxu1 %v2555_v39  ;;  %2004 = vmatpush.bf16.msrb.mxu3 %v2540_v1  ;;  %v2539_v16 = vld [vmem:[%s3988_s11 + $0x58] sm:$0xff] }
 0x8da   :  { %v3805_v53 = vpop.eup %2644  ;;  %v1543_v43 = vsel %vm3725_vm11, %v1542_v4, %v1538_v44  ;;  %2646 = vrcp.f32 %v3772_v6  ;;  %v1566_v13 = vmul.f32 %v1565_v42, %v3664_v51  ;;  %v1587_v60 = vmul.f32 %v3795_v22, %v3795_v22  ;;  %1990 = vmatpush.bf16.msra.mxu2 %v2532_v12  ;;  %vm3848_vm0 = vmor %vm1415_vm13, %vm1416_vm14  ;;  %2020 = vmatpush.bf16.msra.mxu0 %v2546_v33 }
 0x8db   :  { %v2330_v62 = vclamps-f32 %v3779_v38, 1.0  ;;  %vm3814_vm15 = vcmp.eq.f32.partialorder %v1419_v17, 8.507059e+37  ;;  %v1651_v10 = vmul.f32 %v3805_v53, %v3738_v15  ;;  %v1688_v50 = vmul.f32 %v1687_v48, %v3630_v8 }
 0x8dc   :  { %v1554_v14 = vadd.f32 0.05243302, %v1553_v18  ;;  %v1414_v3 = vadd.f32 %v3686_v46, %v1413_v47  ;;  %v1638_v61 = vadd.f32 1.1283791, %v1637_v52  ;;  %v1567_v23 = vadd.f32 0.4994258, %v1566_v13 }
 0x8dd   :  { %v3828_v20 = vmin.f32 %v1587_v60, 16.0  ;;  %v1652_v24 = vsub.f32 1.0, %v1651_v10  ;;  %v1659_v4 = vand.u32 2147483647, %v3738_v15  ;;  %v1675_v32 = vmul.f32 %v1674_v45, %v3630_v8  ;;  %2034 = vmatpush.bf16.msrb.mxu1 %v2554_v7  ;;  %2005 = vmatpush.bf16.msrb.mxu3 %v2539_v16 }
 0x8de   :  { %v3832_v36 = vadd.f32 1.0, %v1688_v50  ;;  %v1661_v17 = vand.u32 2147483648, %v3738_v15  ;;  %v1568_v11 = vmul.f32 %v1567_v23, %v3664_v51  ;;  %vm1656_vm1 = vweird.f32 %v3805_v53  ;;  %1991 = vmatpush.bf16.msra.mxu2 %v2531_v40 }
 0x8df   :  { %v1589_v35 = vmul.f32 2.1237322e-06, %v3828_v20  ;;  %v1600_v38 = vmul.f32 3.8918573e-05, %v3828_v20  ;;  %v1653_v0 = vmul.f32 %v3805_v53, %v1652_v24  ;;  %v1555_v18 = vmul.f32 %v1554_v14, %v3664_v51 }
 0x8e0   :  { %2648 = vrcp.f32 %v3832_v36  ;;  %v3862_v2 = vpop.eup %2646  ;;  %v3865_v47 = vmul.f32 %v1543_v43, %v3669_v41  ;;  %v1418_v52 = vsel %vm3848_vm0, %v3686_v46, %v1414_v3  ;;  %v3870_v42 = vadd.f32 1.0, %v1568_v11  ;;  %v2545_v41 = vld [vmem:[%s3988_s11 + $0x88] sm:$0xff] }
 0x8e1   :  { %v1590_v45 = vadd.f32 0.00028619796, %v1589_v35  ;;  %v1654_v48 = vadd.f32 %v3805_v53, %v1653_v0  ;;  %vm1655_vm2 = vweird.f32 %v3738_v15  ;;  %v1676_v49 = vadd.f32 0.18741608, %v1675_v32  ;;  %v2553_v43 = vld [vmem:[%s3988_s11 + $0xc8] sm:$0xff]  ;;  %2021 = vmatpush.bf16.msra.mxu0 %v2545_v41 }
 0x8e2   :  { %v1601_v39 = vadd.f32 0.001143296, %v1600_v38  ;;  %v1709_v46 = vadd.f32 1.0, %v2330_v62  ;;  %v1639_v13 = vmul.f32 %v1638_v61, %v3579_v5  ;;  %vm1657_vm3 = vmor %vm1655_vm2, %vm1656_vm1  ;;  %v1662_v60 = vor.u32 1.1754944e-38, %v1661_v17  ;;  %v2530_v62 = vld [vmem:[%s3988_s11 + $0x10] sm:$0xff]  ;;  %2035 = vmatpush.bf16.msrb.mxu1 %v2553_v43  ;;  %v2529_v11 = vld [vmem:[%s3988_s11 + $0x8] sm:$0xff] }
 0x8e3   :  { %2650 = vrcp.f32 %v3870_v42  ;;  %v1658_v15 = vsel %vm1657_vm3, %v3805_v53, %v1654_v48  ;;  %vm1660_vm4 = vcmp.eq.f32.partialorder %v1659_v4, 8.507059e+37  ;;  %v1556_v10 = vadd.f32 0.18741608, %v1555_v18  ;;  %v2538_v5 = vld [vmem:[%s3988_s11 + $0x50] sm:$0xff]  ;;  %1992 = vmatpush.bf16.msra.mxu2 %v2530_v62  ;;  %v2528_v43 = vld [vmem:[%s3988_s11] sm:$0xff] }
 0x8e4   :  { %v1591_v50 = vmul.f32 %v1590_v45, %v3828_v20  ;;  %v1423_v14 = vsel %vm3814_vm15, %v3770_v63, %v1418_v52  ;;  %v3897_v53 = vmul.f32 %v3862_v2, %v3772_v6  ;;  %v1663_v12 = vsel %vm1660_vm4, %v1662_v60, %v1658_v15  ;;  %v2544_v63 = vld [vmem:[%s3988_s11 + $0x80] sm:$0xff]  ;;  %2006 = vmatpush.bf16.msrb.mxu3 %v2538_v5 }
 0x8e5   :  { %v1602_v1 = vmul.f32 %v1601_v39, %v3828_v20  ;;  %v1399_v61 = vmul.f32 %v3755_v31, %v3545_v27  ;;  %v3903_v23 = vadd.f32 0.18741608, %v3649_v28  ;;  %v1664_v24 = vmul.f32 %v1663_v12, %v1639_v13  ;;  %2022 = vmatpush.bf16.msra.mxu0 %v2544_v63 }
 0x8e6   :  { %v2649_v3 = vpop.eup %2648  ;;  %v1677_v4 = vmul.f32 %v1676_v49, %v3630_v8  ;;  %v1717_v32 = vmul.f32 %v1709_v46, %v3636_v19  ;;  %v2331_v27 = vclamps-f32 %v3865_v47, 1.0  ;;  %v1557_v7 = vmul.f32 %v1556_v10, %v3664_v51  ;;  %v2537_v19 = vld [vmem:[%s3988_s11 + $0x48] sm:$0xff]  ;;  %2036 = vmatpush.bf16.msrb.mxu1 %v2552_v59  ;;  %v2536_v46 = vld [vmem:[%s3988_s11 + $0x40] sm:$0xff] }
 0x8e7   :  { %v1691_v28 = vmul.f32 %v2649_v3, %v3832_v36  ;;  %v1603_v31 = vadd.f32 0.014752088, %v1602_v1  ;;  %v3915_v33 = vmul.f32 %v1423_v14, %v1399_v61  ;;  %v2334_v8 = vclamps-f32 %v1664_v24, 1.0  ;;  %1993 = vmatpush.bf16.msra.mxu2 %v2529_v11 }
 0x8e8   :  { %v1592_v17 = vadd.f32 0.0036580483, %v1591_v50  ;;  %v1452_v38 = vsub.f32 1.0, %v3897_v53  ;;  %v1701_v0 = vand.u32 2147483648, %v3832_v36  ;;  %v1678_v51 = vadd.f32 1.1283791, %v1677_v4  ;;  %2007 = vmatpush.bf16.msrb.mxu3 %v2537_v19 }
 0x8e9   :  { %v2651_v35 = vpop.eup %2650  ;;  %v1692_v44 = vsub.f32 1.0, %v1691_v28  ;;  %v1604_v18 = vmul.f32 %v1603_v31, %v3828_v20  ;;  %v1713_v40 = vadd.f32 1.0, %v2334_v8  ;;  %vm1695_vm5 = vweird.f32 %v3832_v36 }
 0x8ea   :  { %v1571_v16 = vmul.f32 %v2651_v35, %v3870_v42  ;;  %vm1696_vm6 = vweird.f32 %v2649_v3  ;;  %v1699_v52 = vand.u32 2147483647, %v3832_v36  ;;  %v1558_v49 = vadd.f32 1.1283791, %v1557_v7 }
 0x8eb   :  { %v1693_v47 = vmul.f32 %v2649_v3, %v1692_v44  ;;  %v1605_v45 = vadd.f32 0.112945676, %v1604_v18  ;;  %v1721_v48 = vmul.f32 %v1713_v40, %v3645_v30  ;;  %v1593_v41 = vmul.f32 %v1592_v17, %v3828_v20  ;;  %vm1697_vm7 = vmor %vm1695_vm5, %vm1696_vm6  ;;  %1994 = vmatpush.bf16.msra.mxu2 %v2528_v43 }
 0x8ec   :  { %v1572_v39 = vsub.f32 1.0, %v1571_v16  ;;  %v1702_v60 = vor.u32 1.1754944e-38, %v1701_v0  ;;  %v1581_v15 = vand.u32 2147483648, %v3870_v42  ;;  %vm1576_vm8 = vweird.f32 %v2651_v35  ;;  %2008 = vmatpush.bf16.msrb.mxu3 %v2536_v46 }
 0x8ed   :  { %v1694_v13 = vadd.f32 %v2649_v3, %v1693_v47  ;;  %v1606_v10 = vmul.f32 %v1605_v45, %v3828_v20  ;;  %v1725_v50 = vpack.c.bf16 %v1721_v48, %v1717_v32  ;;  %v1579_v62 = vand.u32 2147483647, %v3870_v42 }
 0x8ee   :  { %v1573_v30 = vmul.f32 %v2651_v35, %v1572_v39  ;;  %v1679_v5 = vmul.f32 %v1678_v51, %v3607_v57  ;;  %vm1700_vm9 = vcmp.eq.f32.partialorder %v1699_v52, 8.507059e+37  ;;  %vm1575_vm10 = vweird.f32 %v3870_v42 }
 0x8ef   :  { %v1698_v14 = vsel %vm1697_vm7, %v2649_v3, %v1694_v13  ;;  %v1607_v53 = vadd.f32 0.4994258, %v1606_v10  ;;  %v1594_v61 = vadd.f32 0.05243302, %v1593_v41  ;;  %2023 = vmatmul.bf16.vlgmr.msra.gmra.mxu0 %v1725_v50  ;;  %v1453_v36 = vmul.f32 %v3862_v2, %v1452_v38  ;;  %vm1577_vm11 = vmor %vm1575_vm10, %vm1576_vm8 }
 0x8f0   :  { %v1703_v12 = vsel %vm1700_vm9, %v1702_v60, %v1698_v14  ;;  %v1574_v1 = vadd.f32 %v2651_v35, %v1573_v30  ;;  %v1582_v4 = vor.u32 1.1754944e-38, %v1581_v15  ;;  %v2328_v57 = vclamps-f32 %v3915_v33, 1.0 }
 0x8f1   :  { %v1704_v24 = vmul.f32 %v1703_v12, %v1679_v5  ;;  %v1608_v63 = vmul.f32 %v1607_v53, %v3828_v20  ;;  %v1559_v3 = vmul.f32 %v1558_v49, %v3633_v9  ;;  %vm1580_vm12 = vcmp.eq.f32.partialorder %v1579_v62, 8.507059e+37 }
 0x8f2   :  { %v1578_v59 = vsel %vm1577_vm11, %v2651_v35, %v1574_v1  ;;  %v1710_v32 = vadd.f32 1.0, %v2331_v27  ;;  %v1437_v8 = vmul.f32 %v3903_v23, %v3568_v56  ;;  %v1378_v7 = vmul.f32 0.5, %v3595_v37 }
 0x8f3   :  { %v2335_v28 = vclamps-f32 %v1704_v24, 1.0  ;;  %v1583_v31 = vsel %vm1580_vm12, %v1582_v4, %v1578_v59  ;;  %v1609_v42 = vadd.f32 1.0, %v1608_v63  ;;  %v1595_v11 = vmul.f32 %v1594_v61, %v3828_v20  ;;  %v2595_v4 = vld [vmem:[#allocation15] ss:$0 sm:$0xff] }
 0x8f4   :  { %v1584_v17 = vmul.f32 %v1583_v31, %v1559_v3  ;;  %v1454_v19 = vadd.f32 %v3862_v2, %v1453_v36  ;;  %vm1456_vm13 = vweird.f32 %v3862_v2  ;;  %v1707_v9 = vadd.f32 1.0, %v2328_v57 }
 0x8f5   :  { %v1714_v33 = vadd.f32 1.0, %v2335_v28  ;;  %2652 = vrcp.f32 %v1609_v42  ;;  %v1461_v27 = vand.u32 2147483648, %v3772_v6  ;;  %v1718_v38 = vmul.f32 %v1710_v32, %v3642_v29 }
 0x8f6   :  { %v2332_v35 = vclamps-f32 %v1584_v17, 1.0  ;;  %vm1455_vm14 = vweird.f32 %v3772_v6  ;;  %v1459_v56 = vand.u32 2147483647, %v3772_v6  ;;  %v1371_v23 = vmul.f32 0.5, %v3534_v21 }
 0x8f7   :  { %v1722_v37 = vmul.f32 %v1714_v33, %v1378_v7  ;;  %vm1457_vm15 = vmor %vm1455_vm14, %vm1456_vm13  ;;  %v1375_v44 = vmul.f32 0.5, %v3614_v54  ;;  %v1596_v18 = vadd.f32 0.18741608, %v1595_v11  ;;  %v1438_v40 = vadd.f32 1.1283791, %v1437_v8 }
 0x8f8   :  { %v1711_v0 = vadd.f32 1.0, %v2332_v35  ;;  %v1458_v51 = vsel %vm1457_vm15, %v3862_v2, %v1454_v19  ;;  %v1715_v47 = vmul.f32 %v1707_v9, %v1371_v23  ;;  %v1462_v52 = vor.u32 1.1754944e-38, %v1461_v27 }
 0x8f9   :  { %v1726_v16 = vpack.c.bf16 %v1722_v37, %v1718_v38  ;;  %vm1460_vm0 = vcmp.eq.f32.partialorder %v1459_v56, 8.507059e+37  ;;  %v1597_v49 = vmul.f32 %v1596_v18, %v3828_v20  ;;  %v1439_v39 = vmul.f32 %v1438_v40, %v3554_v34 }
 0x8fa   :  { %v1719_v45 = vmul.f32 %v1711_v0, %v1375_v44  ;;  %v1463_v48 = vsel %vm1460_vm0, %v1462_v52, %v1458_v51  ;;  %v1621_v43 = vand.u32 2147483648, %v1609_v42  ;;  %v1619_v13 = vand.u32 2147483647, %v1609_v42 }
 0x8fb   :  { %v2653_v29 = vpop.eup %2652  ;;  %2037 = vmatmul.bf16.vlgmr.msrb.gmra.mxu1 %v1726_v16  ;;  %v1464_v41 = vmul.f32 %v1463_v48, %v1439_v39  ;;  %v1598_v46 = vadd.f32 1.1283791, %v1597_v49  ;;  %vm1615_vm2 = vweird.f32 %v1609_v42  ;;  %v1372_v14 = vmul.f32 0.5, %v3542_v25 }
 0x8fc   :  { %v1723_v6 = vpack.c.bf16 %v1719_v45, %v1715_v47  ;;  %v1611_v21 = vmul.f32 %v2653_v29, %v1609_v42  ;;  %vm1616_vm1 = vweird.f32 %v2653_v29  ;;  %v1622_v15 = vor.u32 1.1754944e-38, %v1621_v43 }
 0x8fd   :  { %vm1617_vm3 = vmor %vm1615_vm2, %vm1616_vm1  ;;  %v2329_v10 = vclamps-f32 %v1464_v41, 1.0  ;;  %v1599_v50 = vmul.f32 %v1598_v46, %v3795_v22  ;;  %vm1620_vm4 = vcmp.eq.f32.partialorder %v1619_v13, 8.507059e+37  ;;  %v1376_v53 = vmul.f32 0.5, %v3753_v58 }
 0x8fe   :  { %v1612_v54 = vsub.f32 1.0, %v1611_v21  ;;  %1995 = vmatmul.bf16.vlgmr.msra.gmra.mxu2 %v1723_v6 }
 0x8ff   :  { %v1708_v34 = vadd.f32 1.0, %v2329_v10 }
 0x900   :  { %v1613_v2 = vmul.f32 %v2653_v29, %v1612_v54 }
 0x901   :  { %v1716_v1 = vmul.f32 %v1708_v34, %v1372_v14 }
 0x902   :  { %v1614_v60 = vadd.f32 %v2653_v29, %v1613_v2 }
 0x904   :  { %v1618_v30 = vsel %vm1617_vm3, %v2653_v29, %v1614_v60 }
 0x905   :  { %v1623_v20 = vsel %vm1620_vm4, %v1622_v15, %v1618_v30 }
 0x906   :  { %v1624_v62 = vmul.f32 %v1623_v20, %v1599_v50 }
 0x908   :  { %v2333_v5 = vclamps-f32 %v1624_v62, 1.0 }
 0x90a   :  { %v1712_v12 = vadd.f32 1.0, %v2333_v5 }
 0x90c   :  { %v1720_v61 = vmul.f32 %v1712_v12, %v1376_v53 }
 0x90e   :  { %v1724_v36 = vpack.c.bf16 %v1720_v61, %v1716_v1 }
 0x910   :  { %2009 = vmatmul.bf16.vlgmr.msrb.gmra.mxu3 %v1724_v36 }
 0x96c   :  { %v2024_v57 = vpop.f32.mrf.mxu0 }
 0x974   :  { %v2026_v7 = vpop.f32.mrf.mxu0 }
 0x978   :  { %v2038_v59 = vpop.f32.mrf.mxu1 }
 0x980   :  { %v2040_v11 = vpop.f32.mrf.mxu1 }
 0x981   :  { %v1996_v24 = vpop.f32.mrf.mxu2 }
 0x982   :  { %v1997_v63 = vadd.f32 %v2595_v4, %v1996_v24 }
 0x989   :  { %v1998_v32 = vpop.f32.mrf.mxu2 }
 0x98a   :  { %v1999_v42 = vadd.f32 %v2595_v4, %v1998_v32 }
 0x993   :  { %v2010_v22 = vpop.f32.mrf.mxu3 }
 0x994   :  { %v2011_v3 = vadd.f32 %v2010_v22, %v1997_v63 }
 0x996   :  { %v2025_v28 = vadd.f32 %v2024_v57, %v2011_v3 }
 0x998   :  { %v2039_v31 = vadd.f32 %v2038_v59, %v2025_v28 }
 0x99a   :  { %v2043_v25 = vadd.f32 %v2039_v31, %v3293_v55 }
 0x99b   :  { %v2012_v8 = vpop.f32.mrf.mxu3 }
 0x99c   :  { %2045 = vst [vmem:[%s3990_s13] sm:$0xff] %v2043_v25  ;;  %v2013_v58 = vadd.f32 %v2012_v8, %v1999_v42 }
 0x99e   :  { %v2027_v17 = vadd.f32 %v2026_v7, %v2013_v58 }
 0x9a0   :  { %v2041_v19 = vadd.f32 %v2040_v11, %v2027_v17 }
 0x9a2   :  { %v2044_v33 = vadd.f32 %v2041_v19, %v3297_v26 }
 0x9a4   :  { %2046 = vst [vmem:[%s3990_s13 + $0x8] sm:$0x3] %v2044_v33 }
 0x9a5   :  { %2051 = vsyncpa [#allocation3], 1 }
 0x9a6   :  { %2052 = vsyncpa [#allocation5], 1 }
 0x9a7   :  { %2053 = vsyncpa [#allocation8], 1 }
 0x9a8   :  { %2054 = vsyncpa [#allocation11], 1 }
 0x9a9   :  { %2055 = vsyncpa [#allocation14], 1 }

// kernel: vit_model_forward.6
= control target key start
LH: loop header
LB: loop body
LE: loop exit
PB: predicated region body
PF: predicated region fallthrough
CT: control target
= control target key end

     0   :  { %18 = vsyncpa [#allocation3], 0  ;;  %s3938_s0 = inlined_call_operand.vmem [shape: f32[10,128], index: 0, kind: input, shape index: {}, may-alias: {0,13}]   ;;  %s3939_s1 = inlined_call_operand.hbm [shape: f32[1,128], index: 1, kind: input, shape index: {}]   ;;  %s3940_s2 = inlined_call_operand.hbm [shape: f32[1,128], index: 2, kind: input, shape index: {}]   ;;  %s3941_s3 = inlined_call_operand.vmem [shape: bf16[128,384], index: 3, kind: input, shape index: {}]   ;;  %s3942_s4 = inlined_call_operand.hbm [shape: f32[1,384], index: 4, kind: input, shape index: {}]   ;;  %s3943_s5 = inlined_call_operand.hbm [shape: bf16[128,128], index: 5, kind: input, shape index: {}]   ;;  %s3944_s6 = inlined_call_operand.hbm [shape: f32[1,128], index: 6, kind: input, shape index: {}]   ;;  %s3945_s7 = inlined_call_operand.hbm [shape: f32[1,128], index: 7, kind: input, shape index: {}]   ;;  %s3946_s8 = inlined_call_operand.hbm [shape: f32[1,128], index: 8, kind: input, shape index: {}]   ;;  %s3947_s9 = inlined_call_operand.vmem [shape: bf16[128,512], index: 9, kind: input, shape index: {}]   ;;  %s3948_s10 = inlined_call_operand.vmem [shape: f32[1,512], index: 10, kind: input, shape index: {}]   ;;  %s3949_s11 = inlined_call_operand.vmem [shape: bf16[512,128], index: 11, kind: input, shape index: {}]   ;;  %s3950_s12 = inlined_call_operand.hbm [shape: f32[1,128], index: 12, kind: input, shape index: {}]   ;;  %s3951_s13 = inlined_call_operand.vmem [shape: f32[10,128], index: 13, kind: output, shape index: {}, may-alias: {0,13}]  }
   0x1   :  { %19 = vsyncpa [#allocation5], 0 }
   0x2   :  { %20 = vsyncpa [#allocation8], 0 }
   0x3   :  { %21 = vsyncpa [#allocation11], 0  ;;  %s41_s27 = sshll.u32 %s3940_s2, 4  ;;  %s42_s27 = int_to_ptr.hbm [resolvable:$true] %s41_s27 }
   0x4   :  { %22 = vsyncpa [#allocation14], 0  ;;  %s2842_s28 = smov [#allocation4]   ;;  %s64_s15 = sshll.u32 %s3943_s5, 4  ;;  %s65_s15 = int_to_ptr.hbm [resolvable:$true] %s64_s15 }
   0x5   :  { %s43_s29 = sshll.u32 %s2842_s28, 4  ;;  %s2843_s16 = smov [#allocation7]   ;;  %s44_s29 = int_to_ptr.vmem [resolvable:$true] %s43_s29 }
   0x6   :  { %46 = dma.hbm_to_vmem [thread:$0]  %s42_s27, 16, %s44_s29, [#allocation5]  }
   0x7   :  { %s66_s17 = sshll.u32 %s2843_s16, 4  ;;  %s2844_s18 = smov 64   ;;  %s67_s17 = int_to_ptr.vmem [resolvable:$true] %s66_s17 }
   0x8   :  { %s2845_s19 = smov 4   ;;  %s89_s21 = sshll.u32 %s3945_s7, 4  ;;  %s90_s21 = int_to_ptr.hbm [resolvable:$true] %s89_s21 }
   0x9   :  { %72 = dma.hbm_to_vmem [thread:$0]  %s65_s15, 1024, %s67_s17, [#allocation8], %s2844_s18, %s2844_s18, %s2845_s19  }
   0xa   :  { %s2846_s22 = smov [#allocation10]   ;;  %s30_s25 = sshll.u32 %s3939_s1, 4  ;;  %s31_s25 = int_to_ptr.hbm [resolvable:$true] %s30_s25 }
   0xb   :  { %s91_s23 = sshll.u32 %s2846_s22, 4  ;;  %s2847_s26 = smov [#allocation2]   ;;  %s92_s23 = int_to_ptr.vmem [resolvable:$true] %s91_s23 }
   0xc   :  { %94 = dma.hbm_to_vmem [thread:$0]  %s90_s21, 16, %s92_s23, [#allocation11]  }
   0xd   :  { %s32_s27 = sshll.u32 %s2847_s26, 4  ;;  %s54_s30 = sshll.u32 %s3942_s4, 4  ;;  %s33_s27 = int_to_ptr.vmem [resolvable:$true] %s32_s27  ;;  %s55_s30 = int_to_ptr.hbm [resolvable:$true] %s54_s30 }
   0xe   :  { %35 = dma.hbm_to_vmem [thread:$0]  %s31_s25, 16, %s33_s27, [#allocation3]  }
   0xf   :  { %s78_s15 = sshll.u32 %s3944_s6, 4  ;;  %s2848_s16 = smov [#allocation6]   ;;  %s79_s15 = int_to_ptr.hbm [resolvable:$true] %s78_s15 }
  0x10   :  { %s56_s17 = sshll.u32 %s2848_s16, 4  ;;  %s2849_s1 = smov [#allocation9]   ;;  %s57_s17 = int_to_ptr.vmem [resolvable:$true] %s56_s17 }
  0x11   :  { %59 = dma.hbm_to_vmem [thread:$0]  %s55_s30, 48, %s57_s17, [#allocation5]  }
  0x12   :  { %s80_s19 = sshll.u32 %s2849_s1, 4  ;;  %s100_s21 = sshll.u32 %s3946_s8, 4  ;;  %s81_s19 = int_to_ptr.vmem [resolvable:$true] %s80_s19  ;;  %s101_s21 = int_to_ptr.hbm [resolvable:$true] %s100_s21 }
  0x13   :  { %83 = dma.hbm_to_vmem [thread:$0]  %s79_s15, 16, %s81_s19, [#allocation8]  }
  0x14   :  { %s117_s23 = sshll.u32 %s3950_s12, 4  ;;  %s2850_s24 = smov [#allocation12]   ;;  %s118_s23 = int_to_ptr.hbm [resolvable:$true] %s117_s23 }
  0x15   :  { %s102_s6 = sshll.u32 %s2850_s24, 4  ;;  %s2851_s5 = smov [#allocation13]   ;;  %s103_s6 = int_to_ptr.vmem [resolvable:$true] %s102_s6 }
  0x16   :  { %105 = dma.hbm_to_vmem [thread:$0]  %s101_s21, 16, %s103_s6, [#allocation11]  }
  0x17   :  { %s119_s25 = sshll.u32 %s2851_s5, 4  ;;  %s120_s25 = int_to_ptr.vmem [resolvable:$true] %s119_s25 }
  0x18   :  { %122 = dma.hbm_to_vmem [thread:$0]  %s118_s23, 16, %s120_s25, [#allocation14]  }
  0x19   :  { %2832 = dma.done.wait [#allocation3], 16  }
  0x1a   :  { %2833 = vsyncadd [#allocation3], 4294967280 }
  0x1b   :  { %2834 = dma.done.wait [#allocation5], 64  }
  0x1c   :  { %2835 = vsyncadd [#allocation5], 4294967232 }
  0x1d   :  { %2836 = dma.done.wait [#allocation8], 1040  }
  0x1e   :  { %2837 = vsyncadd [#allocation8], 4294966256 }
  0x1f   :  { %2838 = dma.done.wait [#allocation11], 32  }
  0x20   :  { %2839 = vsyncadd [#allocation11], 4294967264 }
  0x21   :  { %2840 = dma.done.wait [#allocation14], 16  }
  0x22   :  { %2841 = vsyncadd [#allocation14], 4294967280  ;;  %vm162_vm0 = vcmask 1041408   ;;  %v2955_v0 = vld [vmem:[%s3938_s0 + $0x8] sm:$0x3]  ;;  %v2962_v2 = vld [vmem:[%s3938_s0] sm:$0xff] }
  0x23   :  { %v163_v1 = vsel %vm162_vm0, %v2955_v0, 0.0  ;;  %v2852_v3 = vmov 128.0   ;;  %v2129_v19 = vld [vmem:[%s3941_s3 + $0xa8] sm:$0xf]  ;;  %v2473_v20 = vld [vmem:[%s3941_s3 + $0xb0] sm:$0xf0] }
  0x24   :  { %164 = vadd.xlane.f32.xlu0 %v163_v1  ;;  %2582 = vrcp.f32 %v2852_v3  ;;  %v2472_v21 = vld [vmem:[%s3941_s3 + $0xac] sm:$0xf]  ;;  %v2130_v22 = vor.u32 %v2473_v20, %v2129_v19  ;;  %v2131_v23 = vld [vmem:[%s3941_s3 + $0xb4] sm:$0xf0]  ;;  %v2137_v24 = vld [vmem:[%s3941_s3 + $0xb0] sm:$0xf] }
  0x25   :  { %v2474_v25 = vld [vmem:[%s3941_s3 + $0xb8] sm:$0xf0]  ;;  %v2134_v26 = vor.u32 %v2472_v21, %v2131_v23  ;;  %v2117_v28 = vld [vmem:[%s3941_s3 + $0x90] sm:$0xf]  ;;  %v2469_v30 = vld [vmem:[%s3941_s3 + $0x94] sm:$0xf] }
  0x26   :  { %v2138_v27 = vor.u32 %v2474_v25, %v2137_v24  ;;  %389 = vmatpush.bf16.msra.mxu0 %v2130_v22  ;;  %v2470_v29 = vld [vmem:[%s3941_s3 + $0x98] sm:$0xf0]  ;;  %v2119_v32 = vld [vmem:[%s3941_s3 + $0x9c] sm:$0xf0]  ;;  %v2125_v33 = vld [vmem:[%s3941_s3 + $0x98] sm:$0xf] }
  0x27   :  { %403 = vmatpush.bf16.msra.mxu1 %v2134_v26  ;;  %v2118_v31 = vor.u32 %v2470_v29, %v2117_v28  ;;  %v2471_v34 = vld [vmem:[%s3941_s3 + $0xa0] sm:$0xf0]  ;;  %v2122_v35 = vor.u32 %v2469_v30, %v2119_v32  ;;  %v2105_v37 = vld [vmem:[%s3941_s3 + $0x78] sm:$0xf]  ;;  %v2466_v39 = vld [vmem:[%s3941_s3 + $0x7c] sm:$0xf] }
  0x28   :  { %417 = vmatpush.bf16.msra.mxu2 %v2138_v27  ;;  %v2126_v36 = vor.u32 %v2471_v34, %v2125_v33  ;;  %v2467_v38 = vld [vmem:[%s3941_s3 + $0x80] sm:$0xf0]  ;;  %v2107_v41 = vld [vmem:[%s3941_s3 + $0x84] sm:$0xf0]  ;;  %v2113_v42 = vld [vmem:[%s3941_s3 + $0x80] sm:$0xf] }
  0x29   :  { %v2106_v40 = vor.u32 %v2467_v38, %v2105_v37  ;;  %v2468_v43 = vld [vmem:[%s3941_s3 + $0x88] sm:$0xf0]  ;;  %v2110_v44 = vor.u32 %v2466_v39, %v2107_v41  ;;  %v2093_v46 = vld [vmem:[%s3941_s3 + $0x60] sm:$0xf]  ;;  %v2463_v48 = vld [vmem:[%s3941_s3 + $0x64] sm:$0xf] }
  0x2a   :  { %v2583_v4 = vpop.eup %2582  ;;  %390 = vmatpush.bf16.msra.mxu0 %v2118_v31  ;;  %v2114_v45 = vor.u32 %v2468_v43, %v2113_v42  ;;  %v2464_v47 = vld [vmem:[%s3941_s3 + $0x68] sm:$0xf0]  ;;  %v2095_v50 = vld [vmem:[%s3941_s3 + $0x6c] sm:$0xf0]  ;;  %v2101_v51 = vld [vmem:[%s3941_s3 + $0x68] sm:$0xf] }
  0x2b   :  { %v167_v5 = vmul.f32 128.0, %v2583_v4  ;;  %vm171_vm1 = vweird.f32 %v2583_v4  ;;  %404 = vmatpush.bf16.msra.mxu1 %v2122_v35  ;;  %v2094_v49 = vor.u32 %v2464_v47, %v2093_v46  ;;  %v2465_v52 = vld [vmem:[%s3941_s3 + $0x70] sm:$0xf0]  ;;  %v2098_v53 = vor.u32 %v2463_v48, %v2095_v50  ;;  %v2081_v55 = vld [vmem:[%s3941_s3 + $0x48] sm:$0xf]  ;;  %s2855_s8 = smov 32  }
  0x2c   :  { %160 = vadd.xlane.f32.xlu0 %v2962_v2  ;;  %418 = vmatpush.bf16.msra.mxu2 %v2126_v36  ;;  %v2102_v54 = vor.u32 %v2465_v52, %v2101_v51  ;;  %v2461_v56 = vld [vmem:[%s3941_s3 + $0x50] sm:$0xf0]  ;;  %v2460_v57 = vld [vmem:[%s3941_s3 + $0x4c] sm:$0xf]  ;;  %v2083_v59 = vld [vmem:[%s3941_s3 + $0x54] sm:$0xf0] }
  0x2d   :  { %v168_v6 = vsub.f32 1.0, %v167_v5  ;;  %v2082_v58 = vor.u32 %v2461_v56, %v2081_v55  ;;  %v2089_v60 = vld [vmem:[%s3941_s3 + $0x50] sm:$0xf]  ;;  %v2462_v61 = vld [vmem:[%s3941_s3 + $0x58] sm:$0xf0]  ;;  %v2086_v62 = vor.u32 %v2460_v57, %v2083_v59  ;;  %vm439_vm8 = vcmask 261120  }
  0x2e   :  { %391 = vmatpush.bf16.msra.mxu0 %v2106_v40  ;;  %v2090_v63 = vor.u32 %v2462_v61, %v2089_v60  ;;  %v2069_v1 = vld [vmem:[%s3941_s3 + $0x30] sm:$0xf]  ;;  %v2458_v3 = vld [vmem:[%s3941_s3 + $0x38] sm:$0xf0]  ;;  %v2065_v19 = vld [vmem:[%s3941_s3 + $0x20] sm:$0xf] }
  0x2f   :  { %v169_v7 = vmul.f32 %v2583_v4, %v168_v6  ;;  %405 = vmatpush.bf16.msra.mxu1 %v2110_v44  ;;  %v2070_v5 = vor.u32 %v2458_v3, %v2069_v1  ;;  %v2071_v6 = vld [vmem:[%s3941_s3 + $0x3c] sm:$0xf0]  ;;  %v2456_v20 = vld [vmem:[%s3941_s3 + $0x28] sm:$0xf0]  ;;  %v2451_v25 = vld [vmem:[%s3941_s3 + $0x4] sm:$0xf] }
  0x30   :  { %419 = vmatpush.bf16.msra.mxu2 %v2114_v45  ;;  %v2066_v22 = vor.u32 %v2456_v20, %v2065_v19  ;;  %v2045_v23 = vld [vmem:[%s3941_s3] sm:$0xf]  ;;  %v2452_v24 = vld [vmem:[%s3941_s3 + $0x8] sm:$0xf0]  ;;  %v2047_v28 = vld [vmem:[%s3941_s3 + $0xc] sm:$0xf0] }
  0x31   :  { %v170_v9 = vadd.f32 %v2583_v4, %v169_v7  ;;  %v2077_v7 = vld [vmem:[%s3941_s3 + $0x38] sm:$0xf]  ;;  %v2046_v27 = vor.u32 %v2452_v24, %v2045_v23  ;;  %v2053_v29 = vld [vmem:[%s3941_s3 + $0x8] sm:$0xf]  ;;  %v2453_v30 = vld [vmem:[%s3941_s3 + $0x10] sm:$0xf0]  ;;  %v2050_v32 = vor.u32 %v2451_v25, %v2047_v28 }
  0x32   :  { %392 = vmatpush.bf16.msra.mxu0 %v2094_v49  ;;  %v2054_v33 = vor.u32 %v2453_v30, %v2053_v29  ;;  %v2576_v51 = vld [vmem:[#allocation2] ss:$0 sm:$0xff]  ;;  %v2577_v56 = vld [vmem:[#allocation4] ss:$0 sm:$0xff]  ;;  %v253_v61 = vld [vmem:[#allocation6] sm:$0x7] }
  0x33   :  { %v2965_v10 = vsel %vm171_vm1, %v2583_v4, %v170_v9  ;;  %406 = vmatpush.bf16.msra.mxu1 %v2098_v53  ;;  %v2457_v4 = vld [vmem:[%s3941_s3 + $0x34] sm:$0xf]  ;;  %vm476_vm9 = vcmask 1042432   ;;  %vm459_vm10 = vcmask 36864   ;;  %vm472_vm11 = vcmask 39936  }
  0x34   :  { %420 = vmatpush.bf16.msra.mxu2 %v2102_v54  ;;  %v2074_v9 = vor.u32 %v2457_v4, %v2071_v6  ;;  %vm685_vm12 = vcmask 523264   ;;  %vm687_vm13 = vcmask 785408   ;;  %vm958_vm14 = vcmask 1044480  }
  0x36   :  { %393 = vmatpush.bf16.msra.mxu0 %v2082_v58 }
  0x37   :  { %407 = vmatpush.bf16.msra.mxu1 %v2086_v62  ;;  %v255_v62 = vperm.slane %v253_v61, 0 }
  0x38   :  { %421 = vmatpush.bf16.msra.mxu2 %v2090_v63  ;;  %v256_v63 = vperm.slane %v253_v61, 1 }
  0x3a   :  { %394 = vmatpush.bf16.msra.mxu0 %v2070_v5 }
  0x3b   :  { %408 = vmatpush.bf16.msra.mxu1 %v2074_v9 }
  0x97   :  { %v165_v8 = vpop.xlane.xlu0 %164 }
  0x98   :  { %v174_v13 = vmul.f32 %v2965_v10, %v165_v8  ;;  %v2459_v8 = vld [vmem:[%s3941_s3 + $0x40] sm:$0xf0] }
  0x9a   :  { %v2975_v16 = vsub.f32 %v2955_v0, %v174_v13  ;;  %v2455_v13 = vld [vmem:[%s3941_s3 + $0x20] sm:$0xf0] }
  0x9c   :  { %v178_v17 = vmul.f32 %v2975_v16, %v2975_v16 }
  0x9e   :  { %v181_v18 = vsel %vm162_vm0, %v178_v17, 0.0 }
  0x9f   :  { %v161_v11 = vpop.xlane.xlu0 %160 }
  0xa0   :  { %v173_v12 = vmul.f32 %v2965_v10, %v161_v11  ;;  %v2078_v11 = vor.u32 %v2459_v8, %v2077_v7 }
  0xa2   :  { %v2970_v14 = vsub.f32 %v2962_v2, %v173_v12  ;;  %422 = vmatpush.bf16.msra.mxu2 %v2078_v11  ;;  %v2057_v12 = vld [vmem:[%s3941_s3 + $0x18] sm:$0xf]  ;;  %v2853_v11 = vmov 65535  }
  0xa3   :  { %v2058_v17 = vor.u32 %v2455_v13, %v2057_v12  ;;  %v477_v12 = vsel %vm162_vm0, 4294967295, %v2853_v11 }
  0xa4   :  { %v177_v15 = vmul.f32 %v2970_v14, %v2970_v14 }
  0xa5   :  { %395 = vmatpush.bf16.msra.mxu0 %v2058_v17 }
  0xa6   :  { %179 = vadd.xlane.f32.xlu1 %v177_v15  ;;  %v2454_v15 = vld [vmem:[%s3941_s3 + $0x1c] sm:$0xf]  ;;  %423 = vmatpush.bf16.msra.mxu2 %v2066_v22 }
  0xa9   :  { %396 = vmatpush.bf16.msra.mxu0 %v2046_v27 }
  0xaa   :  { %424 = vmatpush.bf16.msra.mxu2 %v2054_v33 }
  0xae   :  { %182 = vadd.xlane.f32.xlu1 %v181_v18  ;;  %v2059_v18 = vld [vmem:[%s3941_s3 + $0x24] sm:$0xf0]  ;;  %s2854_s3 = smov 96  }
  0xaf   :  { %v2062_v21 = vor.u32 %v2454_v15, %v2059_v18 }
  0xb1   :  { %409 = vmatpush.bf16.msra.mxu1 %v2062_v21  ;;  %v3132_v21 = vsel %vm476_vm9, %v477_v12, 0 }
  0xb5   :  { %410 = vmatpush.bf16.msra.mxu1 %v2050_v32 }
 0x119   :  { %v180_v26 = vpop.xlane.xlu1 %179 }
 0x11a   :  { %v184_v31 = vmul.f32 %v180_v26, %v2965_v10 }
 0x11c   :  { %v186_v34 = vadd.f32 1e-06, %v184_v31 }
 0x11e   :  { %2584 = vrsqrt.f32 %v186_v34  ;;  %vm194_vm3 = vweird.f32 %v186_v34 }
 0x121   :  { %v183_v35 = vpop.xlane.xlu1 %182 }
 0x122   :  { %v185_v36 = vmul.f32 %v183_v35, %v2965_v10 }
 0x124   :  { %v2585_v37 = vpop.eup %2584  ;;  %v187_v38 = vadd.f32 1e-06, %v185_v36 }
 0x125   :  { %v189_v39 = vmul.f32 %v2585_v37, %v186_v34  ;;  %vm195_vm2 = vweird.f32 %v2585_v37 }
 0x126   :  { %2586 = vrsqrt.f32 %v187_v38  ;;  %vm196_vm4 = vmor %vm194_vm3, %vm195_vm2  ;;  %vm204_vm6 = vweird.f32 %v187_v38 }
 0x127   :  { %v190_v40 = vmul.f32 %v2585_v37, %v189_v39 }
 0x129   :  { %v191_v41 = vmul.f32 0.5, %v190_v40 }
 0x12b   :  { %v192_v42 = vsub.f32 1.5, %v191_v41 }
 0x12c   :  { %v2587_v43 = vpop.eup %2586 }
 0x12d   :  { %v193_v44 = vmul.f32 %v2585_v37, %v192_v42  ;;  %v199_v45 = vmul.f32 %v2587_v43, %v187_v38  ;;  %vm205_vm5 = vweird.f32 %v2587_v43 }
 0x12e   :  { %vm206_vm7 = vmor %vm204_vm6, %vm205_vm5 }
 0x12f   :  { %v200_v46 = vmul.f32 %v2587_v43, %v199_v45  ;;  %v197_v47 = vsel %vm196_vm4, %v2585_v37, %v193_v44 }
 0x130   :  { %v208_v50 = vmul.f32 %v197_v47, %v2970_v14 }
 0x131   :  { %v201_v48 = vmul.f32 0.5, %v200_v46 }
 0x132   :  { %v213_v55 = vmul.f32 %v2576_v51, %v208_v50 }
 0x133   :  { %v202_v49 = vsub.f32 1.5, %v201_v48 }
 0x134   :  { %v218_v58 = vadd.f32 %v2577_v56, %v213_v55 }
 0x135   :  { %v203_v52 = vmul.f32 %v2587_v43, %v202_v49 }
 0x137   :  { %v207_v53 = vsel %vm206_vm7, %v2587_v43, %v203_v52 }
 0x138   :  { %v209_v54 = vmul.f32 %v207_v53, %v2975_v16  ;;  %v257_v16 = vperm.slane %v253_v61, 2 }
 0x13a   :  { %v214_v57 = vmul.f32 %v2576_v51, %v209_v54 }
 0x13c   :  { %v219_v59 = vadd.f32 %v2577_v56, %v214_v57 }
 0x13e   :  { %v220_v60 = vpack.c.bf16 %v219_v59, %v218_v58 }
 0x140   :  { %397 = vmatmul.bf16.vlgmr.msra.gmra.mxu0 %v220_v60  ;;  %411 = vmatmul.bf16.vlgmr.msra.gmra.mxu1 %v220_v60 }
 0x141   :  { %425 = vmatmul.bf16.vlgmr.msra.gmra.mxu2 %v220_v60 }
 0x1bd   :  { %v398_v14 = vpop.f32.mrf.mxu0  ;;  %v412_v1 = vpop.f32.mrf.mxu1 }
 0x1be   :  { %v399_v3 = vadd.f32 %v398_v14, %v255_v62  ;;  %v413_v4 = vadd.f32 %v412_v1, %v256_v63 }
 0x1c0   :  { %v431_v5 = vmul.f32 0.17677669, %v399_v3  ;;  %v435_v6 = vpack.c.bf16 %v413_v4, %v413_v4 }
 0x1c2   :  { %v433_v7 = vpack.c.bf16 %v431_v5, %v431_v5  ;;  %v501_v8 = vunpack.c.l.b16 %v435_v6  ;;  %v444_v9 = vsel %vm439_vm8, %v435_v6, 0 }
 0x1c3   :  { %453 = vmatpush.bf16.xpose.msra.mxu3 %v444_v9 }
 0x1c4   :  { %v496_v13 = vunpack.c.l.b16 %v433_v7  ;;  %v426_v15 = vpop.f32.mrf.mxu2  ;;  %v3130_v17 = vpack.c.b16 %v501_v8, %v501_v8 }
 0x1c5   :  { %v427_v18 = vadd.f32 %v426_v15, %v257_v16  ;;  %v400_v19 = vpop.f32.mrf.mxu0  ;;  %v414_v20 = vpop.f32.mrf.mxu1 }
 0x1c6   :  { %v401_v22 = vadd.f32 %v400_v19, %v255_v62  ;;  %v415_v23 = vadd.f32 %v414_v20, %v256_v63  ;;  %503 = vrot.lane.b32.xlu0 %v3130_v17, %s2854_s3  ;;  %v3136_v24 = vpack.c.b16 %v496_v13, %v496_v13 }
 0x1c7   :  { %v437_v25 = vpack.c.bf16 %v427_v18, %v427_v18 }
 0x1c8   :  { %v432_v26 = vmul.f32 0.17677669, %v401_v22  ;;  %v436_v27 = vpack.c.bf16 %v415_v23, %v415_v23  ;;  %498 = vrot.lane.b32.xlu1 %v3136_v24, %s2854_s3 }
 0x1c9   :  { %v480_v28 = vand.u32 %v3132_v21, %v437_v25  ;;  %v3146_v41 = vunpack.c.l.b16 %v437_v25 }
 0x1ca   :  { %v434_v29 = vpack.c.bf16 %v432_v26, %v432_v26  ;;  %v701_v30 = vunpack.c.l.b16 %v436_v27  ;;  %2139 = vmatmul.msk.bf16.vlgmr.msra.gmra.mxu3 %vm439_vm8, %v433_v7 }
 0x1cb   :  { %489 = vmatpush.bf16.msrb.mxu3 %v480_v28 }
 0x1cc   :  { %v690_v31 = vunpack.c.l.b16 %v434_v29  ;;  %v702_v32 = vpack.c.b16 %v701_v30, %v501_v8  ;;  %v428_v33 = vpop.f32.mrf.mxu2 }
 0x1cd   :  { %v429_v34 = vadd.f32 %v428_v33, %v257_v16 }
 0x1ce   :  { %v691_v35 = vpack.c.b16 %v690_v31, %v496_v13  ;;  %v704_v36 = vshrl.u32 %v702_v32, 16  ;;  %v707_v37 = vshll.u32 %v702_v32, 16  ;;  %618 = vrot.lane.b32.xlu0 %v3130_v17, %s2855_s8 }
 0x1cf   :  { %v438_v38 = vpack.c.bf16 %v429_v34, %v429_v34 }
 0x1d0   :  { %v706_v39 = vrot.slane %v704_v36, 2  ;;  %v709_v40 = vrot.slane %v707_v37, 3  ;;  %616 = vrot.lane.b32.xlu1 %v3136_v24, %s2855_s8  ;;  %v693_v43 = vshrl.u32 %v691_v35, 16  ;;  %v696_v44 = vshll.u32 %v691_v35, 16 }
 0x1d1   :  { %v743_v42 = vunpack.c.l.b16 %v438_v38 }
 0x1d2   :  { %v710_v45 = vor.u32 %v709_v40, %v706_v39  ;;  %v695_v48 = vrot.slane %v693_v43, 2  ;;  %v698_v49 = vrot.slane %v696_v44, 3 }
 0x1d3   :  { %v3149_v46 = vpack.c.b16 %v743_v42, %v3146_v41  ;;  %v538_v42 = vpack.c.b16 %v3146_v41, %v3146_v41 }
 0x1d4   :  { %v715_v47 = vsel %vm439_vm8, %v710_v45, 0  ;;  %v699_v50 = vor.u32 %v698_v49, %v695_v48 }
 0x1d5   :  { %724 = vmatpush.bf16.xpose.msrb.mxu1 %v715_v47 }
 0x1d6   :  { %774 = vrot.lane.b32.xlu0 %v710_v45, %s2854_s3 }
 0x1d8   :  { %830 = vrot.lane.b32.xlu1 %v710_v45, %s2844_s18 }
 0x1dc   :  { %2147 = vmatmul.msk.bf16.vlgmr.msrb.gmra.mxu1 %vm439_vm8, %v699_v50 }
 0x1de   :  { %886 = vrot.lane.b32.xlu0 %v710_v45, %s2855_s8 }
 0x1e0   :  { %884 = vrot.lane.b32.xlu1 %v699_v50, %s2855_s8 }
 0x238   :  { %v504_v51 = vpop.permute.xlu0 %503 }
 0x239   :  { %v509_v52 = vsel %vm439_vm8, %v504_v51, 0 }
 0x23a   :  { %v499_v53 = vpop.permute.xlu1 %498  ;;  %518 = vmatpush.bf16.xpose.msra.mxu3 %v509_v52  ;;  %v746_v52 = vshrl.u32 %v3149_v46, 16 }
 0x240   :  { %v619_v11 = vpop.permute.xlu0 %618 }
 0x241   :  { %v624_v13 = vsel %vm439_vm8, %v619_v11, 0 }
 0x242   :  { %v617_v54 = vpop.permute.xlu1 %616 }
 0x248   :  { %v775_v18 = vpop.permute.xlu0 %774 }
 0x249   :  { %v780_v19 = vsel %vm439_vm8, %v775_v18, 0 }
 0x24a   :  { %v831_v55 = vpop.permute.xlu1 %830 }
 0x24b   :  { %v836_v56 = vsel %vm439_vm8, %v831_v55, 0  ;;  %v748_v55 = vrot.slane %v746_v52, 2 }
 0x24c   :  { %845 = vmatpush.bf16.xpose.msra.mxu1 %v836_v56 }
 0x24d   :  { %v455_v57 = vpop.f32.mrf.mxu3 }
 0x24e   :  { %v460_v58 = vsel %vm459_vm10, %v455_v57, -inf }
 0x24f   :  { %461 = vmax.xlane.f32.xlu2 %v460_v58 }
 0x250   :  { %v887_v20 = vpop.permute.xlu0 %886 }
 0x251   :  { %v892_v22 = vsel %vm439_vm8, %v887_v20, 0 }
 0x252   :  { %v885_v23 = vpop.permute.xlu1 %884 }
 0x255   :  { %v457_v59 = vpop.f32.mrf.mxu3 }
 0x259   :  { %v3160_v60 = vpop.f32.mrf.mxu1 }
 0x25a   :  { %v730_v61 = vsel %vm459_vm10, %v3160_v60, -inf }
 0x25b   :  { %731 = vmax.xlane.f32.xlu0 %v730_v61 }
 0x261   :  { %v728_v62 = vpop.f32.mrf.mxu1 }
 0x267   :  { %562 = vrot.lane.b32.xlu2 %v3130_v17, %s2844_s18 }
 0x2c2   :  { %v462_v63 = vpop.xlane.xlu2 %461 }
 0x2c3   :  { %v463_v14 = vsub.f32 %v455_v57, %v462_v63 }
 0x2c5   :  { %v464_v1 = vmul.f32 1.442695, %v463_v14 }
 0x2c7   :  { %2588 = vpow2.f32 %v464_v1 }
 0x2ca   :  { %v563_v3 = vpop.permute.xlu2 %562 }
 0x2cb   :  { %v568_v4 = vsel %vm439_vm8, %v563_v3, 0 }
 0x2cc   :  { %577 = vmatpush.bf16.xpose.msrb.mxu2 %v568_v4 }
 0x2cd   :  { %v2589_v5 = vpop.eup %2588 }
 0x2ce   :  { %v466_v6 = vsel %vm459_vm10, %v2589_v5, 0.0  ;;  %v732_v45 = vpop.xlane.xlu0 %731 }
 0x2cf   :  { %467 = vadd.xlane.f32.xlu2 %v466_v6  ;;  %v733_v47 = vsub.f32 %v3160_v60, %v732_v45 }
 0x2d1   :  { %v734_v48 = vmul.f32 1.442695, %v733_v47 }
 0x2e7   :  { %560 = vrot.lane.b32.xlu2 %v3136_v24, %s2844_s18 }
 0x2ef   :  { %772 = vrot.lane.b32.xlu2 %v699_v50, %s2854_s3 }
 0x2f7   :  { %828 = vrot.lane.b32.xlu2 %v699_v50, %s2844_s18 }
 0x342   :  { %v468_v16 = vpop.xlane.xlu2 %467 }
 0x343   :  { %2590 = vrcp.f32 %v468_v16 }
 0x344   :  { %2592 = vpow2.f32 %v734_v48 }
 0x349   :  { %v2591_v7 = vpop.eup %2590 }
 0x34a   :  { %v470_v8 = vmul.f32 %v2591_v7, %v2589_v5  ;;  %v561_v9 = vpop.permute.xlu2 %560  ;;  %v3199_v49 = vpop.eup %2592 }
 0x34b   :  { %2143 = vmatmul.msk.bf16.vlgmr.msrb.gmra.mxu2 %vm439_vm8, %v561_v9  ;;  %v736_v50 = vsel %vm459_vm10, %v3199_v49, 0.0 }
 0x34c   :  { %v471_v12 = vpack.c.bf16 %v470_v8, %v470_v8 }
 0x34e   :  { %2140 = vmatmul.msk.bf16.vlgmr.msrb.gmra.mxu3 %vm472_vm11, %v471_v12 }
 0x34f   :  { %633 = vmatpush.bf16.xpose.msrb.mxu3 %v624_v13 }
 0x352   :  { %v773_v15 = vpop.permute.xlu2 %772 }
 0x35a   :  { %v829_v17 = vpop.permute.xlu2 %828 }
 0x35b   :  { %2151 = vmatmul.msk.bf16.vlgmr.msra.gmra.mxu1 %vm439_vm8, %v829_v17 }
 0x35e   :  { %2141 = vmatmul.msk.bf16.vlgmr.msra.gmra.mxu3 %vm439_vm8, %v499_v53  ;;  %v749_v53 = vshll.u32 %v3149_v46, 16 }
 0x35f   :  { %789 = vmatpush.bf16.xpose.msra.mxu3 %v780_v19 }
 0x360   :  { %v751_v56 = vrot.slane %v749_v53, 3 }
 0x362   :  { %v3205_v57 = vor.u32 %v751_v56, %v748_v55 }
 0x364   :  { %v757_v9 = vand.u32 %v3205_v57, %v3132_v21 }
 0x36e   :  { %2145 = vmatmul.msk.bf16.vlgmr.msrb.gmra.mxu3 %vm439_vm8, %v617_v54 }
 0x36f   :  { %901 = vmatpush.bf16.xpose.msrb.mxu3 %v892_v22 }
 0x37e   :  { %2149 = vmatmul.msk.bf16.vlgmr.msra.gmra.mxu3 %vm439_vm8, %v773_v15 }
 0x38e   :  { %2153 = vmatmul.msk.bf16.vlgmr.msrb.gmra.mxu3 %vm439_vm8, %v885_v23 }
 0x3ce   :  { %v579_v24 = vpop.f32.mrf.mxu2 }
 0x3cf   :  { %v583_v25 = vsel %vm459_vm10, %v579_v24, -inf }
 0x3d0   :  { %584 = vmax.xlane.f32.xlu2 %v583_v25 }
 0x3d1   :  { %v3183_v26 = vpop.f32.mrf.mxu3 }
 0x3d6   :  { %v581_v27 = vpop.f32.mrf.mxu2 }
 0x3d8   :  { %v3185_v28 = vpop.f32.mrf.mxu1 }
 0x3d9   :  { %v493_v29 = vpop.f32.mrf.mxu3  ;;  %v851_v30 = vsel %vm459_vm10, %v3185_v28, -inf }
 0x3da   :  { %852 = vmax.xlane.f32.xlu1 %v851_v30 }
 0x3e0   :  { %v849_v31 = vpop.f32.mrf.mxu1 }
 0x3e1   :  { %v520_v32 = vpop.f32.mrf.mxu3 }
 0x3e2   :  { %v524_v33 = vsel %vm459_vm10, %v520_v32, -inf }
 0x3e3   :  { %525 = vmax.xlane.f32.xlu0 %v524_v33 }
 0x3e9   :  { %v522_v34 = vpop.f32.mrf.mxu3 }
 0x3f1   :  { %v635_v35 = vpop.f32.mrf.mxu3 }
 0x3f2   :  { %v639_v36 = vsel %vm459_vm10, %v635_v35, -inf }
 0x3f3   :  { %640 = vmax.xlane.f32.xlu1 %v639_v36 }
 0x3f9   :  { %v637_v37 = vpop.f32.mrf.mxu3 }
 0x401   :  { %v791_v38 = vpop.f32.mrf.mxu3 }
 0x402   :  { %v795_v39 = vsel %vm459_vm10, %v791_v38, -inf }
 0x403   :  { %796 = vmax.xlane.f32.xlu2 %v795_v39 }
 0x409   :  { %v793_v40 = vpop.f32.mrf.mxu3 }
 0x40c   :  { %539 = vrot.lane.b32.xlu1 %v538_v42, %s2854_s3 }
 0x411   :  { %v3195_v43 = vpop.f32.mrf.mxu3 }
 0x412   :  { %v907_v17 = vsel %vm459_vm10, %v3195_v43, -inf }
 0x419   :  { %v905_v44 = vpop.f32.mrf.mxu3 }
 0x41b   :  { %595 = vrot.lane.b32.xlu2 %v538_v42, %s2844_s18 }
 0x436   :  { %737 = vadd.xlane.f32.xlu1 %v736_v50 }
 0x443   :  { %v585_v51 = vpop.xlane.xlu2 %584 }
 0x444   :  { %v586_v41 = vsub.f32 %v579_v24, %v585_v51 }
 0x446   :  { %v587_v54 = vmul.f32 1.442695, %v586_v41 }
 0x448   :  { %2594 = vpow2.f32 %v587_v54 }
 0x44d   :  { %v853_v14 = vpop.xlane.xlu1 %852 }
 0x44e   :  { %v2595_v58 = vpop.eup %2594  ;;  %v854_v20 = vsub.f32 %v3185_v28, %v853_v14 }
 0x44f   :  { %863 = vrot.lane.b32.xlu1 %v3205_v57, %s2844_s18  ;;  %v589_v59 = vsel %vm459_vm10, %v2595_v58, 0.0 }
 0x450   :  { %590 = vadd.xlane.f32.xlu0 %v589_v59  ;;  %v855_v24 = vmul.f32 1.442695, %v854_v20 }
 0x456   :  { %v526_v60 = vpop.xlane.xlu0 %525 }
 0x457   :  { %v527_v61 = vsub.f32 %v520_v32, %v526_v60 }
 0x459   :  { %v528_v62 = vmul.f32 1.442695, %v527_v61 }
 0x45b   :  { %2596 = vpow2.f32 %v528_v62 }
 0x461   :  { %v2597_v63 = vpop.eup %2596 }
 0x462   :  { %v530_v46 = vsel %vm459_vm10, %v2597_v63, 0.0 }
 0x463   :  { %531 = vadd.xlane.f32.xlu2 %v530_v46 }
 0x464   :  { %651 = vrot.lane.b32.xlu0 %v538_v42, %s2855_s8 }
 0x466   :  { %v641_v1 = vpop.xlane.xlu1 %640 }
 0x467   :  { %v642_v13 = vsub.f32 %v635_v35, %v641_v1 }
 0x469   :  { %v643_v15 = vmul.f32 1.442695, %v642_v13 }
 0x476   :  { %v797_v3 = vpop.xlane.xlu2 %796 }
 0x477   :  { %v798_v4 = vsub.f32 %v791_v38, %v797_v3 }
 0x479   :  { %v799_v5 = vmul.f32 1.442695, %v798_v4 }
 0x47b   :  { %2598 = vpow2.f32 %v799_v5 }
 0x47c   :  { %2600 = vpow2.f32 %v643_v15 }
 0x47e   :  { %v540_v6 = vpop.permute.xlu1 %539  ;;  %v596_v16 = vpop.permute.xlu2 %595 }
 0x47f   :  { %v545_v7 = vand.u32 %v540_v6, %v3132_v21  ;;  %v601_v8 = vand.u32 %v596_v16, %v3132_v21 }
 0x481   :  { %v3216_v11 = vpop.eup %2598  ;;  %554 = vmatpush.bf16.msrb.mxu0 %v545_v7  ;;  %610 = vmatpush.bf16.msra.mxu2 %v601_v8 }
 0x482   :  { %v801_v12 = vsel %vm459_vm10, %v3216_v11, 0.0  ;;  %v2601_v18 = vpop.eup %2600 }
 0x483   :  { %802 = vadd.xlane.f32.xlu2 %v801_v12  ;;  %v645_v19 = vsel %vm459_vm10, %v2601_v18, 0.0 }
 0x485   :  { %766 = vmatpush.bf16.msrb.mxu2 %v757_v9 }
 0x48e   :  { %908 = vmax.xlane.f32.xlu0 %v907_v17 }
 0x496   :  { %646 = vadd.xlane.f32.xlu0 %v645_v19 }
 0x4a9   :  { %v738_v22 = vpop.xlane.xlu1 %737 }
 0x4aa   :  { %807 = vrot.lane.b32.xlu0 %v3205_v57, %s2854_s3 }
 0x4c1   :  { %v864_v27 = vpop.permute.xlu1 %863 }
 0x4c2   :  { %v869_v31 = vand.u32 %v864_v27, %v3132_v21  ;;  %v2479_v27 = vld [vmem:[#allocation7 + $0x20] sm:$0xff] }
 0x4c3   :  { %v591_v23 = vpop.xlane.xlu0 %590 }
 0x4c4   :  { %2602 = vrcp.f32 %v591_v23  ;;  %v2482_v23 = vld [vmem:[#allocation7 + $0x38] sm:$0xff] }
 0x4c5   :  { %2604 = vpow2.f32 %v855_v24  ;;  %1029 = vmatpush.bf16.msrb.mxu1 %v2482_v23  ;;  %v2481_v24 = vld [vmem:[#allocation7 + $0x30] sm:$0xff] }
 0x4c6   :  { %2606 = vrcp.f32 %v738_v22 }
 0x4c9   :  { %1030 = vmatpush.bf16.msrb.mxu1 %v2481_v24  ;;  %v2508_v24 = vld [vmem:[%s3947_s9 + $0xcc] sm:$0xf] }
 0x4ca   :  { %v2603_v25 = vpop.eup %2602 }
 0x4cb   :  { %v593_v29 = vmul.f32 %v2603_v25, %v2595_v58  ;;  %v2605_v32 = vpop.eup %2604  ;;  %v2480_v25 = vld [vmem:[#allocation7 + $0x28] sm:$0xff] }
 0x4cc   :  { %v857_v33 = vsel %vm459_vm10, %v2605_v32, 0.0  ;;  %v2607_v28 = vpop.eup %2606 }
 0x4cd   :  { %v594_v30 = vpack.c.bf16 %v593_v29, %v593_v29  ;;  %v740_v37 = vmul.f32 %v2607_v28, %v3199_v49  ;;  %1031 = vmatpush.bf16.msrb.mxu1 %v2480_v25  ;;  %v2478_v29 = vld [vmem:[#allocation7 + $0x18] sm:$0xff]  ;;  %v2295_v25 = vld [vmem:[%s3947_s9 + $0xd8] sm:$0xf0] }
 0x4cf   :  { %2144 = vmatmul.msk.bf16.vlgmr.msra.gmra.mxu2 %vm472_vm11, %v594_v30  ;;  %v741_v39 = vpack.c.bf16 %v740_v37, %v740_v37  ;;  %v2477_v30 = vld [vmem:[#allocation7 + $0x10] sm:$0xff] }
 0x4d0   :  { %878 = vmatpush.bf16.msra.mxu2 %v869_v31  ;;  %v2476_v31 = vld [vmem:[#allocation7 + $0x8] sm:$0xff] }
 0x4d1   :  { %1032 = vmatpush.bf16.msrb.mxu1 %v2479_v27  ;;  %v2298_v27 = vor.u32 %v2508_v24, %v2295_v25  ;;  %v2490_v24 = vld [vmem:[%s3947_s9 + $0x34] sm:$0xf0] }
 0x4d4   :  { %858 = vadd.xlane.f32.xlu0 %v857_v33 }
 0x4d5   :  { %1033 = vmatpush.bf16.msrb.mxu1 %v2478_v29  ;;  %v2269_v29 = vld [vmem:[%s3947_s9 + $0xa0] sm:$0xf] }
 0x4d6   :  { %v652_v34 = vpop.permute.xlu0 %651  ;;  %v532_v35 = vpop.xlane.xlu2 %531 }
 0x4d7   :  { %v657_v36 = vand.u32 %v652_v34, %v3132_v21  ;;  %2608 = vrcp.f32 %v532_v35 }
 0x4d9   :  { %666 = vmatpush.bf16.msra.mxu0 %v657_v36  ;;  %1034 = vmatpush.bf16.msrb.mxu1 %v2477_v30  ;;  %v2505_v30 = vld [vmem:[%s3947_s9 + $0xac] sm:$0xf0] }
 0x4dd   :  { %v2609_v38 = vpop.eup %2608  ;;  %1035 = vmatpush.bf16.msrb.mxu1 %v2476_v31  ;;  %v2503_v31 = vld [vmem:[%s3947_s9 + $0xa4] sm:$0xf] }
 0x4de   :  { %v534_v40 = vmul.f32 %v2609_v38, %v2597_v63 }
 0x4df   :  { %2148 = vmatmul.msk.bf16.vlgmr.msrb.gmra.mxu2 %vm472_vm11, %v741_v39 }
 0x4e0   :  { %v535_v42 = vpack.c.bf16 %v534_v40, %v534_v40 }
 0x4e2   :  { %2142 = vmatmul.msk.bf16.vlgmr.msrb.gmra.mxu0 %vm472_vm11, %v535_v42 }
 0x4f6   :  { %v803_v52 = vpop.xlane.xlu2 %802 }
 0x501   :  { %v909_v44 = vpop.xlane.xlu0 %908 }
 0x502   :  { %v910_v45 = vsub.f32 %v3195_v43, %v909_v44 }
 0x504   :  { %v911_v47 = vmul.f32 1.442695, %v910_v45 }
 0x506   :  { %2610 = vpow2.f32 %v911_v47 }
 0x509   :  { %v647_v48 = vpop.xlane.xlu0 %646 }
 0x50a   :  { %2612 = vrcp.f32 %v647_v48 }
 0x50b   :  { %2614 = vrcp.f32 %v803_v52  ;;  %v2578_v52 = vld [vmem:[#allocation9] ss:$0 sm:$0xff] }
 0x50c   :  { %v2611_v50 = vpop.eup %2610 }
 0x50d   :  { %v913_v51 = vsel %vm459_vm10, %v2611_v50, 0.0 }
 0x50e   :  { %914 = vadd.xlane.f32.xlu2 %v913_v51 }
 0x510   :  { %v2613_v49 = vpop.eup %2612 }
 0x511   :  { %v649_v41 = vmul.f32 %v2613_v49, %v2601_v18  ;;  %v2615_v54 = vpop.eup %2614 }
 0x512   :  { %v805_v43 = vmul.f32 %v2615_v54, %v3216_v11 }
 0x513   :  { %v650_v53 = vpack.c.bf16 %v649_v41, %v649_v41 }
 0x514   :  { %v806_v58 = vpack.c.bf16 %v805_v43, %v805_v43 }
 0x515   :  { %2146 = vmatmul.msk.bf16.vlgmr.msra.gmra.mxu0 %vm472_vm11, %v650_v53 }
 0x51c   :  { %v808_v55 = vpop.permute.xlu0 %807 }
 0x51d   :  { %v813_v56 = vand.u32 %v808_v55, %v3132_v21 }
 0x51f   :  { %822 = vmatpush.bf16.msrb.mxu0 %v813_v56 }
 0x525   :  { %2150 = vmatmul.msk.bf16.vlgmr.msrb.gmra.mxu0 %vm472_vm11, %v806_v58 }
 0x526   :  { %919 = vrot.lane.b32.xlu2 %v3205_v57, %s2855_s8 }
 0x547   :  { %v859_v59 = vpop.xlane.xlu0 %858 }
 0x548   :  { %2616 = vrcp.f32 %v859_v59 }
 0x54e   :  { %v2617_v60 = vpop.eup %2616 }
 0x54f   :  { %v861_v61 = vmul.f32 %v2617_v60, %v2605_v32  ;;  %v2475_v32 = vld [vmem:[#allocation7] sm:$0xff] }
 0x550   :  { %1036 = vmatpush.bf16.msrb.mxu1 %v2475_v32  ;;  %v2270_v32 = vor.u32 %v2505_v30, %v2269_v29  ;;  %v2488_v29 = vld [vmem:[%s3947_s9 + $0x2c] sm:$0xf]  ;;  %v2215_v30 = vld [vmem:[%s3947_s9 + $0x38] sm:$0xf0] }
 0x551   :  { %v862_v62 = vpack.c.bf16 %v861_v61, %v861_v61 }
 0x552   :  { %v612_v63 = vpop.f32.mrf.mxu2 }
 0x553   :  { %2152 = vmatmul.msk.bf16.vlgmr.msra.gmra.mxu2 %vm472_vm11, %v862_v62 }
 0x55a   :  { %v614_v46 = vpop.f32.mrf.mxu2 }
 0x55f   :  { %v556_v14 = vpop.f32.mrf.mxu0 }
 0x562   :  { %v768_v1 = vpop.f32.mrf.mxu2 }
 0x567   :  { %v558_v3 = vpop.f32.mrf.mxu0 }
 0x568   :  { %v2513_v3 = vld [vmem:[%s3947_s9 + $0xec] sm:$0xf0] }
 0x56a   :  { %v770_v4 = vpop.f32.mrf.mxu2 }
 0x56b   :  { %v2511_v4 = vld [vmem:[%s3947_s9 + $0xe4] sm:$0xf] }
 0x581   :  { %v915_v5 = vpop.xlane.xlu2 %914 }
 0x582   :  { %2618 = vrcp.f32 %v915_v5 }
 0x588   :  { %v2619_v6 = vpop.eup %2618 }
 0x589   :  { %v917_v16 = vmul.f32 %v2619_v6, %v2611_v50  ;;  %v920_v7 = vpop.permute.xlu2 %919  ;;  %v2303_v6 = vld [vmem:[%s3947_s9 + $0xf0] sm:$0xf0] }
 0x58a   :  { %v925_v57 = vand.u32 %v920_v7, %v3132_v21  ;;  %v2514_v7 = vld [vmem:[%s3947_s9 + $0xf4] sm:$0xf0] }
 0x58b   :  { %v918_v8 = vpack.c.bf16 %v917_v16, %v917_v16  ;;  %v2309_v16 = vld [vmem:[%s3947_s9 + $0xe8] sm:$0xf] }
 0x58c   :  { %934 = vmatpush.bf16.msra.mxu0 %v925_v57  ;;  %v2306_v57 = vor.u32 %v2511_v4, %v2303_v6  ;;  %v2493_v4 = vld [vmem:[%s3947_s9 + $0x4c] sm:$0xf0] }
 0x58e   :  { %1316 = vmatpush.bf16.msra.mxu3 %v2306_v57  ;;  %v2494_v57 = vld [vmem:[%s3947_s9 + $0x54] sm:$0xf0] }
 0x58f   :  { %2154 = vmatmul.msk.bf16.vlgmr.msra.gmra.mxu0 %vm472_vm11, %v918_v8  ;;  %v2310_v8 = vor.u32 %v2514_v7, %v2309_v16  ;;  %v2223_v16 = vld [vmem:[%s3947_s9 + $0x50] sm:$0xf0]  ;;  %v2229_v7 = vld [vmem:[%s3947_s9 + $0x48] sm:$0xf] }
 0x591   :  { %1330 = vmatpush.bf16.msrb.mxu0 %v2310_v8 }
 0x592   :  { %v668_v9 = vpop.f32.mrf.mxu0 }
 0x59a   :  { %v670_v11 = vpop.f32.mrf.mxu0 }
 0x59b   :  { %v2311_v11 = vld [vmem:[%s3947_s9 + $0xf8] sm:$0xf0] }
 0x5a2   :  { %v824_v12 = vpop.f32.mrf.mxu0 }
 0x5a3   :  { %v2561_v13 = vpack.i.bf16 %v556_v14, %v824_v12 }
 0x5a5   :  { %2562 = vrot.lane.b32.xlu0 %v2561_v13, %s2855_s8  ;;  %v2285_v13 = vld [vmem:[%s3947_s9 + $0xc0] sm:$0xf] }
 0x5aa   :  { %v826_v15 = vpop.f32.mrf.mxu0 }
 0x5ab   :  { %v2509_v15 = vld [vmem:[%s3947_s9 + $0xcc] sm:$0xf0] }
 0x5d6   :  { %v880_v17 = vpop.f32.mrf.mxu2 }
 0x5d7   :  { %v2566_v18 = vpack.i.bf16 %v612_v63, %v880_v17  ;;  %v2507_v17 = vld [vmem:[%s3947_s9 + $0xc4] sm:$0xf] }
 0x5d9   :  { %2567 = vrot.lane.b32.xlu1 %v2566_v18, %s2844_s18  ;;  %v2286_v18 = vor.u32 %v2509_v15, %v2285_v13 }
 0x5de   :  { %v882_v19 = vpop.f32.mrf.mxu2 }
 0x5df   :  { %v2287_v19 = vld [vmem:[%s3947_s9 + $0xd0] sm:$0xf0] }
 0x60c   :  { %v936_v20 = vpop.f32.mrf.mxu0 }
 0x60d   :  { %v2571_v22 = vpack.i.bf16 %v668_v9, %v936_v20  ;;  %v2512_v9 = vld [vmem:[%s3947_s9 + $0xec] sm:$0xf]  ;;  %v2293_v20 = vld [vmem:[%s3947_s9 + $0xc8] sm:$0xf] }
 0x60e   :  { %v2314_v12 = vor.u32 %v2512_v9, %v2311_v11  ;;  %v2230_v9 = vor.u32 %v2494_v57, %v2229_v7  ;;  %v2492_v11 = vld [vmem:[%s3947_s9 + $0x4c] sm:$0xf] }
 0x60f   :  { %2572 = vrot.lane.b32.xlu1 %v2571_v22, %s2854_s3  ;;  %v2510_v22 = vld [vmem:[%s3947_s9 + $0xd4] sm:$0xf0] }
 0x610   :  { %1344 = vmatpush.bf16.msra.mxu1 %v2314_v12  ;;  %v2294_v23 = vor.u32 %v2510_v22, %v2293_v20  ;;  %v2231_v12 = vld [vmem:[%s3947_s9 + $0x58] sm:$0xf0] }
 0x611   :  { %v2234_v13 = vor.u32 %v2492_v11, %v2231_v12 }
 0x612   :  { %1331 = vmatpush.bf16.msrb.mxu0 %v2294_v23  ;;  %v2213_v23 = vld [vmem:[%s3947_s9 + $0x28] sm:$0xf] }
 0x614   :  { %v938_v21 = vpop.f32.mrf.mxu0  ;;  %1345 = vmatpush.bf16.msra.mxu1 %v2298_v27  ;;  %v2214_v27 = vor.u32 %v2490_v24, %v2213_v23 }
 0x615   :  { %v2290_v21 = vor.u32 %v2507_v17, %v2287_v19  ;;  %v2205_v17 = vld [vmem:[%s3947_s9 + $0x20] sm:$0xf]  ;;  %v2487_v19 = vld [vmem:[%s3947_s9 + $0x24] sm:$0xf] }
 0x617   :  { %v2563_v28 = vpop.permute.xlu0 %2562  ;;  %1317 = vmatpush.bf16.msra.mxu3 %v2290_v21  ;;  %v2207_v21 = vld [vmem:[%s3947_s9 + $0x30] sm:$0xf0] }
 0x618   :  { %v2564_v34 = vunpack.i.l.bf16 %v2563_v28  ;;  %v2565_v36 = vunpack.i.h.bf16 %v2563_v28  ;;  %v2277_v28 = vld [vmem:[%s3947_s9 + $0xa8] sm:$0xf]  ;;  %v2210_v25 = vor.u32 %v2487_v19, %v2207_v21 }
 0x61a   :  { %v952_v39 = vsel %vm439_vm8, %v768_v1, %v2564_v34  ;;  %v684_v45 = vsel %vm439_vm8, %v3183_v26, %v2565_v36  ;;  %v2301_v1 = vld [vmem:[%s3947_s9 + $0xe0] sm:$0xf]  ;;  %v2506_v34 = vld [vmem:[%s3947_s9 + $0xb4] sm:$0xf0] }
 0x61b   :  { %v2302_v5 = vor.u32 %v2513_v3, %v2301_v1  ;;  %v2278_v36 = vor.u32 %v2506_v34, %v2277_v28  ;;  %v2221_v3 = vld [vmem:[%s3947_s9 + $0x40] sm:$0xf]  ;;  %v2485_v28 = vld [vmem:[%s3947_s9 + $0xc] sm:$0xf0]  ;;  %v2483_v34 = vld [vmem:[%s3947_s9 + $0x4] sm:$0xf] }
 0x61c   :  { %v2222_v6 = vor.u32 %v2493_v4, %v2221_v3  ;;  %v2580_v3 = vld [vmem:[#allocation12] ss:$0 sm:$0xff] }
 0x61d   :  { %1302 = vmatpush.bf16.msrb.mxu2 %v2302_v5  ;;  %1332 = vmatpush.bf16.msrb.mxu0 %v2278_v36  ;;  %v2491_v5 = vld [vmem:[%s3947_s9 + $0x44] sm:$0xf]  ;;  %v2191_v36 = vld [vmem:[%s3947_s9 + $0x10] sm:$0xf0] }
 0x61e   :  { %v2226_v8 = vor.u32 %v2491_v5, %v2223_v16 }
 0x621   :  { %1303 = vmatpush.bf16.msrb.mxu2 %v2286_v18  ;;  %v2489_v18 = vld [vmem:[%s3947_s9 + $0x2c] sm:$0xf0] }
 0x622   :  { %v2206_v22 = vor.u32 %v2489_v18, %v2205_v17 }
 0x625   :  { %1304 = vmatpush.bf16.msrb.mxu2 %v2270_v32 }
 0x64b   :  { %v2568_v33 = vpop.permute.xlu1 %2567 }
 0x64c   :  { %v2569_v35 = vunpack.i.l.bf16 %v2568_v33  ;;  %v2570_v37 = vunpack.i.h.bf16 %v2568_v33  ;;  %v2271_v33 = vld [vmem:[%s3947_s9 + $0xb0] sm:$0xf0] }
 0x64e   :  { %v953_v44 = vsel %vm685_vm12, %v952_v39, %v2569_v35  ;;  %v686_v48 = vsel %vm685_vm12, %v684_v45, %v2570_v37  ;;  %v2274_v35 = vor.u32 %v2503_v31, %v2271_v33  ;;  %v2504_v37 = vld [vmem:[%s3947_s9 + $0xac] sm:$0xf]  ;;  %v2189_v31 = vld [vmem:[%s3947_s9] sm:$0xf]  ;;  %v2218_v33 = vor.u32 %v2488_v29, %v2215_v30 }
 0x650   :  { %1318 = vmatpush.bf16.msra.mxu3 %v2274_v35  ;;  %v2190_v35 = vor.u32 %v2485_v28, %v2189_v31 }
 0x681   :  { %v2573_v38 = vpop.permute.xlu1 %2572 }
 0x682   :  { %v2575_v40 = vunpack.i.h.bf16 %v2573_v38  ;;  %v2574_v42 = vunpack.i.l.bf16 %v2573_v38  ;;  %v2279_v38 = vld [vmem:[%s3947_s9 + $0xb8] sm:$0xf0] }
 0x683   :  { %v2282_v39 = vor.u32 %v2504_v37, %v2279_v38  ;;  %v2197_v37 = vld [vmem:[%s3947_s9 + $0x8] sm:$0xf]  ;;  %v2486_v38 = vld [vmem:[%s3947_s9 + $0x14] sm:$0xf0] }
 0x684   :  { %v954_v47 = vsel %vm687_vm13, %v953_v44, %v2574_v42  ;;  %v688_v51 = vsel %vm687_vm13, %v686_v48, %v2575_v40  ;;  %v2253_v40 = vld [vmem:[%s3947_s9 + $0x80] sm:$0xf]  ;;  %v2501_v42 = vld [vmem:[%s3947_s9 + $0x8c] sm:$0xf0]  ;;  %v2499_v44 = vld [vmem:[%s3947_s9 + $0x84] sm:$0xf] }
 0x685   :  { %v956_v50 = vrot.slane %v954_v47, 3  ;;  %1346 = vmatpush.bf16.msra.mxu1 %v2282_v39  ;;  %v2254_v45 = vor.u32 %v2501_v42, %v2253_v40  ;;  %v2255_v47 = vld [vmem:[%s3947_s9 + $0x90] sm:$0xf0]  ;;  %v2261_v48 = vld [vmem:[%s3947_s9 + $0x88] sm:$0xf]  ;;  %v2194_v39 = vor.u32 %v2483_v34, %v2191_v36  ;;  %v2198_v40 = vor.u32 %v2486_v38, %v2197_v37 }
 0x686   :  { %v2484_v42 = vld [vmem:[%s3947_s9 + $0xc] sm:$0xf] }
 0x687   :  { %v959_v49 = vsel %vm958_vm14, %v688_v51, %v956_v50  ;;  %v2258_v51 = vor.u32 %v2499_v44, %v2255_v47  ;;  %1305 = vmatpush.bf16.msrb.mxu2 %v2254_v45  ;;  %v2199_v44 = vld [vmem:[%s3947_s9 + $0x18] sm:$0xf0] }
 0x688   :  { %v960_v41 = vpack.c.bf16 %v956_v50, %v959_v49  ;;  %v2502_v50 = vld [vmem:[%s3947_s9 + $0x94] sm:$0xf0]  ;;  %v2202_v45 = vor.u32 %v2484_v42, %v2199_v44 }
 0x689   :  { %v2262_v49 = vor.u32 %v2502_v50, %v2261_v48  ;;  %1319 = vmatpush.bf16.msra.mxu3 %v2258_v51 }
 0x68a   :  { %1037 = vmatmul.bf16.vlgmr.msrb.gmra.mxu1 %v960_v41  ;;  %v2500_v41 = vld [vmem:[%s3947_s9 + $0x8c] sm:$0xf] }
 0x68b   :  { %1333 = vmatpush.bf16.msrb.mxu0 %v2262_v49 }
 0x707   :  { %v1038_v53 = vpop.f32.mrf.mxu1 }
 0x708   :  { %v1039_v54 = vadd.f32 %v2578_v52, %v1038_v53 }
 0x70a   :  { %v3251_v55 = vadd.f32 %v1039_v54, %v2962_v2  ;;  %v2237_v54 = vld [vmem:[%s3947_s9 + $0x60] sm:$0xf] }
 0x70c   :  { %1047 = vadd.xlane.f32.xlu1 %v3251_v55 }
 0x70f   :  { %v1040_v56 = vpop.f32.mrf.mxu1 }
 0x710   :  { %v1041_v43 = vadd.f32 %v2578_v52, %v1040_v56  ;;  %v2263_v52 = vld [vmem:[%s3947_s9 + $0x98] sm:$0xf0]  ;;  %v2497_v56 = vld [vmem:[%s3947_s9 + $0x6c] sm:$0xf0] }
 0x711   :  { %v2266_v53 = vor.u32 %v2500_v41, %v2263_v52 }
 0x712   :  { %v3255_v26 = vadd.f32 %v1041_v43, %v2955_v0  ;;  %v2495_v43 = vld [vmem:[%s3947_s9 + $0x64] sm:$0xf] }
 0x713   :  { %1347 = vmatpush.bf16.msra.mxu1 %v2266_v53 }
 0x714   :  { %v1049_v58 = vsel %vm162_vm0, %v3255_v26, 0.0 }
 0x715   :  { %1050 = vadd.xlane.f32.xlu2 %v1049_v58  ;;  %v2238_v58 = vor.u32 %v2497_v56, %v2237_v54 }
 0x717   :  { %1306 = vmatpush.bf16.msrb.mxu2 %v2238_v58 }
 0x71b   :  { %1307 = vmatpush.bf16.msrb.mxu2 %v2222_v6 }
 0x71f   :  { %1308 = vmatpush.bf16.msrb.mxu2 %v2206_v22 }
 0x723   :  { %1309 = vmatpush.bf16.msrb.mxu2 %v2190_v35 }
 0x77f   :  { %v1048_v59 = vpop.xlane.xlu1 %1047 }
 0x780   :  { %v1052_v60 = vmul.f32 %v1048_v59, %v2965_v10  ;;  %v2239_v59 = vld [vmem:[%s3947_s9 + $0x70] sm:$0xf0] }
 0x782   :  { %v3261_v61 = vsub.f32 %v3251_v55, %v1052_v60  ;;  %v2245_v60 = vld [vmem:[%s3947_s9 + $0x68] sm:$0xf] }
 0x784   :  { %v1056_v2 = vmul.f32 %v3261_v61, %v3261_v61 }
 0x786   :  { %1058 = vadd.xlane.f32.xlu0 %v1056_v2  ;;  %v2498_v2 = vld [vmem:[%s3947_s9 + $0x74] sm:$0xf0] }
 0x788   :  { %v1051_v62 = vpop.xlane.xlu2 %1050 }
 0x789   :  { %v1053_v63 = vmul.f32 %v1051_v62, %v2965_v10  ;;  %v2242_v62 = vor.u32 %v2495_v43, %v2239_v59 }
 0x78b   :  { %v3267_v0 = vsub.f32 %v3255_v26, %v1053_v63  ;;  %v2246_v63 = vor.u32 %v2498_v2, %v2245_v60  ;;  %1320 = vmatpush.bf16.msra.mxu3 %v2242_v62 }
 0x78d   :  { %v1057_v46 = vmul.f32 %v3267_v0, %v3267_v0  ;;  %1334 = vmatpush.bf16.msrb.mxu0 %v2246_v63 }
 0x78f   :  { %v1060_v14 = vsel %vm162_vm0, %v1057_v46, 0.0  ;;  %v2496_v46 = vld [vmem:[%s3947_s9 + $0x6c] sm:$0xf]  ;;  %1321 = vmatpush.bf16.msra.mxu3 %v2226_v8 }
 0x790   :  { %1061 = vadd.xlane.f32.xlu2 %v1060_v14  ;;  %v2247_v14 = vld [vmem:[%s3947_s9 + $0x78] sm:$0xf0] }
 0x791   :  { %v2250_v1 = vor.u32 %v2496_v46, %v2247_v14  ;;  %1335 = vmatpush.bf16.msrb.mxu0 %v2230_v9 }
 0x793   :  { %1348 = vmatpush.bf16.msra.mxu1 %v2250_v1  ;;  %1322 = vmatpush.bf16.msra.mxu3 %v2210_v25 }
 0x795   :  { %1336 = vmatpush.bf16.msrb.mxu0 %v2214_v27 }
 0x797   :  { %1349 = vmatpush.bf16.msra.mxu1 %v2234_v13  ;;  %1323 = vmatpush.bf16.msra.mxu3 %v2194_v39 }
 0x799   :  { %1337 = vmatpush.bf16.msrb.mxu0 %v2198_v40 }
 0x79b   :  { %1350 = vmatpush.bf16.msra.mxu1 %v2218_v33 }
 0x79f   :  { %1351 = vmatpush.bf16.msra.mxu1 %v2202_v45 }
 0x7f9   :  { %v1059_v15 = vpop.xlane.xlu0 %1058 }
 0x7fa   :  { %v1063_v20 = vmul.f32 %v1059_v15, %v2965_v10 }
 0x7fc   :  { %v1065_v32 = vadd.f32 1e-06, %v1063_v20 }
 0x7fe   :  { %2620 = vrsqrt.f32 %v1065_v32  ;;  %vm1073_vm0 = vweird.f32 %v1065_v32 }
 0x803   :  { %v1062_v47 = vpop.xlane.xlu2 %1061 }
 0x804   :  { %v2621_v48 = vpop.eup %2620  ;;  %v1064_v50 = vmul.f32 %v1062_v47, %v2965_v10  ;;  %v2579_v10 = vld [vmem:[#allocation10] ss:$0 sm:$0xff] }
 0x805   :  { %v1068_v51 = vmul.f32 %v2621_v48, %v1065_v32  ;;  %vm1074_vm15 = vweird.f32 %v2621_v48 }
 0x806   :  { %v1066_v49 = vadd.f32 1e-06, %v1064_v50  ;;  %vm1075_vm1 = vmor %vm1073_vm0, %vm1074_vm15 }
 0x807   :  { %v1069_v41 = vmul.f32 %v2621_v48, %v1068_v51 }
 0x808   :  { %2622 = vrsqrt.f32 %v1066_v49  ;;  %vm1083_vm3 = vweird.f32 %v1066_v49 }
 0x809   :  { %v1070_v52 = vmul.f32 0.5, %v1069_v41 }
 0x80b   :  { %v1071_v53 = vsub.f32 1.5, %v1070_v52 }
 0x80d   :  { %v1072_v56 = vmul.f32 %v2621_v48, %v1071_v53 }
 0x80e   :  { %v2623_v54 = vpop.eup %2622 }
 0x80f   :  { %v1078_v43 = vmul.f32 %v2623_v54, %v1066_v49  ;;  %v1076_v59 = vsel %vm1075_vm1, %v2621_v48, %v1072_v56  ;;  %vm1084_vm2 = vweird.f32 %v2623_v54 }
 0x810   :  { %v1087_v62 = vmul.f32 %v1076_v59, %v3261_v61  ;;  %vm1085_vm4 = vmor %vm1083_vm3, %vm1084_vm2  ;;  %v3471_v61 = vld [vmem:[%s3948_s10] sm:$0xf] }
 0x811   :  { %v1079_v58 = vmul.f32 %v2623_v54, %v1078_v43  ;;  %v1136_v7 = vperm.slane %v3471_v61, 2  ;;  %v1137_v57 = vperm.slane %v3471_v61, 3  ;;  %v1134_v12 = vperm.slane %v3471_v61, 0 }
 0x812   :  { %v1092_v1 = vmul.f32 %v2579_v10, %v1087_v62  ;;  %v1135_v17 = vperm.slane %v3471_v61, 1  ;;  %v2541_v61 = vld [vmem:[%s3949_s11 + $0xd0] sm:$0xff] }
 0x813   :  { %v1080_v60 = vmul.f32 0.5, %v1079_v58 }
 0x814   :  { %v1097_v5 = vadd.f32 %v2580_v3, %v1092_v1 }
 0x815   :  { %v1081_v2 = vsub.f32 1.5, %v1080_v60 }
 0x817   :  { %v1082_v63 = vmul.f32 %v2623_v54, %v1081_v2 }
 0x819   :  { %v1086_v46 = vsel %vm1085_vm4, %v2623_v54, %v1082_v63 }
 0x81a   :  { %v1088_v14 = vmul.f32 %v1086_v46, %v3267_v0 }
 0x81c   :  { %v1093_v4 = vmul.f32 %v2579_v10, %v1088_v14 }
 0x81e   :  { %v1098_v6 = vadd.f32 %v2580_v3, %v1093_v4 }
 0x820   :  { %v1099_v16 = vpack.c.bf16 %v1098_v6, %v1097_v5 }
 0x822   :  { %1310 = vmatmul.bf16.vlgmr.msrb.gmra.mxu2 %v1099_v16  ;;  %1324 = vmatmul.bf16.vlgmr.msra.gmra.mxu3 %v1099_v16 }
 0x823   :  { %1338 = vmatmul.bf16.vlgmr.msrb.gmra.mxu0 %v1099_v16  ;;  %1352 = vmatmul.bf16.vlgmr.msra.gmra.mxu1 %v1099_v16 }
 0x8a0   :  { %v1339_v0 = vpop.f32.mrf.mxu0  ;;  %v1353_v8 = vpop.f32.mrf.mxu1 }
 0x8a1   :  { %v3475_v9 = vadd.f32 %v1339_v0, %v1136_v7  ;;  %v3479_v11 = vadd.f32 %v1353_v8, %v1137_v57 }
 0x8a3   :  { %v3483_v13 = vmul.f32 0.70710677, %v3475_v9  ;;  %v3486_v15 = vmul.f32 0.70710677, %v3479_v11 }
 0x8a5   :  { %v1454_v18 = vmul.f32 %v3483_v13, %v3483_v13  ;;  %v1494_v19 = vmul.f32 %v3486_v15, %v3486_v15  ;;  %v1311_v20 = vpop.f32.mrf.mxu2  ;;  %v1325_v22 = vpop.f32.mrf.mxu3 }
 0x8a6   :  { %v3495_v21 = vadd.f32 %v1311_v20, %v1134_v12  ;;  %v3503_v25 = vadd.f32 %v1325_v22, %v1135_v17 }
 0x8a7   :  { %v3497_v23 = vmin.f32 %v1454_v18, 16.0  ;;  %v3499_v24 = vmin.f32 %v1494_v19, 16.0 }
 0x8a8   :  { %v3506_v27 = vmul.f32 0.70710677, %v3495_v21  ;;  %v3515_v34 = vmul.f32 0.70710677, %v3503_v25  ;;  %v1341_v53 = vpop.f32.mrf.mxu0 }
 0x8a9   :  { %v1467_v29 = vmul.f32 3.8918573e-05, %v3497_v23  ;;  %v1456_v30 = vmul.f32 2.1237322e-06, %v3497_v23  ;;  %v1496_v31 = vmul.f32 2.1237322e-06, %v3499_v24  ;;  %v3533_v2 = vadd.f32 %v1341_v53, %v1136_v7 }
 0x8aa   :  { %v1507_v32 = vmul.f32 3.8918573e-05, %v3499_v24  ;;  %v1374_v33 = vmul.f32 %v3506_v27, %v3506_v27  ;;  %v1414_v45 = vmul.f32 %v3515_v34, %v3515_v34 }
 0x8ab   :  { %v1468_v28 = vadd.f32 0.001143296, %v1467_v29  ;;  %v1457_v38 = vadd.f32 0.00028619796, %v1456_v30  ;;  %v1497_v39 = vadd.f32 0.00028619796, %v1496_v31  ;;  %v1355_v29 = vpop.f32.mrf.mxu1 }
 0x8ac   :  { %v1508_v35 = vadd.f32 0.001143296, %v1507_v32  ;;  %v3517_v36 = vmin.f32 %v1374_v33, 16.0  ;;  %v3529_v56 = vmin.f32 %v1414_v45, 16.0  ;;  %v3540_v5 = vmul.f32 0.70710677, %v3533_v2 }
 0x8ad   :  { %v1469_v37 = vmul.f32 %v1468_v28, %v3497_v23  ;;  %v1458_v51 = vmul.f32 %v1457_v38, %v3497_v23  ;;  %v1498_v49 = vmul.f32 %v1497_v39, %v3499_v24 }
 0x8ae   :  { %v1509_v40 = vmul.f32 %v1508_v35, %v3499_v24  ;;  %v1387_v42 = vmul.f32 3.8918573e-05, %v3517_v36  ;;  %v1376_v60 = vmul.f32 2.1237322e-06, %v3517_v36  ;;  %v1416_v14 = vmul.f32 2.1237322e-06, %v3529_v56 }
 0x8af   :  { %v1470_v44 = vadd.f32 0.014752088, %v1469_v37  ;;  %v1459_v62 = vadd.f32 0.0036580483, %v1458_v51  ;;  %v1499_v10 = vadd.f32 0.0036580483, %v1498_v49  ;;  %v1614_v22 = vmul.f32 %v3540_v5, %v3540_v5 }
 0x8b0   :  { %v1510_v47 = vadd.f32 0.014752088, %v1509_v40  ;;  %v1388_v48 = vadd.f32 0.001143296, %v1387_v42  ;;  %v1377_v4 = vadd.f32 0.00028619796, %v1376_v60  ;;  %v3556_v37 = vadd.f32 %v1355_v29, %v1137_v57 }
 0x8b1   :  { %v1471_v50 = vmul.f32 %v1470_v44, %v3497_v23  ;;  %v1460_v6 = vmul.f32 %v1459_v62, %v3497_v23  ;;  %v1500_v16 = vmul.f32 %v1499_v10, %v3499_v24  ;;  %v1417_v0 = vadd.f32 0.00028619796, %v1416_v14 }
 0x8b2   :  { %v1511_v41 = vmul.f32 %v1510_v47, %v3499_v24  ;;  %v1389_v52 = vmul.f32 %v1388_v48, %v3517_v36  ;;  %v1427_v8 = vmul.f32 3.8918573e-05, %v3529_v56  ;;  %v1378_v20 = vmul.f32 %v1377_v4, %v3517_v36 }
 0x8b3   :  { %v1472_v54 = vadd.f32 0.112945676, %v1471_v50  ;;  %v1461_v30 = vadd.f32 0.05243302, %v1460_v6  ;;  %v1501_v31 = vadd.f32 0.05243302, %v1500_v16  ;;  %v1418_v33 = vmul.f32 %v1417_v0, %v3529_v56  ;;  %v1313_v50 = vpop.f32.mrf.mxu2 }
 0x8b4   :  { %v1512_v43 = vadd.f32 0.112945676, %v1511_v41  ;;  %v1390_v58 = vadd.f32 0.014752088, %v1389_v52  ;;  %v1428_v28 = vadd.f32 0.001143296, %v1427_v8 }
 0x8b5   :  { %v1473_v59 = vmul.f32 %v1472_v54, %v3497_v23  ;;  %v1379_v38 = vadd.f32 0.0036580483, %v1378_v20  ;;  %v3558_v39 = vmin.f32 %v1614_v22, 16.0  ;;  %v1462_v40 = vmul.f32 %v1461_v30, %v3497_v23 }
 0x8b6   :  { %v1513_v46 = vmul.f32 %v1512_v43, %v3499_v24  ;;  %v1391_v1 = vmul.f32 %v1390_v58, %v3517_v36  ;;  %v1502_v42 = vmul.f32 %v1501_v31, %v3499_v24  ;;  %v1419_v45 = vadd.f32 0.0036580483, %v1418_v33 }
 0x8b7   :  { %v1474_v63 = vadd.f32 0.4994258, %v1473_v59  ;;  %v1429_v47 = vmul.f32 %v1428_v28, %v3529_v56  ;;  %v1616_v48 = vmul.f32 2.1237322e-06, %v3558_v39  ;;  %v1627_v49 = vmul.f32 3.8918573e-05, %v3558_v39 }
 0x8b8   :  { %v1514_v7 = vadd.f32 0.4994258, %v1513_v46  ;;  %v1392_v19 = vadd.f32 0.112945676, %v1391_v1  ;;  %v3568_v57 = vmul.f32 0.70710677, %v3556_v37  ;;  %v1380_v41 = vmul.f32 %v1379_v38, %v3517_v36 }
 0x8b9   :  { %v1475_v3 = vmul.f32 %v1474_v63, %v3497_v23  ;;  %v1463_v53 = vadd.f32 0.18741608, %v1462_v40  ;;  %v3575_v54 = vadd.f32 %v1313_v50, %v1134_v12  ;;  %v1503_v43 = vadd.f32 0.18741608, %v1502_v42 }
 0x8ba   :  { %v1515_v32 = vmul.f32 %v1514_v7, %v3499_v24  ;;  %v1393_v35 = vmul.f32 %v1392_v19, %v3517_v36  ;;  %v1420_v58 = vmul.f32 %v1419_v45, %v3529_v56  ;;  %v1430_v59 = vadd.f32 0.014752088, %v1429_v47 }
 0x8bb   :  { %v3545_v18 = vadd.f32 1.0, %v1475_v3  ;;  %v1617_v60 = vadd.f32 0.00028619796, %v1616_v48  ;;  %v1628_v10 = vadd.f32 0.001143296, %v1627_v49  ;;  %v1654_v63 = vmul.f32 %v3568_v57, %v3568_v57 }
 0x8bc   :  { %v3562_v44 = vadd.f32 1.0, %v1515_v32  ;;  %v1394_v51 = vadd.f32 0.4994258, %v1393_v35  ;;  %v1381_v14 = vadd.f32 0.05243302, %v1380_v41  ;;  %v1464_v12 = vmul.f32 %v1463_v53, %v3497_v23 }
 0x8bd   :  { %2624 = vrcp.f32 %v3545_v18  ;;  %v1618_v1 = vmul.f32 %v1617_v60, %v3558_v39  ;;  %v1504_v3 = vmul.f32 %v1503_v43, %v3499_v24  ;;  %v1421_v4 = vadd.f32 0.05243302, %v1420_v58  ;;  %v2538_v43 = vld [vmem:[%s3949_s11 + $0xb8] sm:$0xff] }
 0x8be   :  { %2626 = vrcp.f32 %v3562_v44  ;;  %v1395_v62 = vmul.f32 %v1394_v51, %v3517_v36  ;;  %v1629_v6 = vmul.f32 %v1628_v10, %v3558_v39  ;;  %v1431_v7 = vmul.f32 %v1430_v59, %v3529_v56  ;;  %2002 = vmatpush.bf16.msra.mxu0 %v2538_v43  ;;  %v1327_v43 = vpop.f32.mrf.mxu3 }
 0x8bf   :  { %v3591_v0 = vmin.f32 %v1654_v63, 16.0  ;;  %v3594_v8 = vmul.f32 0.70710677, %v3575_v54  ;;  %v3597_v19 = vmul.f32 0.5, %v3475_v9  ;;  %v1382_v20 = vmul.f32 %v1381_v14, %v3517_v36 }
 0x8c0   :  { %v3588_v16 = vadd.f32 1.0, %v1395_v62  ;;  %v1465_v24 = vadd.f32 1.1283791, %v1464_v12  ;;  %v3603_v29 = vmul.f32 0.5, %v3479_v11  ;;  %v3606_v30 = vmul.f32 0.5, %v3533_v2 }
 0x8c1   :  { %v1619_v31 = vadd.f32 0.0036580483, %v1618_v1  ;;  %v1486_v32 = vand.u32 2147483647, %v3545_v18  ;;  %v1505_v33 = vadd.f32 1.1283791, %v1504_v3  ;;  %v3610_v28 = vmul.f32 %v1421_v4, %v3529_v56 }
 0x8c2   :  { %v1630_v9 = vadd.f32 0.014752088, %v1629_v6  ;;  %2628 = vrcp.f32 %v3588_v16  ;;  %v1432_v35 = vadd.f32 0.112945676, %v1431_v7  ;;  %v1656_v38 = vmul.f32 2.1237322e-06, %v3591_v0 }
 0x8c3   :  { %v3571_v52 = vpop.eup %2624  ;;  %v1534_v11 = vmul.f32 %v3594_v8, %v3594_v8  ;;  %v1383_v42 = vadd.f32 0.18741608, %v1382_v20  ;;  %v3621_v47 = vmul.f32 %v1465_v24, %v3483_v13  ;;  %v1620_v48 = vmul.f32 %v1619_v31, %v3558_v39  ;;  %v2546_v13 = vld [vmem:[%s3949_s11 + $0xf8] sm:$0xff]  ;;  %v2537_v20 = vld [vmem:[%s3949_s11 + $0xb0] sm:$0xff] }
 0x8c4   :  { %v1478_v46 = vmul.f32 %v3571_v52, %v3545_v18  ;;  %v3600_v22 = vpop.eup %2626  ;;  %v1631_v45 = vmul.f32 %v1630_v9, %v3558_v39  ;;  %v1667_v50 = vmul.f32 3.8918573e-05, %v3591_v0  ;;  %vm1482_vm5 = vweird.f32 %v3545_v18  ;;  %2016 = vmatpush.bf16.msrb.mxu1 %v2546_v13  ;;  %2003 = vmatpush.bf16.msra.mxu0 %v2537_v20  ;;  %v2536_v13 = vld [vmem:[%s3949_s11 + $0xa8] sm:$0xff] }
 0x8c5   :  { %v1518_v2 = vmul.f32 %v3600_v22, %v3562_v44  ;;  %v3625_v51 = vmin.f32 %v1534_v11, 16.0  ;;  %v1488_v49 = vand.u32 2147483648, %v3545_v18  ;;  %v3630_v41 = vmul.f32 %v1505_v33, %v3486_v15  ;;  %v2545_v18 = vld [vmem:[%s3949_s11 + $0xf0] sm:$0xff] }
 0x8c6   :  { %v1479_v23 = vsub.f32 1.0, %v1478_v46  ;;  %v1657_v53 = vadd.f32 0.00028619796, %v1656_v38  ;;  %vm3638_vm6 = vcmp.eq.f32.partialorder %v1486_v32, 8.507059e+37  ;;  %v1526_v59 = vand.u32 2147483647, %v3562_v44 }
 0x8c7   :  { %v1433_v60 = vmul.f32 %v1432_v35, %v3529_v56  ;;  %v1632_v62 = vadd.f32 0.112945676, %v1631_v45  ;;  %vm1483_vm7 = vweird.f32 %v3571_v52  ;;  %v1519_v10 = vsub.f32 1.0, %v1518_v2  ;;  %v2530_v2 = vld [vmem:[%s3949_s11 + $0x78] sm:$0xff] }
 0x8c8   :  { %v1480_v40 = vmul.f32 %v3571_v52, %v1479_v23  ;;  %v1528_v63 = vand.u32 2147483648, %v3562_v44  ;;  %v3647_v46 = vpop.eup %2628  ;;  %v1621_v14 = vadd.f32 0.05243302, %v1620_v48  ;;  %v1668_v1 = vadd.f32 0.001143296, %v1667_v50  ;;  %vm3662_vm9 = vmor %vm1482_vm5, %vm1483_vm7  ;;  %2017 = vmatpush.bf16.msrb.mxu1 %v2545_v18  ;;  %1988 = vmatpush.bf16.msrb.mxu3 %v2530_v2  ;;  %v2528_v2 = vld [vmem:[%s3949_s11 + $0x68] sm:$0xff] }
 0x8c9   :  { %v1633_v12 = vmul.f32 %v1632_v62, %v3558_v39  ;;  %v1536_v3 = vmul.f32 2.1237322e-06, %v3625_v51  ;;  %v1489_v4 = vor.u32 1.1754944e-38, %v1488_v49  ;;  %vm1522_vm8 = vweird.f32 %v3562_v44  ;;  %2004 = vmatpush.bf16.msra.mxu0 %v2536_v13 }
 0x8ca   :  { %v1481_v15 = vadd.f32 %v3571_v52, %v1480_v40  ;;  %v1384_v6 = vmul.f32 %v1383_v42, %v3517_v36  ;;  %v1658_v7 = vmul.f32 %v1657_v53, %v3591_v0  ;;  %v1547_v23 = vmul.f32 3.8918573e-05, %v3625_v51  ;;  %v2522_v40 = vld [vmem:[%s3949_s11 + $0x38] sm:$0xff] }
 0x8cb   :  { %v1434_v31 = vadd.f32 0.4994258, %v1433_v60  ;;  %v1634_v32 = vadd.f32 0.4994258, %v1633_v12  ;;  %v1669_v36 = vmul.f32 %v1668_v1, %v3591_v0  ;;  %v1537_v33 = vadd.f32 0.00028619796, %v1536_v3  ;;  %1974 = vmatpush.bf16.msra.mxu2 %v2522_v40 }
 0x8cc   :  { %v1485_v9 = vsel %vm3662_vm9, %v3571_v52, %v1481_v15  ;;  %v1520_v35 = vmul.f32 %v3600_v22, %v1519_v10  ;;  %v1398_v38 = vmul.f32 %v3647_v46, %v3588_v16  ;;  %v1548_v11 = vadd.f32 0.001143296, %v1547_v23  ;;  %v2544_v60 = vld [vmem:[%s3949_s11 + $0xe8] sm:$0xff]  ;;  %v2529_v23 = vld [vmem:[%s3949_s11 + $0x70] sm:$0xff] }
 0x8cd   :  { %v1622_v52 = vmul.f32 %v1621_v14, %v3558_v39  ;;  %v1635_v42 = vmul.f32 %v1634_v32, %v3558_v39  ;;  %v1670_v45 = vadd.f32 0.014752088, %v1669_v36  ;;  %v1538_v48 = vmul.f32 %v1537_v33, %v3625_v51  ;;  %2018 = vmatpush.bf16.msrb.mxu1 %v2544_v60  ;;  %v2535_v33 = vld [vmem:[%s3949_s11 + $0xa0] sm:$0xff]  ;;  %1989 = vmatpush.bf16.msrb.mxu3 %v2529_v23  ;;  %v2520_v40 = vld [vmem:[%s3949_s11 + $0x28] sm:$0xff] }
 0x8ce   :  { %vm1523_vm10 = vweird.f32 %v3600_v22  ;;  %vm3686_vm11 = vcmp.eq.f32.partialorder %v1526_v59, 8.507059e+37  ;;  %v1659_v49 = vadd.f32 0.0036580483, %v1658_v7  ;;  %v1549_v53 = vmul.f32 %v1548_v11, %v3625_v51  ;;  %v2521_v7 = vld [vmem:[%s3949_s11 + $0x30] sm:$0xff]  ;;  %2005 = vmatpush.bf16.msra.mxu0 %v2535_v33 }
 0x8cf   :  { %v1408_v62 = vand.u32 2147483648, %v3588_v16  ;;  %v1435_v59 = vmul.f32 %v1434_v31, %v3529_v56  ;;  %v3699_v15 = vadd.f32 1.0, %v1635_v42  ;;  %v1671_v10 = vmul.f32 %v1670_v45, %v3591_v0  ;;  %1975 = vmatpush.bf16.msra.mxu2 %v2521_v7  ;;  %vm3726_vm12 = vmor %vm1522_vm8, %vm1523_vm10  ;;  %v2533_v33 = vld [vmem:[%s3949_s11 + $0x90] sm:$0xff] }
 0x8d0   :  { %v1490_v14 = vsel %vm3638_vm6, %v1489_v4, %v1485_v9  ;;  %v1521_v12 = vadd.f32 %v3600_v22, %v1520_v35  ;;  %v1539_v1 = vadd.f32 0.0036580483, %v1538_v48  ;;  %v1550_v3 = vadd.f32 0.014752088, %v1549_v53  ;;  %v2543_v35 = vld [vmem:[%s3949_s11 + $0xe0] sm:$0xff] }
 0x8d1   :  { %v1399_v20 = vsub.f32 1.0, %v1398_v38  ;;  %v1623_v24 = vadd.f32 0.18741608, %v1622_v52  ;;  %2630 = vrcp.f32 %v3699_v15  ;;  %v3714_v58 = vadd.f32 %v1327_v43, %v1135_v17  ;;  %2019 = vmatpush.bf16.msrb.mxu1 %v2543_v35  ;;  %1990 = vmatpush.bf16.msrb.mxu3 %v2528_v2 }
 0x8d2   :  { %v1529_v4 = vor.u32 1.1754944e-38, %v1528_v63  ;;  %v3716_v31 = vadd.f32 1.1283791, %v1384_v6  ;;  %v1660_v32 = vmul.f32 %v1659_v49, %v3591_v0  ;;  %v1672_v36 = vadd.f32 0.112945676, %v1671_v10  ;;  %v2534_v49 = vld [vmem:[%s3949_s11 + $0x98] sm:$0xff] }
 0x8d3   :  { %v1406_v17 = vand.u32 2147483647, %v3588_v16  ;;  %v3731_v63 = vor.u32 1.1754944e-38, %v1408_v62  ;;  %v3733_v6 = vadd.f32 1.0, %v1435_v59  ;;  %v1551_v9 = vmul.f32 %v1550_v3, %v3625_v51  ;;  %1976 = vmatpush.bf16.msra.mxu2 %v2520_v40  ;;  %2006 = vmatpush.bf16.msra.mxu0 %v2534_v49  ;;  %v2518_v40 = vld [vmem:[%s3949_s11 + $0x18] sm:$0xff]  ;;  %v2539_v59 = vld [vmem:[%s3949_s11 + $0xc0] sm:$0xff] }
 0x8d4   :  { %v3740_v38 = vmul.f32 %v1490_v14, %v3621_v47  ;;  %v1525_v44 = vsel %vm3726_vm12, %v3600_v22, %v1521_v12  ;;  %v1673_v11 = vmul.f32 %v1672_v36, %v3591_v0  ;;  %v1540_v18 = vmul.f32 %v1539_v1, %v3625_v51  ;;  %v2519_v12 = vld [vmem:[%s3949_s11 + $0x20] sm:$0xff] }
 0x8d5   :  { %v1400_v47 = vmul.f32 %v3647_v46, %v1399_v20  ;;  %v1624_v52 = vmul.f32 %v1623_v24, %v3558_v39  ;;  %v1552_v42 = vadd.f32 0.112945676, %v1551_v9  ;;  %v3756_v22 = vmul.f32 0.70710677, %v3714_v58  ;;  %v2542_v39 = vld [vmem:[%s3949_s11 + $0xd8] sm:$0xff]  ;;  %v2527_v1 = vld [vmem:[%s3949_s11 + $0x60] sm:$0xff] }
 0x8d6   :  { %vm1402_vm13 = vweird.f32 %v3588_v16  ;;  %vm1403_vm14 = vweird.f32 %v3647_v46  ;;  %v1661_v45 = vadd.f32 0.05243302, %v1660_v32  ;;  %v1674_v48 = vadd.f32 0.4994258, %v1673_v11  ;;  %2020 = vmatpush.bf16.msrb.mxu1 %v2542_v39  ;;  %1991 = vmatpush.bf16.msrb.mxu3 %v2527_v1  ;;  %v2526_v16 = vld [vmem:[%s3949_s11 + $0x58] sm:$0xff] }
 0x8d7   :  { %v3766_v53 = vpop.eup %2630  ;;  %v1530_v43 = vsel %vm3686_vm11, %v1529_v4, %v1525_v44  ;;  %2632 = vrcp.f32 %v3733_v6  ;;  %v1553_v13 = vmul.f32 %v1552_v42, %v3625_v51  ;;  %v1574_v60 = vmul.f32 %v3756_v22, %v3756_v22  ;;  %1977 = vmatpush.bf16.msra.mxu2 %v2519_v12  ;;  %vm3809_vm0 = vmor %vm1402_vm13, %vm1403_vm14  ;;  %2007 = vmatpush.bf16.msra.mxu0 %v2533_v33 }
 0x8d8   :  { %v2317_v62 = vclamps-f32 %v3740_v38, 1.0  ;;  %vm3775_vm15 = vcmp.eq.f32.partialorder %v1406_v17, 8.507059e+37  ;;  %v1638_v10 = vmul.f32 %v3766_v53, %v3699_v15  ;;  %v1675_v50 = vmul.f32 %v1674_v48, %v3591_v0 }
 0x8d9   :  { %v1541_v14 = vadd.f32 0.05243302, %v1540_v18  ;;  %v1401_v3 = vadd.f32 %v3647_v46, %v1400_v47  ;;  %v1625_v7 = vadd.f32 1.1283791, %v1624_v52  ;;  %v1554_v23 = vadd.f32 0.4994258, %v1553_v13 }
 0x8da   :  { %v3789_v20 = vmin.f32 %v1574_v60, 16.0  ;;  %v1639_v24 = vsub.f32 1.0, %v1638_v10  ;;  %v1646_v4 = vand.u32 2147483647, %v3699_v15  ;;  %v1662_v32 = vmul.f32 %v1661_v45, %v3591_v0  ;;  %2021 = vmatpush.bf16.msrb.mxu1 %v2541_v61  ;;  %1992 = vmatpush.bf16.msrb.mxu3 %v2526_v16 }
 0x8db   :  { %v3793_v36 = vadd.f32 1.0, %v1675_v50  ;;  %v1648_v17 = vand.u32 2147483648, %v3699_v15  ;;  %v1555_v9 = vmul.f32 %v1554_v23, %v3625_v51  ;;  %vm1643_vm1 = vweird.f32 %v3766_v53  ;;  %1978 = vmatpush.bf16.msra.mxu2 %v2518_v40 }
 0x8dc   :  { %v1576_v35 = vmul.f32 2.1237322e-06, %v3789_v20  ;;  %v1587_v38 = vmul.f32 3.8918573e-05, %v3789_v20  ;;  %v1640_v11 = vmul.f32 %v3766_v53, %v1639_v24  ;;  %v1542_v18 = vmul.f32 %v1541_v14, %v3625_v51 }
 0x8dd   :  { %2634 = vrcp.f32 %v3793_v36  ;;  %v3823_v2 = vpop.eup %2632  ;;  %v3826_v47 = vmul.f32 %v1530_v43, %v3630_v41  ;;  %v1405_v52 = vsel %vm3809_vm0, %v3647_v46, %v1401_v3  ;;  %v3831_v42 = vadd.f32 1.0, %v1555_v9  ;;  %v2532_v41 = vld [vmem:[%s3949_s11 + $0x88] sm:$0xff] }
 0x8de   :  { %v1577_v45 = vadd.f32 0.00028619796, %v1576_v35  ;;  %v1641_v48 = vadd.f32 %v3766_v53, %v1640_v11  ;;  %vm1642_vm2 = vweird.f32 %v3699_v15  ;;  %v1663_v49 = vadd.f32 0.18741608, %v1662_v32  ;;  %v2540_v43 = vld [vmem:[%s3949_s11 + $0xc8] sm:$0xff]  ;;  %2008 = vmatpush.bf16.msra.mxu0 %v2532_v41 }
 0x8df   :  { %v1588_v39 = vadd.f32 0.001143296, %v1587_v38  ;;  %v1696_v46 = vadd.f32 1.0, %v2317_v62  ;;  %v1626_v13 = vmul.f32 %v1625_v7, %v3540_v5  ;;  %vm1644_vm3 = vmor %vm1642_vm2, %vm1643_vm1  ;;  %v1649_v60 = vor.u32 1.1754944e-38, %v1648_v17  ;;  %v2517_v62 = vld [vmem:[%s3949_s11 + $0x10] sm:$0xff]  ;;  %2022 = vmatpush.bf16.msrb.mxu1 %v2540_v43  ;;  %v2516_v9 = vld [vmem:[%s3949_s11 + $0x8] sm:$0xff] }
 0x8e0   :  { %2636 = vrcp.f32 %v3831_v42  ;;  %v1645_v15 = vsel %vm1644_vm3, %v3766_v53, %v1641_v48  ;;  %vm1647_vm4 = vcmp.eq.f32.partialorder %v1646_v4, 8.507059e+37  ;;  %v1543_v10 = vadd.f32 0.18741608, %v1542_v18  ;;  %v2525_v5 = vld [vmem:[%s3949_s11 + $0x50] sm:$0xff]  ;;  %1979 = vmatpush.bf16.msra.mxu2 %v2517_v62  ;;  %v2515_v43 = vld [vmem:[%s3949_s11] sm:$0xff] }
 0x8e1   :  { %v1578_v50 = vmul.f32 %v1577_v45, %v3789_v20  ;;  %v1410_v14 = vsel %vm3775_vm15, %v3731_v63, %v1405_v52  ;;  %v3858_v53 = vmul.f32 %v3823_v2, %v3733_v6  ;;  %v1650_v12 = vsel %vm1647_vm4, %v1649_v60, %v1645_v15  ;;  %v2531_v63 = vld [vmem:[%s3949_s11 + $0x80] sm:$0xff]  ;;  %1993 = vmatpush.bf16.msrb.mxu3 %v2525_v5 }
 0x8e2   :  { %v1589_v1 = vmul.f32 %v1588_v39, %v3789_v20  ;;  %v1386_v7 = vmul.f32 %v3716_v31, %v3506_v27  ;;  %v3864_v23 = vadd.f32 0.18741608, %v3610_v28  ;;  %v1651_v24 = vmul.f32 %v1650_v12, %v1626_v13  ;;  %2009 = vmatpush.bf16.msra.mxu0 %v2531_v63 }
 0x8e3   :  { %v2635_v3 = vpop.eup %2634  ;;  %v1664_v4 = vmul.f32 %v1663_v49, %v3591_v0  ;;  %v1704_v32 = vmul.f32 %v1696_v46, %v3597_v19  ;;  %v2318_v27 = vclamps-f32 %v3826_v47, 1.0  ;;  %v1544_v61 = vmul.f32 %v1543_v10, %v3625_v51  ;;  %v2524_v19 = vld [vmem:[%s3949_s11 + $0x48] sm:$0xff]  ;;  %2023 = vmatpush.bf16.msrb.mxu1 %v2539_v59  ;;  %v2523_v46 = vld [vmem:[%s3949_s11 + $0x40] sm:$0xff] }
 0x8e4   :  { %v1678_v28 = vmul.f32 %v2635_v3, %v3793_v36  ;;  %v1590_v31 = vadd.f32 0.014752088, %v1589_v1  ;;  %v3876_v33 = vmul.f32 %v1410_v14, %v1386_v7  ;;  %v2321_v0 = vclamps-f32 %v1651_v24, 1.0  ;;  %1980 = vmatpush.bf16.msra.mxu2 %v2516_v9 }
 0x8e5   :  { %v1579_v17 = vadd.f32 0.0036580483, %v1578_v50  ;;  %v1439_v38 = vsub.f32 1.0, %v3858_v53  ;;  %v1688_v11 = vand.u32 2147483648, %v3793_v36  ;;  %v1665_v51 = vadd.f32 1.1283791, %v1664_v4  ;;  %1994 = vmatpush.bf16.msrb.mxu3 %v2524_v19 }
 0x8e6   :  { %v2637_v35 = vpop.eup %2636  ;;  %v1679_v44 = vsub.f32 1.0, %v1678_v28  ;;  %v1591_v18 = vmul.f32 %v1590_v31, %v3789_v20  ;;  %v1700_v40 = vadd.f32 1.0, %v2321_v0  ;;  %vm1682_vm5 = vweird.f32 %v3793_v36 }
 0x8e7   :  { %v1558_v16 = vmul.f32 %v2637_v35, %v3831_v42  ;;  %vm1683_vm6 = vweird.f32 %v2635_v3  ;;  %v1686_v52 = vand.u32 2147483647, %v3793_v36  ;;  %v1545_v49 = vadd.f32 1.1283791, %v1544_v61 }
 0x8e8   :  { %v1680_v47 = vmul.f32 %v2635_v3, %v1679_v44  ;;  %v1592_v45 = vadd.f32 0.112945676, %v1591_v18  ;;  %v1708_v48 = vmul.f32 %v1700_v40, %v3606_v30  ;;  %v1580_v41 = vmul.f32 %v1579_v17, %v3789_v20  ;;  %vm1684_vm7 = vmor %vm1682_vm5, %vm1683_vm6  ;;  %1981 = vmatpush.bf16.msra.mxu2 %v2515_v43 }
 0x8e9   :  { %v1559_v39 = vsub.f32 1.0, %v1558_v16  ;;  %v1689_v60 = vor.u32 1.1754944e-38, %v1688_v11  ;;  %v1568_v15 = vand.u32 2147483648, %v3831_v42  ;;  %vm1563_vm8 = vweird.f32 %v2637_v35  ;;  %1995 = vmatpush.bf16.msrb.mxu3 %v2523_v46 }
 0x8ea   :  { %v1681_v13 = vadd.f32 %v2635_v3, %v1680_v47  ;;  %v1593_v10 = vmul.f32 %v1592_v45, %v3789_v20  ;;  %v1712_v50 = vpack.c.bf16 %v1708_v48, %v1704_v32  ;;  %v1566_v62 = vand.u32 2147483647, %v3831_v42 }
 0x8eb   :  { %v1560_v30 = vmul.f32 %v2637_v35, %v1559_v39  ;;  %v1666_v5 = vmul.f32 %v1665_v51, %v3568_v57  ;;  %vm1687_vm9 = vcmp.eq.f32.partialorder %v1686_v52, 8.507059e+37  ;;  %vm1562_vm10 = vweird.f32 %v3831_v42 }
 0x8ec   :  { %v1685_v14 = vsel %vm1684_vm7, %v2635_v3, %v1681_v13  ;;  %v1594_v53 = vadd.f32 0.4994258, %v1593_v10  ;;  %v1581_v7 = vadd.f32 0.05243302, %v1580_v41  ;;  %2010 = vmatmul.bf16.vlgmr.msra.gmra.mxu0 %v1712_v50  ;;  %v1440_v36 = vmul.f32 %v3823_v2, %v1439_v38  ;;  %vm1564_vm11 = vmor %vm1562_vm10, %vm1563_vm8 }
 0x8ed   :  { %v1690_v12 = vsel %vm1687_vm9, %v1689_v60, %v1685_v14  ;;  %v1561_v1 = vadd.f32 %v2637_v35, %v1560_v30  ;;  %v1569_v4 = vor.u32 1.1754944e-38, %v1568_v15  ;;  %v2315_v57 = vclamps-f32 %v3876_v33, 1.0 }
 0x8ee   :  { %v1691_v24 = vmul.f32 %v1690_v12, %v1666_v5  ;;  %v1595_v63 = vmul.f32 %v1594_v53, %v3789_v20  ;;  %v1546_v3 = vmul.f32 %v1545_v49, %v3594_v8  ;;  %vm1567_vm12 = vcmp.eq.f32.partialorder %v1566_v62, 8.507059e+37 }
 0x8ef   :  { %v1565_v59 = vsel %vm1564_vm11, %v2637_v35, %v1561_v1  ;;  %v1697_v32 = vadd.f32 1.0, %v2318_v27  ;;  %v1424_v0 = vmul.f32 %v3864_v23, %v3529_v56  ;;  %v1365_v61 = vmul.f32 0.5, %v3556_v37 }
 0x8f0   :  { %v2322_v28 = vclamps-f32 %v1691_v24, 1.0  ;;  %v1570_v31 = vsel %vm1567_vm12, %v1569_v4, %v1565_v59  ;;  %v1596_v42 = vadd.f32 1.0, %v1595_v63  ;;  %v1582_v9 = vmul.f32 %v1581_v7, %v3789_v20  ;;  %v2581_v4 = vld [vmem:[#allocation13] ss:$0 sm:$0xff] }
 0x8f1   :  { %v1571_v17 = vmul.f32 %v1570_v31, %v1546_v3  ;;  %v1441_v19 = vadd.f32 %v3823_v2, %v1440_v36  ;;  %vm1443_vm13 = vweird.f32 %v3823_v2  ;;  %v1694_v8 = vadd.f32 1.0, %v2315_v57 }
 0x8f2   :  { %v1701_v33 = vadd.f32 1.0, %v2322_v28  ;;  %2638 = vrcp.f32 %v1596_v42  ;;  %v1448_v27 = vand.u32 2147483648, %v3733_v6  ;;  %v1705_v38 = vmul.f32 %v1697_v32, %v3603_v29 }
 0x8f3   :  { %v2319_v35 = vclamps-f32 %v1571_v17, 1.0  ;;  %vm1442_vm14 = vweird.f32 %v3733_v6  ;;  %v1446_v56 = vand.u32 2147483647, %v3733_v6  ;;  %v1358_v23 = vmul.f32 0.5, %v3495_v21 }
 0x8f4   :  { %v1709_v37 = vmul.f32 %v1701_v33, %v1365_v61  ;;  %vm1444_vm15 = vmor %vm1442_vm14, %vm1443_vm13  ;;  %v1362_v44 = vmul.f32 0.5, %v3575_v54  ;;  %v1583_v18 = vadd.f32 0.18741608, %v1582_v9  ;;  %v1425_v40 = vadd.f32 1.1283791, %v1424_v0 }
 0x8f5   :  { %v1698_v11 = vadd.f32 1.0, %v2319_v35  ;;  %v1445_v51 = vsel %vm1444_vm15, %v3823_v2, %v1441_v19  ;;  %v1702_v47 = vmul.f32 %v1694_v8, %v1358_v23  ;;  %v1449_v52 = vor.u32 1.1754944e-38, %v1448_v27 }
 0x8f6   :  { %v1713_v16 = vpack.c.bf16 %v1709_v37, %v1705_v38  ;;  %vm1447_vm0 = vcmp.eq.f32.partialorder %v1446_v56, 8.507059e+37  ;;  %v1584_v49 = vmul.f32 %v1583_v18, %v3789_v20  ;;  %v1426_v39 = vmul.f32 %v1425_v40, %v3515_v34 }
 0x8f7   :  { %v1706_v45 = vmul.f32 %v1698_v11, %v1362_v44  ;;  %v1450_v48 = vsel %vm1447_vm0, %v1449_v52, %v1445_v51  ;;  %v1608_v43 = vand.u32 2147483648, %v1596_v42  ;;  %v1606_v13 = vand.u32 2147483647, %v1596_v42 }
 0x8f8   :  { %v2639_v29 = vpop.eup %2638  ;;  %2024 = vmatmul.bf16.vlgmr.msrb.gmra.mxu1 %v1713_v16  ;;  %v1451_v41 = vmul.f32 %v1450_v48, %v1426_v39  ;;  %v1585_v46 = vadd.f32 1.1283791, %v1584_v49  ;;  %vm1602_vm2 = vweird.f32 %v1596_v42  ;;  %v1359_v14 = vmul.f32 0.5, %v3503_v25 }
 0x8f9   :  { %v1710_v6 = vpack.c.bf16 %v1706_v45, %v1702_v47  ;;  %v1598_v21 = vmul.f32 %v2639_v29, %v1596_v42  ;;  %vm1603_vm1 = vweird.f32 %v2639_v29  ;;  %v1609_v15 = vor.u32 1.1754944e-38, %v1608_v43 }
 0x8fa   :  { %vm1604_vm3 = vmor %vm1602_vm2, %vm1603_vm1  ;;  %v2316_v10 = vclamps-f32 %v1451_v41, 1.0  ;;  %v1586_v50 = vmul.f32 %v1585_v46, %v3756_v22  ;;  %vm1607_vm4 = vcmp.eq.f32.partialorder %v1606_v13, 8.507059e+37  ;;  %v1363_v53 = vmul.f32 0.5, %v3714_v58 }
 0x8fb   :  { %v1599_v54 = vsub.f32 1.0, %v1598_v21  ;;  %1982 = vmatmul.bf16.vlgmr.msra.gmra.mxu2 %v1710_v6 }
 0x8fc   :  { %v1695_v34 = vadd.f32 1.0, %v2316_v10 }
 0x8fd   :  { %v1600_v2 = vmul.f32 %v2639_v29, %v1599_v54 }
 0x8fe   :  { %v1703_v1 = vmul.f32 %v1695_v34, %v1359_v14 }
 0x8ff   :  { %v1601_v60 = vadd.f32 %v2639_v29, %v1600_v2 }
 0x901   :  { %v1605_v30 = vsel %vm1604_vm3, %v2639_v29, %v1601_v60 }
 0x902   :  { %v1610_v20 = vsel %vm1607_vm4, %v1609_v15, %v1605_v30 }
 0x903   :  { %v1611_v62 = vmul.f32 %v1610_v20, %v1586_v50 }
 0x905   :  { %v2320_v5 = vclamps-f32 %v1611_v62, 1.0 }
 0x907   :  { %v1699_v12 = vadd.f32 1.0, %v2320_v5 }
 0x909   :  { %v1707_v7 = vmul.f32 %v1699_v12, %v1363_v53 }
 0x90b   :  { %v1711_v36 = vpack.c.bf16 %v1707_v7, %v1703_v1 }
 0x90d   :  { %1996 = vmatmul.bf16.vlgmr.msrb.gmra.mxu3 %v1711_v36 }
 0x969   :  { %v2011_v57 = vpop.f32.mrf.mxu0 }
 0x971   :  { %v2013_v61 = vpop.f32.mrf.mxu0 }
 0x975   :  { %v2025_v59 = vpop.f32.mrf.mxu1 }
 0x97d   :  { %v2027_v9 = vpop.f32.mrf.mxu1 }
 0x97e   :  { %v1983_v24 = vpop.f32.mrf.mxu2 }
 0x97f   :  { %v1984_v63 = vadd.f32 %v2581_v4, %v1983_v24 }
 0x986   :  { %v1985_v32 = vpop.f32.mrf.mxu2 }
 0x987   :  { %v1986_v42 = vadd.f32 %v2581_v4, %v1985_v32 }
 0x990   :  { %v1997_v22 = vpop.f32.mrf.mxu3 }
 0x991   :  { %v1998_v3 = vadd.f32 %v1997_v22, %v1984_v63 }
 0x993   :  { %v2012_v28 = vadd.f32 %v2011_v57, %v1998_v3 }
 0x995   :  { %v2026_v31 = vadd.f32 %v2025_v59, %v2012_v28 }
 0x997   :  { %v2030_v25 = vadd.f32 %v2026_v31, %v3251_v55 }
 0x998   :  { %v1999_v0 = vpop.f32.mrf.mxu3 }
 0x999   :  { %2032 = vst [vmem:[%s3951_s13] sm:$0xff] %v2030_v25  ;;  %v2000_v58 = vadd.f32 %v1999_v0, %v1986_v42 }
 0x99b   :  { %v2014_v17 = vadd.f32 %v2013_v61, %v2000_v58 }
 0x99d   :  { %v2028_v19 = vadd.f32 %v2027_v9, %v2014_v17 }
 0x99f   :  { %v2031_v33 = vadd.f32 %v2028_v19, %v3255_v26 }
 0x9a1   :  { %2033 = vst [vmem:[%s3951_s13 + $0x8] sm:$0x3] %v2031_v33 }
 0x9a2   :  { %2038 = vsyncpa [#allocation3], 1 }
 0x9a3   :  { %2039 = vsyncpa [#allocation5], 1 }
 0x9a4   :  { %2040 = vsyncpa [#allocation8], 1 }
 0x9a5   :  { %2041 = vsyncpa [#allocation11], 1 }
 0x9a6   :  { %2042 = vsyncpa [#allocation14], 1 }

</bundles_post_ra>
